<compile_context>
chip_gen: v7x
topology: tpu7x:2x2x1
jax: 0.10.0
libtpu: 0.0.40
codegen_flags: <defaults>
</compile_context>

<pallas_src>
import functools

import jax
import jax.numpy as jnp
from jax.experimental import pallas as pl
from jax.experimental.pallas import tpu as pltpu

BN_EPS = 1e-5


def _vmem_limit_bytes():
    """~3/4 of physical VMEM, capped at 96 MiB (v5e/v6e: 128 MiB physical,
    v7x: 64 MiB); conservative 48 MiB fallback if the query is unavailable."""
    try:
        cap = pltpu.get_tpu_info().vmem_capacity_bytes
        return int(min(cap * 3 // 4, 96 * 1024 * 1024))
    except Exception:
        return 48 * 1024 * 1024


# ----------------------------------------------------------------------------
# Pallas kernel: implicit-GEMM stride-1 "VALID" conv, fused shift + activation
# ----------------------------------------------------------------------------
def _conv_kernel(x_ref, w_ref, shift_ref, o_ref, patch_ref, *,
                 kh, kw, oh, ow, act):
    cin = x_ref.shape[-1]
    # ---- in-VMEM patch formation (implicit GEMM, no HBM im2col) -------------
    # x_ref[0] : (oh+kh-1, ow+kw-1, cin); tap (a, b) of output row y is the
    # contiguous slice x_ref[0, y+a, b:b+ow, :] -> (ow, cin).
    taps = [(a, b) for a in range(kh) for b in range(kw)]
    for y in range(oh):
        for t, (a, b) in enumerate(taps):
            patch_ref[y * ow:(y + 1) * ow, t * cin:(t + 1) * cin] = (
                x_ref[0, y + a, b:b + ow, :])
    # ---- fused matmul + per-channel shift + activation (f32 epilogue) -------
    acc = jnp.dot(patch_ref[...], w_ref[...],
                  preferred_element_type=jnp.float32)
    acc = acc + shift_ref[...]
    if act == "relu":
        acc = jnp.maximum(acc, 0.0)
    elif act == "tanh":
        acc = jnp.tanh(acc)
    o_ref[0] = acc.astype(o_ref.dtype)


def conv_stride1_fused(x, wmat, shift, *, kh, kw, act,
                       out_dtype=jnp.bfloat16):
    """Implicit-GEMM stride-1 VALID conv + fused shift + activation.

    x:     (N, oh+kh-1, ow+kw-1, Cin)   activation (already padded / s2d'd)
    wmat:  (kh*kw*Cin, OC)              K ordered (tap_row, tap_col, cin)
    shift: (1, OC)                      f32 per-output-channel shift
    returns (N, oh*ow, OC).
    """
    n, hin, win, cin = x.shape
    oh, ow = hin - kh + 1, win - kw + 1
    k, oc = wmat.shape
    assert k == kh * kw * cin
    m = oh * ow

    kern = functools.partial(_conv_kernel, kh=kh, kw=kw, oh=oh, ow=ow, act=act)
    return pl.pallas_call(
        kern,
        out_shape=jax.ShapeDtypeStruct((n, m, oc), out_dtype),
        grid_spec=pltpu.PrefetchScalarGridSpec(
            num_scalar_prefetch=0,
            grid=(n,),
            in_specs=[
                pl.BlockSpec((1, hin, win, cin), lambda i: (i, 0, 0, 0)),
                pl.BlockSpec((k, oc), lambda i: (0, 0)),
                pl.BlockSpec((1, oc), lambda i: (0, 0)),
            ],
            out_specs=pl.BlockSpec((1, m, oc), lambda i: (i, 0, 0)),
            scratch_shapes=[pltpu.VMEM((m, k), jnp.bfloat16)],
        ),
        compiler_params=pltpu.CompilerParams(
            dimension_semantics=("parallel",),
            vmem_limit_bytes=_vmem_limit_bytes(),
        ),
    )(x.astype(jnp.bfloat16), wmat.astype(jnp.bfloat16),
      shift.astype(jnp.float32))


# ----------------------------------------------------------------------------
# XLA-side 1x-data layout helpers + weight-matrix construction
# ----------------------------------------------------------------------------
def _pad_hw(x, p):
    return jnp.pad(x, ((0, 0), (p, p), (p, p), (0, 0)))


def _space_to_depth2(x):
    """(N, H, W, C) -> (N, H/2, W/2, 4C); channel order (row-par a, col-par b, c)."""
    n, h, w, c = x.shape
    z = x.reshape(n, h // 2, 2, w // 2, 2, c)
    z = jnp.transpose(z, (0, 1, 3, 2, 4, 5))
    return z.reshape(n, h // 2, w // 2, 4 * c)


def _enc_weight_matrix(w, scale):
    """PyTorch Conv2d(k=4, s=2, p=1) weight (OC, IC, 4, 4) -> GEMM weight for
    the equivalent k=2 s=1 conv on the space-to-depth input.

    Returns (16*IC, OC); K ordered (tap_row ta, tap_col tb, row-par a,
    col-par b, ic) matching the s2d channel order (a, b, ic)."""
    oc, ic, _, _ = w.shape
    e = w.reshape(oc, ic, 2, 2, 2, 2)            # (oc, ic, ta, a, tb, b)
    e = jnp.transpose(e, (2, 4, 3, 5, 1, 0))     # (ta, tb, a, b, ic, oc)
    return e.reshape(16 * ic, oc).astype(jnp.float32) * scale.reshape(1, -1)


def _deconv_weight_matrix(w, scale):
    """PyTorch ConvTranspose2d(k=4, s=2, p=1) weight (IC, OC, 4, 4) ->
    sub-pixel stride-1 3x3 GEMM weight (9*IC, 4*OC); pre-depth-to-space channel
    order is (row-parity ph, col-parity pw, oc).  Assumes output_padding=0."""
    ic, oc, kh, kw = w.shape
    assert (kh, kw) == (4, 4), "sub-pixel decomposition specialized to k=4,s=2,p=1"
    w_eq = jnp.zeros((2, 2, oc, ic, 3, 3), jnp.float32)
    for ph in range(2):
        for a in range(2):
            th = a + ph
            kh_i = (3 - 2 * a) if ph == 0 else (2 - 2 * a)
            for pw in range(2):
                for b in range(2):
                    tw = b + pw
                    kw_i = (3 - 2 * b) if pw == 0 else (2 - 2 * b)
                    w_eq = w_eq.at[ph, pw, :, :, th, tw].set(
                        w[:, :, kh_i, kw_i].T.astype(jnp.float32))
    w_eq = w_eq.reshape(4 * oc, ic, 3, 3)        # channel = ph*2*oc + pw*oc + c
    wmat = jnp.transpose(w_eq, (2, 3, 1, 0)).reshape(9 * ic, 4 * oc)
    scale4 = jnp.tile(scale.reshape(-1), 4).reshape(1, -1)
    return wmat * scale4


def _fold_bn(bias, gamma, beta, mean, var):
    s = gamma / jnp.sqrt(var + BN_EPS)
    return s, (bias - mean) * s + beta


# ----------------------------------------------------------------------------
# Parameter construction (deterministic, synthetic) and forward pass
# ----------------------------------------------------------------------------
def init_params(key):
    ks = jax.random.split(key, 16)

    def nrm(k, shape, s):
        return jax.random.normal(k, shape, jnp.float32) * s

    p = {}
    # encoder
    p["w1"] = nrm(ks[0], (64, 2, 4, 4), 0.08)
    p["b1"] = nrm(ks[1], (64,), 0.02)
    p["w2"] = nrm(ks[2], (128, 64, 4, 4), 0.03)
    p["b2"] = nrm(ks[3], (128,), 0.02)
    p["bn2_g"] = 1.0 + nrm(ks[4], (128,), 0.05)
    p["bn2_b"] = nrm(ks[5], (128,), 0.02)
    p["bn2_m"] = nrm(ks[6], (128,), 0.02)
    p["bn2_v"] = 1.0 + jnp.abs(nrm(ks[7], (128,), 0.05))
    # decoder
    p["wd1"] = nrm(ks[8], (128, 64, 4, 4), 0.03)     # ConvTranspose: (IC, OC, KH, KW)
    p["bd1"] = nrm(ks[9], (64,), 0.02)
    p["bn3_g"] = 1.0 + nrm(ks[10], (64,), 0.05)
    p["bn3_b"] = nrm(ks[11], (64,), 0.02)
    p["bn3_m"] = nrm(ks[12], (64,), 0.02)
    p["bn3_v"] = 1.0 + jnp.abs(nrm(ks[13], (64,), 0.05))
    p["wd2"] = nrm(ks[14], (64, 1, 4, 4), 0.05)      # ConvTranspose: (IC, OC, KH, KW)
    p["bd2"] = nrm(ks[15], (1,), 0.02)
    return p


def generator_forward(params, xray, ct):
    """xray, ct: NCHW (N, 1, H, W) float32 -> output NCHW (N, 1, H, W) float32."""
    # TODO(synk): training-mode dropout(p=0.3) on `ct` is not applied (eval fwd).
    p = params
    n, _, h, w = xray.shape
    h2, w2 = h // 2, w // 2
    h4, w4 = h // 4, w // 4

    x = jnp.concatenate([xray, ct], axis=1)              # (N, 2, H, W)
    x = jnp.transpose(x, (0, 2, 3, 1)).astype(jnp.bfloat16)   # NHWC, bf16

    # ---- encoder: Conv(2->64, k4 s2 p1) + ReLU ------------------------------
    wm1 = _enc_weight_matrix(p["w1"], jnp.ones((64,), jnp.float32))
    z = _space_to_depth2(_pad_hw(x, 1))                   # (N, H/2+1, W/2+1, 8)
    x = conv_stride1_fused(z, wm1, p["b1"].reshape(1, -1), kh=2, kw=2, act="relu")
    x = x.reshape(n, h2, w2, 64)

    # ---- encoder: Conv(64->128, k4 s2 p1) + BN + ReLU (BN folded) -----------
    s2, sh2 = _fold_bn(p["b2"], p["bn2_g"], p["bn2_b"], p["bn2_m"], p["bn2_v"])
    wm2 = _enc_weight_matrix(p["w2"], s2)
    z = _space_to_depth2(_pad_hw(x, 1))                   # (N, H/4+1, W/4+1, 256)
    x = conv_stride1_fused(z, wm2, sh2.reshape(1, -1), kh=2, kw=2, act="relu")
    x = x.reshape(n, h4, w4, 128)

    # ---- decoder: ConvT(128->64, k4 s2 p1) + BN + ReLU (sub-pixel) ----------
    s3, sh3 = _fold_bn(p["bd1"], p["bn3_g"], p["bn3_b"], p["bn3_m"], p["bn3_v"])
    wmd1 = _deconv_weight_matrix(p["wd1"], s3)
    sh3_4 = jnp.tile(sh3.reshape(-1), 4).reshape(1, -1)
    x = conv_stride1_fused(_pad_hw(x, 1), wmd1, sh3_4, kh=3, kw=3, act="relu")
    # depth-to-space (XLA 1x-data layout op): (n,h4,w4,2,2,64) -> (n,h2,w2,64)
    # TODO(synk): fold this D2S into the next layer's in-kernel patch indexing.
    x = x.reshape(n, h4, w4, 2, 2, 64)
    x = jnp.transpose(x, (0, 1, 3, 2, 4, 5)).reshape(n, h2, w2, 64)

    # ---- decoder: ConvT(64->1, k4 s2 p1) + Tanh (sub-pixel) -----------------
    wmd2 = _deconv_weight_matrix(p["wd2"], jnp.ones((1,), jnp.float32))
    shd2 = jnp.tile(p["bd2"].reshape(-1), 4).reshape(1, -1)
    y = conv_stride1_fused(_pad_hw(x, 1), wmd2, shd2, kh=3, kw=3, act="tanh",
                           out_dtype=jnp.float32)
    # sub-pixel reassembly of the tiny 1-channel output straight into NCHW.
    y = y.reshape(n, h2, w2, 2, 2)                        # (n, y, x, ph, pw)
    y = jnp.transpose(y, (0, 1, 3, 2, 4))                 # (n, y, ph, x, pw)
    return y.reshape(n, 1, h, w)


if __name__ == "__main__":
    key = jax.random.PRNGKey(0)
    kp, kx, kc = jax.random.split(key, 3)

    params = init_params(kp)
    xray = jax.random.normal(kx, (2, 1, 16, 16), jnp.float32)
    ct = jax.random.normal(kc, (2, 1, 16, 16), jnp.float32)

    fwd = jax.jit(generator_forward)
    out = fwd(params, xray, ct)
    out = jax.block_until_ready(out)
    assert out.shape == (2, 1, 16, 16), out.shape
    assert bool(jnp.all(jnp.isfinite(out)))
    print("KERNEL_OK")
</pallas_src>

<mosaic_0001>
module attributes {stable_mosaic.version = 11 : i64} {
  func.func @_conv_kernel(%arg0: i32, %arg1: memref<1x9x9x8xbf16, #tpu.memory_space<vmem>>, %arg2: memref<32x64xbf16, #tpu.memory_space<vmem>>, %arg3: memref<1x64xf32, #tpu.memory_space<vmem>>, %arg4: memref<1x64x64xbf16, #tpu.memory_space<vmem>>, %arg5: memref<64x32xbf16, #tpu.memory_space<vmem>>) attributes {dimension_semantics = [#tpu.dimension_semantics<parallel>], iteration_bounds = array<i64: 2>, scalar_prefetch = 0 : i64, scratch_operands = 1 : i64, tpu.core_type = #tpu.core_type<tc>, window_params = [{transform_indices = @transform_0, window_bounds = array<i64: 1, 9, 9, 8>}, {pipeline_mode = #tpu.pipeline_mode<synchronous>, transform_indices = @transform_1, window_bounds = array<i64: 32, 64>}, {pipeline_mode = #tpu.pipeline_mode<synchronous>, transform_indices = @transform_2, window_bounds = array<i64: 1, 64>}, {transform_indices = @transform_3, window_bounds = array<i64: 1, 64, 64>}]} {
    %c0 = arith.constant 0 : index
    %c0_0 = arith.constant 0 : index
    %c0_1 = arith.constant 0 : index
    %c0_2 = arith.constant 0 : index
    %0 = vector.load %arg1[%c0, %c0_0, %c0_1, %c0_2] : memref<1x9x9x8xbf16, #tpu.memory_space<vmem>>, vector<1x1x8x8xbf16>
    %1 = vector.shape_cast %0 : vector<1x1x8x8xbf16> to vector<8x8xbf16>
    %c0_3 = arith.constant 0 : index
    %c0_4 = arith.constant 0 : index
    %2 = vector.load %arg5[%c0_3, %c0_4] : memref<64x32xbf16, #tpu.memory_space<vmem>>, vector<8x8xbf16>
    tpu.vector_store %arg5[%c0_3, %c0_4], %1 {strides = array<i32>} : memref<64x32xbf16, #tpu.memory_space<vmem>>, vector<8x8xbf16>,
    %c0_5 = arith.constant 0 : index
    %c0_6 = arith.constant 0 : index
    %c1 = arith.constant 1 : index
    %c0_7 = arith.constant 0 : index
    %3 = vector.load %arg1[%c0_5, %c0_6, %c1, %c0_7] : memref<1x9x9x8xbf16, #tpu.memory_space<vmem>>, vector<1x1x8x8xbf16>
    %4 = vector.shape_cast %3 : vector<1x1x8x8xbf16> to vector<8x8xbf16>
    %c0_8 = arith.constant 0 : index
    %c8 = arith.constant 8 : index
    %5 = vector.load %arg5[%c0_8, %c8] : memref<64x32xbf16, #tpu.memory_space<vmem>>, vector<8x8xbf16>
    tpu.vector_store %arg5[%c0_8, %c8], %4 {strides = array<i32>} : memref<64x32xbf16, #tpu.memory_space<vmem>>, vector<8x8xbf16>,
    %c0_9 = arith.constant 0 : index
    %c1_10 = arith.constant 1 : index
    %c0_11 = arith.constant 0 : index
    %c0_12 = arith.constant 0 : index
    %6 = vector.load %arg1[%c0_9, %c1_10, %c0_11, %c0_12] : memref<1x9x9x8xbf16, #tpu.memory_space<vmem>>, vector<1x1x8x8xbf16>
    %7 = vector.shape_cast %6 : vector<1x1x8x8xbf16> to vector<8x8xbf16>
    %c0_13 = arith.constant 0 : index
    %c16 = arith.constant 16 : index
    %8 = vector.load %arg5[%c0_13, %c16] : memref<64x32xbf16, #tpu.memory_space<vmem>>, vector<8x8xbf16>
    tpu.vector_store %arg5[%c0_13, %c16], %7 {strides = array<i32>} : memref<64x32xbf16, #tpu.memory_space<vmem>>, vector<8x8xbf16>,
    %c0_14 = arith.constant 0 : index
    %c1_15 = arith.constant 1 : index
    %c1_16 = arith.constant 1 : index
    %c0_17 = arith.constant 0 : index
    %9 = vector.load %arg1[%c0_14, %c1_15, %c1_16, %c0_17] : memref<1x9x9x8xbf16, #tpu.memory_space<vmem>>, vector<1x1x8x8xbf16>
    %10 = vector.shape_cast %9 : vector<1x1x8x8xbf16> to vector<8x8xbf16>
    %c0_18 = arith.constant 0 : index
    %c24 = arith.constant 24 : index
    %11 = vector.load %arg5[%c0_18, %c24] : memref<64x32xbf16, #tpu.memory_space<vmem>>, vector<8x8xbf16>
    tpu.vector_store %arg5[%c0_18, %c24], %10 {strides = array<i32>} : memref<64x32xbf16, #tpu.memory_space<vmem>>, vector<8x8xbf16>,
    %c0_19 = arith.constant 0 : index
    %c1_20 = arith.constant 1 : index
    %c0_21 = arith.constant 0 : index
    %c0_22 = arith.constant 0 : index
    %12 = vector.load %arg1[%c0_19, %c1_20, %c0_21, %c0_22] : memref<1x9x9x8xbf16, #tpu.memory_space<vmem>>, vector<1x1x8x8xbf16>
    %13 = vector.shape_cast %12 : vector<1x1x8x8xbf16> to vector<8x8xbf16>
    %c8_23 = arith.constant 8 : index
    %c0_24 = arith.constant 0 : index
    %14 = vector.load %arg5[%c8_23, %c0_24] : memref<64x32xbf16, #tpu.memory_space<vmem>>, vector<8x8xbf16>
    tpu.vector_store %arg5[%c8_23, %c0_24], %13 {strides = array<i32>} : memref<64x32xbf16, #tpu.memory_space<vmem>>, vector<8x8xbf16>,
    %c0_25 = arith.constant 0 : index
    %c1_26 = arith.constant 1 : index
    %c1_27 = arith.constant 1 : index
    %c0_28 = arith.constant 0 : index
    %15 = vector.load %arg1[%c0_25, %c1_26, %c1_27, %c0_28] : memref<1x9x9x8xbf16, #tpu.memory_space<vmem>>, vector<1x1x8x8xbf16>
    %16 = vector.shape_cast %15 : vector<1x1x8x8xbf16> to vector<8x8xbf16>
    %c8_29 = arith.constant 8 : index
    %c8_30 = arith.constant 8 : index
    %17 = vector.load %arg5[%c8_29, %c8_30] : memref<64x32xbf16, #tpu.memory_space<vmem>>, vector<8x8xbf16>
    tpu.vector_store %arg5[%c8_29, %c8_30], %16 {strides = array<i32>} : memref<64x32xbf16, #tpu.memory_space<vmem>>, vector<8x8xbf16>,
    %c0_31 = arith.constant 0 : index
    %c2 = arith.constant 2 : index
    %c0_32 = arith.constant 0 : index
    %c0_33 = arith.constant 0 : index
    %18 = vector.load %arg1[%c0_31, %c2, %c0_32, %c0_33] : memref<1x9x9x8xbf16, #tpu.memory_space<vmem>>, vector<1x1x8x8xbf16>
    %19 = vector.shape_cast %18 : vector<1x1x8x8xbf16> to vector<8x8xbf16>
    %c8_34 = arith.constant 8 : index
    %c16_35 = arith.constant 16 : index
    %20 = vector.load %arg5[%c8_34, %c16_35] : memref<64x32xbf16, #tpu.memory_space<vmem>>, vector<8x8xbf16>
    tpu.vector_store %arg5[%c8_34, %c16_35], %19 {strides = array<i32>} : memref<64x32xbf16, #tpu.memory_space<vmem>>, vector<8x8xbf16>,
    %c0_36 = arith.constant 0 : index
    %c2_37 = arith.constant 2 : index
    %c1_38 = arith.constant 1 : index
    %c0_39 = arith.constant 0 : index
    %21 = vector.load %arg1[%c0_36, %c2_37, %c1_38, %c0_39] : memref<1x9x9x8xbf16, #tpu.memory_space<vmem>>, vector<1x1x8x8xbf16>
    %22 = vector.shape_cast %21 : vector<1x1x8x8xbf16> to vector<8x8xbf16>
    %c8_40 = arith.constant 8 : index
    %c24_41 = arith.constant 24 : index
    %23 = vector.load %arg5[%c8_40, %c24_41] : memref<64x32xbf16, #tpu.memory_space<vmem>>, vector<8x8xbf16>
    tpu.vector_store %arg5[%c8_40, %c24_41], %22 {strides = array<i32>} : memref<64x32xbf16, #tpu.memory_space<vmem>>, vector<8x8xbf16>,
    %c0_42 = arith.constant 0 : index
    %c2_43 = arith.constant 2 : index
    %c0_44 = arith.constant 0 : index
    %c0_45 = arith.constant 0 : index
    %24 = vector.load %arg1[%c0_42, %c2_43, %c0_44, %c0_45] : memref<1x9x9x8xbf16, #tpu.memory_space<vmem>>, vector<1x1x8x8xbf16>
    %25 = vector.shape_cast %24 : vector<1x1x8x8xbf16> to vector<8x8xbf16>
    %c16_46 = arith.constant 16 : index
    %c0_47 = arith.constant 0 : index
    %26 = vector.load %arg5[%c16_46, %c0_47] : memref<64x32xbf16, #tpu.memory_space<vmem>>, vector<8x8xbf16>
    tpu.vector_store %arg5[%c16_46, %c0_47], %25 {strides = array<i32>} : memref<64x32xbf16, #tpu.memory_space<vmem>>, vector<8x8xbf16>,
    %c0_48 = arith.constant 0 : index
    %c2_49 = arith.constant 2 : index
    %c1_50 = arith.constant 1 : index
    %c0_51 = arith.constant 0 : index
    %27 = vector.load %arg1[%c0_48, %c2_49, %c1_50, %c0_51] : memref<1x9x9x8xbf16, #tpu.memory_space<vmem>>, vector<1x1x8x8xbf16>
    %28 = vector.shape_cast %27 : vector<1x1x8x8xbf16> to vector<8x8xbf16>
    %c16_52 = arith.constant 16 : index
    %c8_53 = arith.constant 8 : index
    %29 = vector.load %arg5[%c16_52, %c8_53] : memref<64x32xbf16, #tpu.memory_space<vmem>>, vector<8x8xbf16>
    tpu.vector_store %arg5[%c16_52, %c8_53], %28 {strides = array<i32>} : memref<64x32xbf16, #tpu.memory_space<vmem>>, vector<8x8xbf16>,
    %c0_54 = arith.constant 0 : index
    %c3 = arith.constant 3 : index
    %c0_55 = arith.constant 0 : index
    %c0_56 = arith.constant 0 : index
    %30 = vector.load %arg1[%c0_54, %c3, %c0_55, %c0_56] : memref<1x9x9x8xbf16, #tpu.memory_space<vmem>>, vector<1x1x8x8xbf16>
    %31 = vector.shape_cast %30 : vector<1x1x8x8xbf16> to vector<8x8xbf16>
    %c16_57 = arith.constant 16 : index
    %c16_58 = arith.constant 16 : index
    %32 = vector.load %arg5[%c16_57, %c16_58] : memref<64x32xbf16, #tpu.memory_space<vmem>>, vector<8x8xbf16>
    tpu.vector_store %arg5[%c16_57, %c16_58], %31 {strides = array<i32>} : memref<64x32xbf16, #tpu.memory_space<vmem>>, vector<8x8xbf16>,
    %c0_59 = arith.constant 0 : index
    %c3_60 = arith.constant 3 : index
    %c1_61 = arith.constant 1 : index
    %c0_62 = arith.constant 0 : index
    %33 = vector.load %arg1[%c0_59, %c3_60, %c1_61, %c0_62] : memref<1x9x9x8xbf16, #tpu.memory_space<vmem>>, vector<1x1x8x8xbf16>
    %34 = vector.shape_cast %33 : vector<1x1x8x8xbf16> to vector<8x8xbf16>
    %c16_63 = arith.constant 16 : index
    %c24_64 = arith.constant 24 : index
    %35 = vector.load %arg5[%c16_63, %c24_64] : memref<64x32xbf16, #tpu.memory_space<vmem>>, vector<8x8xbf16>
    tpu.vector_store %arg5[%c16_63, %c24_64], %34 {strides = array<i32>} : memref<64x32xbf16, #tpu.memory_space<vmem>>, vector<8x8xbf16>,
    %c0_65 = arith.constant 0 : index
    %c3_66 = arith.constant 3 : index
    %c0_67 = arith.constant 0 : index
    %c0_68 = arith.constant 0 : index
    %36 = vector.load %arg1[%c0_65, %c3_66, %c0_67, %c0_68] : memref<1x9x9x8xbf16, #tpu.memory_space<vmem>>, vector<1x1x8x8xbf16>
    %37 = vector.shape_cast %36 : vector<1x1x8x8xbf16> to vector<8x8xbf16>
    %c24_69 = arith.constant 24 : index
    %c0_70 = arith.constant 0 : index
    %38 = vector.load %arg5[%c24_69, %c0_70] : memref<64x32xbf16, #tpu.memory_space<vmem>>, vector<8x8xbf16>
    tpu.vector_store %arg5[%c24_69, %c0_70], %37 {strides = array<i32>} : memref<64x32xbf16, #tpu.memory_space<vmem>>, vector<8x8xbf16>,
    %c0_71 = arith.constant 0 : index
    %c3_72 = arith.constant 3 : index
    %c1_73 = arith.constant 1 : index
    %c0_74 = arith.constant 0 : index
    %39 = vector.load %arg1[%c0_71, %c3_72, %c1_73, %c0_74] : memref<1x9x9x8xbf16, #tpu.memory_space<vmem>>, vector<1x1x8x8xbf16>
    %40 = vector.shape_cast %39 : vector<1x1x8x8xbf16> to vector<8x8xbf16>
    %c24_75 = arith.constant 24 : index
    %c8_76 = arith.constant 8 : index
    %41 = vector.load %arg5[%c24_75, %c8_76] : memref<64x32xbf16, #tpu.memory_space<vmem>>, vector<8x8xbf16>
    tpu.vector_store %arg5[%c24_75, %c8_76], %40 {strides = array<i32>} : memref<64x32xbf16, #tpu.memory_space<vmem>>, vector<8x8xbf16>,
    %c0_77 = arith.constant 0 : index
    %c4 = arith.constant 4 : index
    %c0_78 = arith.constant 0 : index
    %c0_79 = arith.constant 0 : index
    %42 = vector.load %arg1[%c0_77, %c4, %c0_78, %c0_79] : memref<1x9x9x8xbf16, #tpu.memory_space<vmem>>, vector<1x1x8x8xbf16>
    %43 = vector.shape_cast %42 : vector<1x1x8x8xbf16> to vector<8x8xbf16>
    %c24_80 = arith.constant 24 : index
    %c16_81 = arith.constant 16 : index
    %44 = vector.load %arg5[%c24_80, %c16_81] : memref<64x32xbf16, #tpu.memory_space<vmem>>, vector<8x8xbf16>
    tpu.vector_store %arg5[%c24_80, %c16_81], %43 {strides = array<i32>} : memref<64x32xbf16, #tpu.memory_space<vmem>>, vector<8x8xbf16>,
    %c0_82 = arith.constant 0 : index
    %c4_83 = arith.constant 4 : index
    %c1_84 = arith.constant 1 : index
    %c0_85 = arith.constant 0 : index
    %45 = vector.load %arg1[%c0_82, %c4_83, %c1_84, %c0_85] : memref<1x9x9x8xbf16, #tpu.memory_space<vmem>>, vector<1x1x8x8xbf16>
    %46 = vector.shape_cast %45 : vector<1x1x8x8xbf16> to vector<8x8xbf16>
    %c24_86 = arith.constant 24 : index
    %c24_87 = arith.constant 24 : index
    %47 = vector.load %arg5[%c24_86, %c24_87] : memref<64x32xbf16, #tpu.memory_space<vmem>>, vector<8x8xbf16>
    tpu.vector_store %arg5[%c24_86, %c24_87], %46 {strides = array<i32>} : memref<64x32xbf16, #tpu.memory_space<vmem>>, vector<8x8xbf16>,
    %c0_88 = arith.constant 0 : index
    %c4_89 = arith.constant 4 : index
    %c0_90 = arith.constant 0 : index
    %c0_91 = arith.constant 0 : index
    %48 = vector.load %arg1[%c0_88, %c4_89, %c0_90, %c0_91] : memref<1x9x9x8xbf16, #tpu.memory_space<vmem>>, vector<1x1x8x8xbf16>
    %49 = vector.shape_cast %48 : vector<1x1x8x8xbf16> to vector<8x8xbf16>
    %c32 = arith.constant 32 : index
    %c0_92 = arith.constant 0 : index
    %50 = vector.load %arg5[%c32, %c0_92] : memref<64x32xbf16, #tpu.memory_space<vmem>>, vector<8x8xbf16>
    tpu.vector_store %arg5[%c32, %c0_92], %49 {strides = array<i32>} : memref<64x32xbf16, #tpu.memory_space<vmem>>, vector<8x8xbf16>,
    %c0_93 = arith.constant 0 : index
    %c4_94 = arith.constant 4 : index
    %c1_95 = arith.constant 1 : index
    %c0_96 = arith.constant 0 : index
    %51 = vector.load %arg1[%c0_93, %c4_94, %c1_95, %c0_96] : memref<1x9x9x8xbf16, #tpu.memory_space<vmem>>, vector<1x1x8x8xbf16>
    %52 = vector.shape_cast %51 : vector<1x1x8x8xbf16> to vector<8x8xbf16>
    %c32_97 = arith.constant 32 : index
    %c8_98 = arith.constant 8 : index
    %53 = vector.load %arg5[%c32_97, %c8_98] : memref<64x32xbf16, #tpu.memory_space<vmem>>, vector<8x8xbf16>
    tpu.vector_store %arg5[%c32_97, %c8_98], %52 {strides = array<i32>} : memref<64x32xbf16, #tpu.memory_space<vmem>>, vector<8x8xbf16>,
    %c0_99 = arith.constant 0 : index
    %c5 = arith.constant 5 : index
    %c0_100 = arith.constant 0 : index
    %c0_101 = arith.constant 0 : index
    %54 = vector.load %arg1[%c0_99, %c5, %c0_100, %c0_101] : memref<1x9x9x8xbf16, #tpu.memory_space<vmem>>, vector<1x1x8x8xbf16>
    %55 = vector.shape_cast %54 : vector<1x1x8x8xbf16> to vector<8x8xbf16>
    %c32_102 = arith.constant 32 : index
    %c16_103 = arith.constant 16 : index
    %56 = vector.load %arg5[%c32_102, %c16_103] : memref<64x32xbf16, #tpu.memory_space<vmem>>, vector<8x8xbf16>
    tpu.vector_store %arg5[%c32_102, %c16_103], %55 {strides = array<i32>} : memref<64x32xbf16, #tpu.memory_space<vmem>>, vector<8x8xbf16>,
    %c0_104 = arith.constant 0 : index
    %c5_105 = arith.constant 5 : index
    %c1_106 = arith.constant 1 : index
    %c0_107 = arith.constant 0 : index
    %57 = vector.load %arg1[%c0_104, %c5_105, %c1_106, %c0_107] : memref<1x9x9x8xbf16, #tpu.memory_space<vmem>>, vector<1x1x8x8xbf16>
    %58 = vector.shape_cast %57 : vector<1x1x8x8xbf16> to vector<8x8xbf16>
    %c32_108 = arith.constant 32 : index
    %c24_109 = arith.constant 24 : index
    %59 = vector.load %arg5[%c32_108, %c24_109] : memref<64x32xbf16, #tpu.memory_space<vmem>>, vector<8x8xbf16>
    tpu.vector_store %arg5[%c32_108, %c24_109], %58 {strides = array<i32>} : memref<64x32xbf16, #tpu.memory_space<vmem>>, vector<8x8xbf16>,
    %c0_110 = arith.constant 0 : index
    %c5_111 = arith.constant 5 : index
    %c0_112 = arith.constant 0 : index
    %c0_113 = arith.constant 0 : index
    %60 = vector.load %arg1[%c0_110, %c5_111, %c0_112, %c0_113] : memref<1x9x9x8xbf16, #tpu.memory_space<vmem>>, vector<1x1x8x8xbf16>
    %61 = vector.shape_cast %60 : vector<1x1x8x8xbf16> to vector<8x8xbf16>
    %c40 = arith.constant 40 : index
    %c0_114 = arith.constant 0 : index
    %62 = vector.load %arg5[%c40, %c0_114] : memref<64x32xbf16, #tpu.memory_space<vmem>>, vector<8x8xbf16>
    tpu.vector_store %arg5[%c40, %c0_114], %61 {strides = array<i32>} : memref<64x32xbf16, #tpu.memory_space<vmem>>, vector<8x8xbf16>,
    %c0_115 = arith.constant 0 : index
    %c5_116 = arith.constant 5 : index
    %c1_117 = arith.constant 1 : index
    %c0_118 = arith.constant 0 : index
    %63 = vector.load %arg1[%c0_115, %c5_116, %c1_117, %c0_118] : memref<1x9x9x8xbf16, #tpu.memory_space<vmem>>, vector<1x1x8x8xbf16>
    %64 = vector.shape_cast %63 : vector<1x1x8x8xbf16> to vector<8x8xbf16>
    %c40_119 = arith.constant 40 : index
    %c8_120 = arith.constant 8 : index
    %65 = vector.load %arg5[%c40_119, %c8_120] : memref<64x32xbf16, #tpu.memory_space<vmem>>, vector<8x8xbf16>
    tpu.vector_store %arg5[%c40_119, %c8_120], %64 {strides = array<i32>} : memref<64x32xbf16, #tpu.memory_space<vmem>>, vector<8x8xbf16>,
    %c0_121 = arith.constant 0 : index
    %c6 = arith.constant 6 : index
    %c0_122 = arith.constant 0 : index
    %c0_123 = arith.constant 0 : index
    %66 = vector.load %arg1[%c0_121, %c6, %c0_122, %c0_123] : memref<1x9x9x8xbf16, #tpu.memory_space<vmem>>, vector<1x1x8x8xbf16>
    %67 = vector.shape_cast %66 : vector<1x1x8x8xbf16> to vector<8x8xbf16>
    %c40_124 = arith.constant 40 : index
    %c16_125 = arith.constant 16 : index
    %68 = vector.load %arg5[%c40_124, %c16_125] : memref<64x32xbf16, #tpu.memory_space<vmem>>, vector<8x8xbf16>
    tpu.vector_store %arg5[%c40_124, %c16_125], %67 {strides = array<i32>} : memref<64x32xbf16, #tpu.memory_space<vmem>>, vector<8x8xbf16>,
    %c0_126 = arith.constant 0 : index
    %c6_127 = arith.constant 6 : index
    %c1_128 = arith.constant 1 : index
    %c0_129 = arith.constant 0 : index
    %69 = vector.load %arg1[%c0_126, %c6_127, %c1_128, %c0_129] : memref<1x9x9x8xbf16, #tpu.memory_space<vmem>>, vector<1x1x8x8xbf16>
    %70 = vector.shape_cast %69 : vector<1x1x8x8xbf16> to vector<8x8xbf16>
    %c40_130 = arith.constant 40 : index
    %c24_131 = arith.constant 24 : index
    %71 = vector.load %arg5[%c40_130, %c24_131] : memref<64x32xbf16, #tpu.memory_space<vmem>>, vector<8x8xbf16>
    tpu.vector_store %arg5[%c40_130, %c24_131], %70 {strides = array<i32>} : memref<64x32xbf16, #tpu.memory_space<vmem>>, vector<8x8xbf16>,
    %c0_132 = arith.constant 0 : index
    %c6_133 = arith.constant 6 : index
    %c0_134 = arith.constant 0 : index
    %c0_135 = arith.constant 0 : index
    %72 = vector.load %arg1[%c0_132, %c6_133, %c0_134, %c0_135] : memref<1x9x9x8xbf16, #tpu.memory_space<vmem>>, vector<1x1x8x8xbf16>
    %73 = vector.shape_cast %72 : vector<1x1x8x8xbf16> to vector<8x8xbf16>
    %c48 = arith.constant 48 : index
    %c0_136 = arith.constant 0 : index
    %74 = vector.load %arg5[%c48, %c0_136] : memref<64x32xbf16, #tpu.memory_space<vmem>>, vector<8x8xbf16>
    tpu.vector_store %arg5[%c48, %c0_136], %73 {strides = array<i32>} : memref<64x32xbf16, #tpu.memory_space<vmem>>, vector<8x8xbf16>,
    %c0_137 = arith.constant 0 : index
    %c6_138 = arith.constant 6 : index
    %c1_139 = arith.constant 1 : index
    %c0_140 = arith.constant 0 : index
    %75 = vector.load %arg1[%c0_137, %c6_138, %c1_139, %c0_140] : memref<1x9x9x8xbf16, #tpu.memory_space<vmem>>, vector<1x1x8x8xbf16>
    %76 = vector.shape_cast %75 : vector<1x1x8x8xbf16> to vector<8x8xbf16>
    %c48_141 = arith.constant 48 : index
    %c8_142 = arith.constant 8 : index
    %77 = vector.load %arg5[%c48_141, %c8_142] : memref<64x32xbf16, #tpu.memory_space<vmem>>, vector<8x8xbf16>
    tpu.vector_store %arg5[%c48_141, %c8_142], %76 {strides = array<i32>} : memref<64x32xbf16, #tpu.memory_space<vmem>>, vector<8x8xbf16>,
    %c0_143 = arith.constant 0 : index
    %c7 = arith.constant 7 : index
    %c0_144 = arith.constant 0 : index
    %c0_145 = arith.constant 0 : index
    %78 = vector.load %arg1[%c0_143, %c7, %c0_144, %c0_145] : memref<1x9x9x8xbf16, #tpu.memory_space<vmem>>, vector<1x1x8x8xbf16>
    %79 = vector.shape_cast %78 : vector<1x1x8x8xbf16> to vector<8x8xbf16>
    %c48_146 = arith.constant 48 : index
    %c16_147 = arith.constant 16 : index
    %80 = vector.load %arg5[%c48_146, %c16_147] : memref<64x32xbf16, #tpu.memory_space<vmem>>, vector<8x8xbf16>
    tpu.vector_store %arg5[%c48_146, %c16_147], %79 {strides = array<i32>} : memref<64x32xbf16, #tpu.memory_space<vmem>>, vector<8x8xbf16>,
    %c0_148 = arith.constant 0 : index
    %c7_149 = arith.constant 7 : index
    %c1_150 = arith.constant 1 : index
    %c0_151 = arith.constant 0 : index
    %81 = vector.load %arg1[%c0_148, %c7_149, %c1_150, %c0_151] : memref<1x9x9x8xbf16, #tpu.memory_space<vmem>>, vector<1x1x8x8xbf16>
    %82 = vector.shape_cast %81 : vector<1x1x8x8xbf16> to vector<8x8xbf16>
    %c48_152 = arith.constant 48 : index
    %c24_153 = arith.constant 24 : index
    %83 = vector.load %arg5[%c48_152, %c24_153] : memref<64x32xbf16, #tpu.memory_space<vmem>>, vector<8x8xbf16>
    tpu.vector_store %arg5[%c48_152, %c24_153], %82 {strides = array<i32>} : memref<64x32xbf16, #tpu.memory_space<vmem>>, vector<8x8xbf16>,
    %c0_154 = arith.constant 0 : index
    %c7_155 = arith.constant 7 : index
    %c0_156 = arith.constant 0 : index
    %c0_157 = arith.constant 0 : index
    %84 = vector.load %arg1[%c0_154, %c7_155, %c0_156, %c0_157] : memref<1x9x9x8xbf16, #tpu.memory_space<vmem>>, vector<1x1x8x8xbf16>
    %85 = vector.shape_cast %84 : vector<1x1x8x8xbf16> to vector<8x8xbf16>
    %c56 = arith.constant 56 : index
    %c0_158 = arith.constant 0 : index
    %86 = vector.load %arg5[%c56, %c0_158] : memref<64x32xbf16, #tpu.memory_space<vmem>>, vector<8x8xbf16>
    tpu.vector_store %arg5[%c56, %c0_158], %85 {strides = array<i32>} : memref<64x32xbf16, #tpu.memory_space<vmem>>, vector<8x8xbf16>,
    %c0_159 = arith.constant 0 : index
    %c7_160 = arith.constant 7 : index
    %c1_161 = arith.constant 1 : index
    %c0_162 = arith.constant 0 : index
    %87 = vector.load %arg1[%c0_159, %c7_160, %c1_161, %c0_162] : memref<1x9x9x8xbf16, #tpu.memory_space<vmem>>, vector<1x1x8x8xbf16>
    %88 = vector.shape_cast %87 : vector<1x1x8x8xbf16> to vector<8x8xbf16>
    %c56_163 = arith.constant 56 : index
    %c8_164 = arith.constant 8 : index
    %89 = vector.load %arg5[%c56_163, %c8_164] : memref<64x32xbf16, #tpu.memory_space<vmem>>, vector<8x8xbf16>
    tpu.vector_store %arg5[%c56_163, %c8_164], %88 {strides = array<i32>} : memref<64x32xbf16, #tpu.memory_space<vmem>>, vector<8x8xbf16>,
    %c0_165 = arith.constant 0 : index
    %c8_166 = arith.constant 8 : index
    %c0_167 = arith.constant 0 : index
    %c0_168 = arith.constant 0 : index
    %90 = vector.load %arg1[%c0_165, %c8_166, %c0_167, %c0_168] : memref<1x9x9x8xbf16, #tpu.memory_space<vmem>>, vector<1x1x8x8xbf16>
    %91 = vector.shape_cast %90 : vector<1x1x8x8xbf16> to vector<8x8xbf16>
    %c56_169 = arith.constant 56 : index
    %c16_170 = arith.constant 16 : index
    %92 = vector.load %arg5[%c56_169, %c16_170] : memref<64x32xbf16, #tpu.memory_space<vmem>>, vector<8x8xbf16>
    tpu.vector_store %arg5[%c56_169, %c16_170], %91 {strides = array<i32>} : memref<64x32xbf16, #tpu.memory_space<vmem>>, vector<8x8xbf16>,
    %c0_171 = arith.constant 0 : index
    %c8_172 = arith.constant 8 : index
    %c1_173 = arith.constant 1 : index
    %c0_174 = arith.constant 0 : index
    %93 = vector.load %arg1[%c0_171, %c8_172, %c1_173, %c0_174] : memref<1x9x9x8xbf16, #tpu.memory_space<vmem>>, vector<1x1x8x8xbf16>
    %94 = vector.shape_cast %93 : vector<1x1x8x8xbf16> to vector<8x8xbf16>
    %c56_175 = arith.constant 56 : index
    %c24_176 = arith.constant 24 : index
    %95 = vector.load %arg5[%c56_175, %c24_176] : memref<64x32xbf16, #tpu.memory_space<vmem>>, vector<8x8xbf16>
    tpu.vector_store %arg5[%c56_175, %c24_176], %94 {strides = array<i32>} : memref<64x32xbf16, #tpu.memory_space<vmem>>, vector<8x8xbf16>,
    %c0_177 = arith.constant 0 : index
    %c0_178 = arith.constant 0 : index
    %96 = vector.load %arg5[%c0_177, %c0_178] : memref<64x32xbf16, #tpu.memory_space<vmem>>, vector<64x32xbf16>
    %c0_179 = arith.constant 0 : index
    %c0_180 = arith.constant 0 : index
    %97 = vector.load %arg2[%c0_179, %c0_180] : memref<32x64xbf16, #tpu.memory_space<vmem>>, vector<32x64xbf16>
    %cst = arith.constant dense<0.000000e+00> : vector<64x64xf32>
    %98 = tpu.matmul %96, %97, %cst {dimension_numbers = #tpu.dot_dimension_numbers<[1], [0], [0], [1], [0, 0, 1, 1], [], []>} : vector<64x32xbf16>, vector<32x64xbf16>, vector<64x64xf32> -> vector<64x64xf32>
    %c0_181 = arith.constant 0 : index
    %c0_182 = arith.constant 0 : index
    %99 = vector.load %arg3[%c0_181, %c0_182] : memref<1x64xf32, #tpu.memory_space<vmem>>, vector<1x64xf32>
    %100 = vector.broadcast %99 : vector<1x64xf32> to vector<64x64xf32>
    %101 = arith.addf %98, %100 : vector<64x64xf32>
    %cst_183 = arith.constant 0.000000e+00 : f32
    %102 = vector.broadcast %cst_183 : f32 to vector<64x64xf32>
    %103 = arith.maximumf %101, %102 : vector<64x64xf32>
    %104 = arith.truncf %103 : vector<64x64xf32> to vector<64x64xbf16>
    %c0_184 = arith.constant 0 : index
    %c0_185 = arith.constant 0 : index
    %c0_186 = arith.constant 0 : index
    %105 = vector.load %arg4[%c0_184, %c0_185, %c0_186] : memref<1x64x64xbf16, #tpu.memory_space<vmem>>, vector<1x64x64xbf16>
    %106 = vector.shape_cast %105 : vector<1x64x64xbf16> to vector<64x64xbf16>
    %107 = vector.shape_cast %104 : vector<64x64xbf16> to vector<1x64x64xbf16>
    tpu.vector_store %arg4[%c0_184, %c0_185, %c0_186], %107 {strides = array<i32>} : memref<1x64x64xbf16, #tpu.memory_space<vmem>>, vector<1x64x64xbf16>,
    return
  }
  func.func @transform_0(%arg0: i32) -> (i32, i32, i32, i32) {
    %c0_i32 = arith.constant 0 : i32
    %c0_i32_0 = arith.constant 0 : i32
    %c0_i32_1 = arith.constant 0 : i32
    %c0_i32_2 = arith.constant 0 : i32
    return %arg0, %c0_i32, %c0_i32_0, %c0_i32_1 : i32, i32, i32, i32
  }
  func.func @transform_1(%arg0: i32) -> (i32, i32) {
    %c0_i32 = arith.constant 0 : i32
    %c0_i32_0 = arith.constant 0 : i32
    %c0_i32_1 = arith.constant 0 : i32
    return %c0_i32, %c0_i32_0 : i32, i32
  }
  func.func @transform_2(%arg0: i32) -> (i32, i32) {
    %c0_i32 = arith.constant 0 : i32
    %c0_i32_0 = arith.constant 0 : i32
    %c0_i32_1 = arith.constant 0 : i32
    return %c0_i32, %c0_i32_0 : i32, i32
  }
  func.func @transform_3(%arg0: i32) -> (i32, i32, i32) {
    %c0_i32 = arith.constant 0 : i32
    %c0_i32_0 = arith.constant 0 : i32
    %c0_i32_1 = arith.constant 0 : i32
    return %arg0, %c0_i32, %c0_i32_0 : i32, i32, i32
  }
}

module attributes {stable_mosaic.version = 11 : i64} {
  func.func @_conv_kernel(%arg0: i32, %arg1: memref<1x5x5x256xbf16, #tpu.memory_space<vmem>>, %arg2: memref<1024x128xbf16, #tpu.memory_space<vmem>>, %arg3: memref<1x128xf32, #tpu.memory_space<vmem>>, %arg4: memref<1x16x128xbf16, #tpu.memory_space<vmem>>, %arg5: memref<16x1024xbf16, #tpu.memory_space<vmem>>) attributes {dimension_semantics = [#tpu.dimension_semantics<parallel>], iteration_bounds = array<i64: 2>, scalar_prefetch = 0 : i64, scratch_operands = 1 : i64, tpu.core_type = #tpu.core_type<tc>, window_params = [{transform_indices = @transform_0, window_bounds = array<i64: 1, 5, 5, 256>}, {pipeline_mode = #tpu.pipeline_mode<synchronous>, transform_indices = @transform_1, window_bounds = array<i64: 1024, 128>}, {pipeline_mode = #tpu.pipeline_mode<synchronous>, transform_indices = @transform_2, window_bounds = array<i64: 1, 128>}, {transform_indices = @transform_3, window_bounds = array<i64: 1, 16, 128>}]} {
    %c0 = arith.constant 0 : index
    %c0_0 = arith.constant 0 : index
    %c0_1 = arith.constant 0 : index
    %c0_2 = arith.constant 0 : index
    %0 = vector.load %arg1[%c0, %c0_0, %c0_1, %c0_2] : memref<1x5x5x256xbf16, #tpu.memory_space<vmem>>, vector<1x1x4x256xbf16>
    %1 = vector.shape_cast %0 : vector<1x1x4x256xbf16> to vector<4x256xbf16>
    %c0_3 = arith.constant 0 : index
    %c0_4 = arith.constant 0 : index
    %2 = vector.load %arg5[%c0_3, %c0_4] : memref<16x1024xbf16, #tpu.memory_space<vmem>>, vector<4x256xbf16>
    tpu.vector_store %arg5[%c0_3, %c0_4], %1 {strides = array<i32>} : memref<16x1024xbf16, #tpu.memory_space<vmem>>, vector<4x256xbf16>,
    %c0_5 = arith.constant 0 : index
    %c0_6 = arith.constant 0 : index
    %c1 = arith.constant 1 : index
    %c0_7 = arith.constant 0 : index
    %3 = vector.load %arg1[%c0_5, %c0_6, %c1, %c0_7] : memref<1x5x5x256xbf16, #tpu.memory_space<vmem>>, vector<1x1x4x256xbf16>
    %4 = vector.shape_cast %3 : vector<1x1x4x256xbf16> to vector<4x256xbf16>
    %c0_8 = arith.constant 0 : index
    %c256 = arith.constant 256 : index
    %5 = vector.load %arg5[%c0_8, %c256] : memref<16x1024xbf16, #tpu.memory_space<vmem>>, vector<4x256xbf16>
    tpu.vector_store %arg5[%c0_8, %c256], %4 {strides = array<i32>} : memref<16x1024xbf16, #tpu.memory_space<vmem>>, vector<4x256xbf16>,
    %c0_9 = arith.constant 0 : index
    %c1_10 = arith.constant 1 : index
    %c0_11 = arith.constant 0 : index
    %c0_12 = arith.constant 0 : index
    %6 = vector.load %arg1[%c0_9, %c1_10, %c0_11, %c0_12] : memref<1x5x5x256xbf16, #tpu.memory_space<vmem>>, vector<1x1x4x256xbf16>
    %7 = vector.shape_cast %6 : vector<1x1x4x256xbf16> to vector<4x256xbf16>
    %c0_13 = arith.constant 0 : index
    %c512 = arith.constant 512 : index
    %8 = vector.load %arg5[%c0_13, %c512] : memref<16x1024xbf16, #tpu.memory_space<vmem>>, vector<4x256xbf16>
    tpu.vector_store %arg5[%c0_13, %c512], %7 {strides = array<i32>} : memref<16x1024xbf16, #tpu.memory_space<vmem>>, vector<4x256xbf16>,
    %c0_14 = arith.constant 0 : index
    %c1_15 = arith.constant 1 : index
    %c1_16 = arith.constant 1 : index
    %c0_17 = arith.constant 0 : index
    %9 = vector.load %arg1[%c0_14, %c1_15, %c1_16, %c0_17] : memref<1x5x5x256xbf16, #tpu.memory_space<vmem>>, vector<1x1x4x256xbf16>
    %10 = vector.shape_cast %9 : vector<1x1x4x256xbf16> to vector<4x256xbf16>
    %c0_18 = arith.constant 0 : index
    %c768 = arith.constant 768 : index
    %11 = vector.load %arg5[%c0_18, %c768] : memref<16x1024xbf16, #tpu.memory_space<vmem>>, vector<4x256xbf16>
    tpu.vector_store %arg5[%c0_18, %c768], %10 {strides = array<i32>} : memref<16x1024xbf16, #tpu.memory_space<vmem>>, vector<4x256xbf16>,
    %c0_19 = arith.constant 0 : index
    %c1_20 = arith.constant 1 : index
    %c0_21 = arith.constant 0 : index
    %c0_22 = arith.constant 0 : index
    %12 = vector.load %arg1[%c0_19, %c1_20, %c0_21, %c0_22] : memref<1x5x5x256xbf16, #tpu.memory_space<vmem>>, vector<1x1x4x256xbf16>
    %13 = vector.shape_cast %12 : vector<1x1x4x256xbf16> to vector<4x256xbf16>
    %c4 = arith.constant 4 : index
    %c0_23 = arith.constant 0 : index
    %14 = vector.load %arg5[%c4, %c0_23] : memref<16x1024xbf16, #tpu.memory_space<vmem>>, vector<4x256xbf16>
    tpu.vector_store %arg5[%c4, %c0_23], %13 {strides = array<i32>} : memref<16x1024xbf16, #tpu.memory_space<vmem>>, vector<4x256xbf16>,
    %c0_24 = arith.constant 0 : index
    %c1_25 = arith.constant 1 : index
    %c1_26 = arith.constant 1 : index
    %c0_27 = arith.constant 0 : index
    %15 = vector.load %arg1[%c0_24, %c1_25, %c1_26, %c0_27] : memref<1x5x5x256xbf16, #tpu.memory_space<vmem>>, vector<1x1x4x256xbf16>
    %16 = vector.shape_cast %15 : vector<1x1x4x256xbf16> to vector<4x256xbf16>
    %c4_28 = arith.constant 4 : index
    %c256_29 = arith.constant 256 : index
    %17 = vector.load %arg5[%c4_28, %c256_29] : memref<16x1024xbf16, #tpu.memory_space<vmem>>, vector<4x256xbf16>
    tpu.vector_store %arg5[%c4_28, %c256_29], %16 {strides = array<i32>} : memref<16x1024xbf16, #tpu.memory_space<vmem>>, vector<4x256xbf16>,
    %c0_30 = arith.constant 0 : index
    %c2 = arith.constant 2 : index
    %c0_31 = arith.constant 0 : index
    %c0_32 = arith.constant 0 : index
    %18 = vector.load %arg1[%c0_30, %c2, %c0_31, %c0_32] : memref<1x5x5x256xbf16, #tpu.memory_space<vmem>>, vector<1x1x4x256xbf16>
    %19 = vector.shape_cast %18 : vector<1x1x4x256xbf16> to vector<4x256xbf16>
    %c4_33 = arith.constant 4 : index
    %c512_34 = arith.constant 512 : index
    %20 = vector.load %arg5[%c4_33, %c512_34] : memref<16x1024xbf16, #tpu.memory_space<vmem>>, vector<4x256xbf16>
    tpu.vector_store %arg5[%c4_33, %c512_34], %19 {strides = array<i32>} : memref<16x1024xbf16, #tpu.memory_space<vmem>>, vector<4x256xbf16>,
    %c0_35 = arith.constant 0 : index
    %c2_36 = arith.constant 2 : index
    %c1_37 = arith.constant 1 : index
    %c0_38 = arith.constant 0 : index
    %21 = vector.load %arg1[%c0_35, %c2_36, %c1_37, %c0_38] : memref<1x5x5x256xbf16, #tpu.memory_space<vmem>>, vector<1x1x4x256xbf16>
    %22 = vector.shape_cast %21 : vector<1x1x4x256xbf16> to vector<4x256xbf16>
    %c4_39 = arith.constant 4 : index
    %c768_40 = arith.constant 768 : index
    %23 = vector.load %arg5[%c4_39, %c768_40] : memref<16x1024xbf16, #tpu.memory_space<vmem>>, vector<4x256xbf16>
    tpu.vector_store %arg5[%c4_39, %c768_40], %22 {strides = array<i32>} : memref<16x1024xbf16, #tpu.memory_space<vmem>>, vector<4x256xbf16>,
    %c0_41 = arith.constant 0 : index
    %c2_42 = arith.constant 2 : index
    %c0_43 = arith.constant 0 : index
    %c0_44 = arith.constant 0 : index
    %24 = vector.load %arg1[%c0_41, %c2_42, %c0_43, %c0_44] : memref<1x5x5x256xbf16, #tpu.memory_space<vmem>>, vector<1x1x4x256xbf16>
    %25 = vector.shape_cast %24 : vector<1x1x4x256xbf16> to vector<4x256xbf16>
    %c8 = arith.constant 8 : index
    %c0_45 = arith.constant 0 : index
    %26 = vector.load %arg5[%c8, %c0_45] : memref<16x1024xbf16, #tpu.memory_space<vmem>>, vector<4x256xbf16>
    tpu.vector_store %arg5[%c8, %c0_45], %25 {strides = array<i32>} : memref<16x1024xbf16, #tpu.memory_space<vmem>>, vector<4x256xbf16>,
    %c0_46 = arith.constant 0 : index
    %c2_47 = arith.constant 2 : index
    %c1_48 = arith.constant 1 : index
    %c0_49 = arith.constant 0 : index
    %27 = vector.load %arg1[%c0_46, %c2_47, %c1_48, %c0_49] : memref<1x5x5x256xbf16, #tpu.memory_space<vmem>>, vector<1x1x4x256xbf16>
    %28 = vector.shape_cast %27 : vector<1x1x4x256xbf16> to vector<4x256xbf16>
    %c8_50 = arith.constant 8 : index
    %c256_51 = arith.constant 256 : index
    %29 = vector.load %arg5[%c8_50, %c256_51] : memref<16x1024xbf16, #tpu.memory_space<vmem>>, vector<4x256xbf16>
    tpu.vector_store %arg5[%c8_50, %c256_51], %28 {strides = array<i32>} : memref<16x1024xbf16, #tpu.memory_space<vmem>>, vector<4x256xbf16>,
    %c0_52 = arith.constant 0 : index
    %c3 = arith.constant 3 : index
    %c0_53 = arith.constant 0 : index
    %c0_54 = arith.constant 0 : index
    %30 = vector.load %arg1[%c0_52, %c3, %c0_53, %c0_54] : memref<1x5x5x256xbf16, #tpu.memory_space<vmem>>, vector<1x1x4x256xbf16>
    %31 = vector.shape_cast %30 : vector<1x1x4x256xbf16> to vector<4x256xbf16>
    %c8_55 = arith.constant 8 : index
    %c512_56 = arith.constant 512 : index
    %32 = vector.load %arg5[%c8_55, %c512_56] : memref<16x1024xbf16, #tpu.memory_space<vmem>>, vector<4x256xbf16>
    tpu.vector_store %arg5[%c8_55, %c512_56], %31 {strides = array<i32>} : memref<16x1024xbf16, #tpu.memory_space<vmem>>, vector<4x256xbf16>,
    %c0_57 = arith.constant 0 : index
    %c3_58 = arith.constant 3 : index
    %c1_59 = arith.constant 1 : index
    %c0_60 = arith.constant 0 : index
    %33 = vector.load %arg1[%c0_57, %c3_58, %c1_59, %c0_60] : memref<1x5x5x256xbf16, #tpu.memory_space<vmem>>, vector<1x1x4x256xbf16>
    %34 = vector.shape_cast %33 : vector<1x1x4x256xbf16> to vector<4x256xbf16>
    %c8_61 = arith.constant 8 : index
    %c768_62 = arith.constant 768 : index
    %35 = vector.load %arg5[%c8_61, %c768_62] : memref<16x1024xbf16, #tpu.memory_space<vmem>>, vector<4x256xbf16>
    tpu.vector_store %arg5[%c8_61, %c768_62], %34 {strides = array<i32>} : memref<16x1024xbf16, #tpu.memory_space<vmem>>, vector<4x256xbf16>,
    %c0_63 = arith.constant 0 : index
    %c3_64 = arith.constant 3 : index
    %c0_65 = arith.constant 0 : index
    %c0_66 = arith.constant 0 : index
    %36 = vector.load %arg1[%c0_63, %c3_64, %c0_65, %c0_66] : memref<1x5x5x256xbf16, #tpu.memory_space<vmem>>, vector<1x1x4x256xbf16>
    %37 = vector.shape_cast %36 : vector<1x1x4x256xbf16> to vector<4x256xbf16>
    %c12 = arith.constant 12 : index
    %c0_67 = arith.constant 0 : index
    %38 = vector.load %arg5[%c12, %c0_67] : memref<16x1024xbf16, #tpu.memory_space<vmem>>, vector<4x256xbf16>
    tpu.vector_store %arg5[%c12, %c0_67], %37 {strides = array<i32>} : memref<16x1024xbf16, #tpu.memory_space<vmem>>, vector<4x256xbf16>,
    %c0_68 = arith.constant 0 : index
    %c3_69 = arith.constant 3 : index
    %c1_70 = arith.constant 1 : index
    %c0_71 = arith.constant 0 : index
    %39 = vector.load %arg1[%c0_68, %c3_69, %c1_70, %c0_71] : memref<1x5x5x256xbf16, #tpu.memory_space<vmem>>, vector<1x1x4x256xbf16>
    %40 = vector.shape_cast %39 : vector<1x1x4x256xbf16> to vector<4x256xbf16>
    %c12_72 = arith.constant 12 : index
    %c256_73 = arith.constant 256 : index
    %41 = vector.load %arg5[%c12_72, %c256_73] : memref<16x1024xbf16, #tpu.memory_space<vmem>>, vector<4x256xbf16>
    tpu.vector_store %arg5[%c12_72, %c256_73], %40 {strides = array<i32>} : memref<16x1024xbf16, #tpu.memory_space<vmem>>, vector<4x256xbf16>,
    %c0_74 = arith.constant 0 : index
    %c4_75 = arith.constant 4 : index
    %c0_76 = arith.constant 0 : index
    %c0_77 = arith.constant 0 : index
    %42 = vector.load %arg1[%c0_74, %c4_75, %c0_76, %c0_77] : memref<1x5x5x256xbf16, #tpu.memory_space<vmem>>, vector<1x1x4x256xbf16>
    %43 = vector.shape_cast %42 : vector<1x1x4x256xbf16> to vector<4x256xbf16>
    %c12_78 = arith.constant 12 : index
    %c512_79 = arith.constant 512 : index
    %44 = vector.load %arg5[%c12_78, %c512_79] : memref<16x1024xbf16, #tpu.memory_space<vmem>>, vector<4x256xbf16>
    tpu.vector_store %arg5[%c12_78, %c512_79], %43 {strides = array<i32>} : memref<16x1024xbf16, #tpu.memory_space<vmem>>, vector<4x256xbf16>,
    %c0_80 = arith.constant 0 : index
    %c4_81 = arith.constant 4 : index
    %c1_82 = arith.constant 1 : index
    %c0_83 = arith.constant 0 : index
    %45 = vector.load %arg1[%c0_80, %c4_81, %c1_82, %c0_83] : memref<1x5x5x256xbf16, #tpu.memory_space<vmem>>, vector<1x1x4x256xbf16>
    %46 = vector.shape_cast %45 : vector<1x1x4x256xbf16> to vector<4x256xbf16>
    %c12_84 = arith.constant 12 : index
    %c768_85 = arith.constant 768 : index
    %47 = vector.load %arg5[%c12_84, %c768_85] : memref<16x1024xbf16, #tpu.memory_space<vmem>>, vector<4x256xbf16>
    tpu.vector_store %arg5[%c12_84, %c768_85], %46 {strides = array<i32>} : memref<16x1024xbf16, #tpu.memory_space<vmem>>, vector<4x256xbf16>,
    %c0_86 = arith.constant 0 : index
    %c0_87 = arith.constant 0 : index
    %48 = vector.load %arg5[%c0_86, %c0_87] : memref<16x1024xbf16, #tpu.memory_space<vmem>>, vector<16x1024xbf16>
    %c0_88 = arith.constant 0 : index
    %c0_89 = arith.constant 0 : index
    %49 = vector.load %arg2[%c0_88, %c0_89] : memref<1024x128xbf16, #tpu.memory_space<vmem>>, vector<1024x128xbf16>
    %cst = arith.constant dense<0.000000e+00> : vector<16x128xf32>
    %50 = tpu.matmul %48, %49, %cst {dimension_numbers = #tpu.dot_dimension_numbers<[1], [0], [0], [1], [0, 0, 1, 1], [], []>} : vector<16x1024xbf16>, vector<1024x128xbf16>, vector<16x128xf32> -> vector<16x128xf32>
    %c0_90 = arith.constant 0 : index
    %c0_91 = arith.constant 0 : index
    %51 = vector.load %arg3[%c0_90, %c0_91] : memref<1x128xf32, #tpu.memory_space<vmem>>, vector<1x128xf32>
    %52 = vector.broadcast %51 : vector<1x128xf32> to vector<16x128xf32>
    %53 = arith.addf %50, %52 : vector<16x128xf32>
    %cst_92 = arith.constant 0.000000e+00 : f32
    %54 = vector.broadcast %cst_92 : f32 to vector<16x128xf32>
    %55 = arith.maximumf %53, %54 : vector<16x128xf32>
    %56 = arith.truncf %55 : vector<16x128xf32> to vector<16x128xbf16>
    %c0_93 = arith.constant 0 : index
    %c0_94 = arith.constant 0 : index
    %c0_95 = arith.constant 0 : index
    %57 = vector.load %arg4[%c0_93, %c0_94, %c0_95] : memref<1x16x128xbf16, #tpu.memory_space<vmem>>, vector<1x16x128xbf16>
    %58 = vector.shape_cast %57 : vector<1x16x128xbf16> to vector<16x128xbf16>
    %59 = vector.shape_cast %56 : vector<16x128xbf16> to vector<1x16x128xbf16>
    tpu.vector_store %arg4[%c0_93, %c0_94, %c0_95], %59 {strides = array<i32>} : memref<1x16x128xbf16, #tpu.memory_space<vmem>>, vector<1x16x128xbf16>,
    return
  }
  func.func @transform_0(%arg0: i32) -> (i32, i32, i32, i32) {
    %c0_i32 = arith.constant 0 : i32
    %c0_i32_0 = arith.constant 0 : i32
    %c0_i32_1 = arith.constant 0 : i32
    %c0_i32_2 = arith.constant 0 : i32
    return %arg0, %c0_i32, %c0_i32_0, %c0_i32_1 : i32, i32, i32, i32
  }
  func.func @transform_1(%arg0: i32) -> (i32, i32) {
    %c0_i32 = arith.constant 0 : i32
    %c0_i32_0 = arith.constant 0 : i32
    %c0_i32_1 = arith.constant 0 : i32
    return %c0_i32, %c0_i32_0 : i32, i32
  }
  func.func @transform_2(%arg0: i32) -> (i32, i32) {
    %c0_i32 = arith.constant 0 : i32
    %c0_i32_0 = arith.constant 0 : i32
    %c0_i32_1 = arith.constant 0 : i32
    return %c0_i32, %c0_i32_0 : i32, i32
  }
  func.func @transform_3(%arg0: i32) -> (i32, i32, i32) {
    %c0_i32 = arith.constant 0 : i32
    %c0_i32_0 = arith.constant 0 : i32
    %c0_i32_1 = arith.constant 0 : i32
    return %arg0, %c0_i32, %c0_i32_0 : i32, i32, i32
  }
}

module attributes {stable_mosaic.version = 11 : i64} {
  func.func @_conv_kernel(%arg0: i32, %arg1: memref<1x6x6x128xbf16, #tpu.memory_space<vmem>>, %arg2: memref<1152x256xbf16, #tpu.memory_space<vmem>>, %arg3: memref<1x256xf32, #tpu.memory_space<vmem>>, %arg4: memref<1x16x256xbf16, #tpu.memory_space<vmem>>, %arg5: memref<16x1152xbf16, #tpu.memory_space<vmem>>) attributes {dimension_semantics = [#tpu.dimension_semantics<parallel>], iteration_bounds = array<i64: 2>, scalar_prefetch = 0 : i64, scratch_operands = 1 : i64, tpu.core_type = #tpu.core_type<tc>, window_params = [{transform_indices = @transform_0, window_bounds = array<i64: 1, 6, 6, 128>}, {pipeline_mode = #tpu.pipeline_mode<synchronous>, transform_indices = @transform_1, window_bounds = array<i64: 1152, 256>}, {pipeline_mode = #tpu.pipeline_mode<synchronous>, transform_indices = @transform_2, window_bounds = array<i64: 1, 256>}, {transform_indices = @transform_3, window_bounds = array<i64: 1, 16, 256>}]} {
    %c0 = arith.constant 0 : index
    %c0_0 = arith.constant 0 : index
    %c0_1 = arith.constant 0 : index
    %c0_2 = arith.constant 0 : index
    %0 = vector.load %arg1[%c0, %c0_0, %c0_1, %c0_2] : memref<1x6x6x128xbf16, #tpu.memory_space<vmem>>, vector<1x1x4x128xbf16>
    %1 = vector.shape_cast %0 : vector<1x1x4x128xbf16> to vector<4x128xbf16>
    %c0_3 = arith.constant 0 : index
    %c0_4 = arith.constant 0 : index
    %2 = vector.load %arg5[%c0_3, %c0_4] : memref<16x1152xbf16, #tpu.memory_space<vmem>>, vector<4x128xbf16>
    tpu.vector_store %arg5[%c0_3, %c0_4], %1 {strides = array<i32>} : memref<16x1152xbf16, #tpu.memory_space<vmem>>, vector<4x128xbf16>,
    %c0_5 = arith.constant 0 : index
    %c0_6 = arith.constant 0 : index
    %c1 = arith.constant 1 : index
    %c0_7 = arith.constant 0 : index
    %3 = vector.load %arg1[%c0_5, %c0_6, %c1, %c0_7] : memref<1x6x6x128xbf16, #tpu.memory_space<vmem>>, vector<1x1x4x128xbf16>
    %4 = vector.shape_cast %3 : vector<1x1x4x128xbf16> to vector<4x128xbf16>
    %c0_8 = arith.constant 0 : index
    %c128 = arith.constant 128 : index
    %5 = vector.load %arg5[%c0_8, %c128] : memref<16x1152xbf16, #tpu.memory_space<vmem>>, vector<4x128xbf16>
    tpu.vector_store %arg5[%c0_8, %c128], %4 {strides = array<i32>} : memref<16x1152xbf16, #tpu.memory_space<vmem>>, vector<4x128xbf16>,
    %c0_9 = arith.constant 0 : index
    %c0_10 = arith.constant 0 : index
    %c2 = arith.constant 2 : index
    %c0_11 = arith.constant 0 : index
    %6 = vector.load %arg1[%c0_9, %c0_10, %c2, %c0_11] : memref<1x6x6x128xbf16, #tpu.memory_space<vmem>>, vector<1x1x4x128xbf16>
    %7 = vector.shape_cast %6 : vector<1x1x4x128xbf16> to vector<4x128xbf16>
    %c0_12 = arith.constant 0 : index
    %c256 = arith.constant 256 : index
    %8 = vector.load %arg5[%c0_12, %c256] : memref<16x1152xbf16, #tpu.memory_space<vmem>>, vector<4x128xbf16>
    tpu.vector_store %arg5[%c0_12, %c256], %7 {strides = array<i32>} : memref<16x1152xbf16, #tpu.memory_space<vmem>>, vector<4x128xbf16>,
    %c0_13 = arith.constant 0 : index
    %c1_14 = arith.constant 1 : index
    %c0_15 = arith.constant 0 : index
    %c0_16 = arith.constant 0 : index
    %9 = vector.load %arg1[%c0_13, %c1_14, %c0_15, %c0_16] : memref<1x6x6x128xbf16, #tpu.memory_space<vmem>>, vector<1x1x4x128xbf16>
    %10 = vector.shape_cast %9 : vector<1x1x4x128xbf16> to vector<4x128xbf16>
    %c0_17 = arith.constant 0 : index
    %c384 = arith.constant 384 : index
    %11 = vector.load %arg5[%c0_17, %c384] : memref<16x1152xbf16, #tpu.memory_space<vmem>>, vector<4x128xbf16>
    tpu.vector_store %arg5[%c0_17, %c384], %10 {strides = array<i32>} : memref<16x1152xbf16, #tpu.memory_space<vmem>>, vector<4x128xbf16>,
    %c0_18 = arith.constant 0 : index
    %c1_19 = arith.constant 1 : index
    %c1_20 = arith.constant 1 : index
    %c0_21 = arith.constant 0 : index
    %12 = vector.load %arg1[%c0_18, %c1_19, %c1_20, %c0_21] : memref<1x6x6x128xbf16, #tpu.memory_space<vmem>>, vector<1x1x4x128xbf16>
    %13 = vector.shape_cast %12 : vector<1x1x4x128xbf16> to vector<4x128xbf16>
    %c0_22 = arith.constant 0 : index
    %c512 = arith.constant 512 : index
    %14 = vector.load %arg5[%c0_22, %c512] : memref<16x1152xbf16, #tpu.memory_space<vmem>>, vector<4x128xbf16>
    tpu.vector_store %arg5[%c0_22, %c512], %13 {strides = array<i32>} : memref<16x1152xbf16, #tpu.memory_space<vmem>>, vector<4x128xbf16>,
    %c0_23 = arith.constant 0 : index
    %c1_24 = arith.constant 1 : index
    %c2_25 = arith.constant 2 : index
    %c0_26 = arith.constant 0 : index
    %15 = vector.load %arg1[%c0_23, %c1_24, %c2_25, %c0_26] : memref<1x6x6x128xbf16, #tpu.memory_space<vmem>>, vector<1x1x4x128xbf16>
    %16 = vector.shape_cast %15 : vector<1x1x4x128xbf16> to vector<4x128xbf16>
    %c0_27 = arith.constant 0 : index
    %c640 = arith.constant 640 : index
    %17 = vector.load %arg5[%c0_27, %c640] : memref<16x1152xbf16, #tpu.memory_space<vmem>>, vector<4x128xbf16>
    tpu.vector_store %arg5[%c0_27, %c640], %16 {strides = array<i32>} : memref<16x1152xbf16, #tpu.memory_space<vmem>>, vector<4x128xbf16>,
    %c0_28 = arith.constant 0 : index
    %c2_29 = arith.constant 2 : index
    %c0_30 = arith.constant 0 : index
    %c0_31 = arith.constant 0 : index
    %18 = vector.load %arg1[%c0_28, %c2_29, %c0_30, %c0_31] : memref<1x6x6x128xbf16, #tpu.memory_space<vmem>>, vector<1x1x4x128xbf16>
    %19 = vector.shape_cast %18 : vector<1x1x4x128xbf16> to vector<4x128xbf16>
    %c0_32 = arith.constant 0 : index
    %c768 = arith.constant 768 : index
    %20 = vector.load %arg5[%c0_32, %c768] : memref<16x1152xbf16, #tpu.memory_space<vmem>>, vector<4x128xbf16>
    tpu.vector_store %arg5[%c0_32, %c768], %19 {strides = array<i32>} : memref<16x1152xbf16, #tpu.memory_space<vmem>>, vector<4x128xbf16>,
    %c0_33 = arith.constant 0 : index
    %c2_34 = arith.constant 2 : index
    %c1_35 = arith.constant 1 : index
    %c0_36 = arith.constant 0 : index
    %21 = vector.load %arg1[%c0_33, %c2_34, %c1_35, %c0_36] : memref<1x6x6x128xbf16, #tpu.memory_space<vmem>>, vector<1x1x4x128xbf16>
    %22 = vector.shape_cast %21 : vector<1x1x4x128xbf16> to vector<4x128xbf16>
    %c0_37 = arith.constant 0 : index
    %c896 = arith.constant 896 : index
    %23 = vector.load %arg5[%c0_37, %c896] : memref<16x1152xbf16, #tpu.memory_space<vmem>>, vector<4x128xbf16>
    tpu.vector_store %arg5[%c0_37, %c896], %22 {strides = array<i32>} : memref<16x1152xbf16, #tpu.memory_space<vmem>>, vector<4x128xbf16>,
    %c0_38 = arith.constant 0 : index
    %c2_39 = arith.constant 2 : index
    %c2_40 = arith.constant 2 : index
    %c0_41 = arith.constant 0 : index
    %24 = vector.load %arg1[%c0_38, %c2_39, %c2_40, %c0_41] : memref<1x6x6x128xbf16, #tpu.memory_space<vmem>>, vector<1x1x4x128xbf16>
    %25 = vector.shape_cast %24 : vector<1x1x4x128xbf16> to vector<4x128xbf16>
    %c0_42 = arith.constant 0 : index
    %c1024 = arith.constant 1024 : index
    %26 = vector.load %arg5[%c0_42, %c1024] : memref<16x1152xbf16, #tpu.memory_space<vmem>>, vector<4x128xbf16>
    tpu.vector_store %arg5[%c0_42, %c1024], %25 {strides = array<i32>} : memref<16x1152xbf16, #tpu.memory_space<vmem>>, vector<4x128xbf16>,
    %c0_43 = arith.constant 0 : index
    %c1_44 = arith.constant 1 : index
    %c0_45 = arith.constant 0 : index
    %c0_46 = arith.constant 0 : index
    %27 = vector.load %arg1[%c0_43, %c1_44, %c0_45, %c0_46] : memref<1x6x6x128xbf16, #tpu.memory_space<vmem>>, vector<1x1x4x128xbf16>
    %28 = vector.shape_cast %27 : vector<1x1x4x128xbf16> to vector<4x128xbf16>
    %c4 = arith.constant 4 : index
    %c0_47 = arith.constant 0 : index
    %29 = vector.load %arg5[%c4, %c0_47] : memref<16x1152xbf16, #tpu.memory_space<vmem>>, vector<4x128xbf16>
    tpu.vector_store %arg5[%c4, %c0_47], %28 {strides = array<i32>} : memref<16x1152xbf16, #tpu.memory_space<vmem>>, vector<4x128xbf16>,
    %c0_48 = arith.constant 0 : index
    %c1_49 = arith.constant 1 : index
    %c1_50 = arith.constant 1 : index
    %c0_51 = arith.constant 0 : index
    %30 = vector.load %arg1[%c0_48, %c1_49, %c1_50, %c0_51] : memref<1x6x6x128xbf16, #tpu.memory_space<vmem>>, vector<1x1x4x128xbf16>
    %31 = vector.shape_cast %30 : vector<1x1x4x128xbf16> to vector<4x128xbf16>
    %c4_52 = arith.constant 4 : index
    %c128_53 = arith.constant 128 : index
    %32 = vector.load %arg5[%c4_52, %c128_53] : memref<16x1152xbf16, #tpu.memory_space<vmem>>, vector<4x128xbf16>
    tpu.vector_store %arg5[%c4_52, %c128_53], %31 {strides = array<i32>} : memref<16x1152xbf16, #tpu.memory_space<vmem>>, vector<4x128xbf16>,
    %c0_54 = arith.constant 0 : index
    %c1_55 = arith.constant 1 : index
    %c2_56 = arith.constant 2 : index
    %c0_57 = arith.constant 0 : index
    %33 = vector.load %arg1[%c0_54, %c1_55, %c2_56, %c0_57] : memref<1x6x6x128xbf16, #tpu.memory_space<vmem>>, vector<1x1x4x128xbf16>
    %34 = vector.shape_cast %33 : vector<1x1x4x128xbf16> to vector<4x128xbf16>
    %c4_58 = arith.constant 4 : index
    %c256_59 = arith.constant 256 : index
    %35 = vector.load %arg5[%c4_58, %c256_59] : memref<16x1152xbf16, #tpu.memory_space<vmem>>, vector<4x128xbf16>
    tpu.vector_store %arg5[%c4_58, %c256_59], %34 {strides = array<i32>} : memref<16x1152xbf16, #tpu.memory_space<vmem>>, vector<4x128xbf16>,
    %c0_60 = arith.constant 0 : index
    %c2_61 = arith.constant 2 : index
    %c0_62 = arith.constant 0 : index
    %c0_63 = arith.constant 0 : index
    %36 = vector.load %arg1[%c0_60, %c2_61, %c0_62, %c0_63] : memref<1x6x6x128xbf16, #tpu.memory_space<vmem>>, vector<1x1x4x128xbf16>
    %37 = vector.shape_cast %36 : vector<1x1x4x128xbf16> to vector<4x128xbf16>
    %c4_64 = arith.constant 4 : index
    %c384_65 = arith.constant 384 : index
    %38 = vector.load %arg5[%c4_64, %c384_65] : memref<16x1152xbf16, #tpu.memory_space<vmem>>, vector<4x128xbf16>
    tpu.vector_store %arg5[%c4_64, %c384_65], %37 {strides = array<i32>} : memref<16x1152xbf16, #tpu.memory_space<vmem>>, vector<4x128xbf16>,
    %c0_66 = arith.constant 0 : index
    %c2_67 = arith.constant 2 : index
    %c1_68 = arith.constant 1 : index
    %c0_69 = arith.constant 0 : index
    %39 = vector.load %arg1[%c0_66, %c2_67, %c1_68, %c0_69] : memref<1x6x6x128xbf16, #tpu.memory_space<vmem>>, vector<1x1x4x128xbf16>
    %40 = vector.shape_cast %39 : vector<1x1x4x128xbf16> to vector<4x128xbf16>
    %c4_70 = arith.constant 4 : index
    %c512_71 = arith.constant 512 : index
    %41 = vector.load %arg5[%c4_70, %c512_71] : memref<16x1152xbf16, #tpu.memory_space<vmem>>, vector<4x128xbf16>
    tpu.vector_store %arg5[%c4_70, %c512_71], %40 {strides = array<i32>} : memref<16x1152xbf16, #tpu.memory_space<vmem>>, vector<4x128xbf16>,
    %c0_72 = arith.constant 0 : index
    %c2_73 = arith.constant 2 : index
    %c2_74 = arith.constant 2 : index
    %c0_75 = arith.constant 0 : index
    %42 = vector.load %arg1[%c0_72, %c2_73, %c2_74, %c0_75] : memref<1x6x6x128xbf16, #tpu.memory_space<vmem>>, vector<1x1x4x128xbf16>
    %43 = vector.shape_cast %42 : vector<1x1x4x128xbf16> to vector<4x128xbf16>
    %c4_76 = arith.constant 4 : index
    %c640_77 = arith.constant 640 : index
    %44 = vector.load %arg5[%c4_76, %c640_77] : memref<16x1152xbf16, #tpu.memory_space<vmem>>, vector<4x128xbf16>
    tpu.vector_store %arg5[%c4_76, %c640_77], %43 {strides = array<i32>} : memref<16x1152xbf16, #tpu.memory_space<vmem>>, vector<4x128xbf16>,
    %c0_78 = arith.constant 0 : index
    %c3 = arith.constant 3 : index
    %c0_79 = arith.constant 0 : index
    %c0_80 = arith.constant 0 : index
    %45 = vector.load %arg1[%c0_78, %c3, %c0_79, %c0_80] : memref<1x6x6x128xbf16, #tpu.memory_space<vmem>>, vector<1x1x4x128xbf16>
    %46 = vector.shape_cast %45 : vector<1x1x4x128xbf16> to vector<4x128xbf16>
    %c4_81 = arith.constant 4 : index
    %c768_82 = arith.constant 768 : index
    %47 = vector.load %arg5[%c4_81, %c768_82] : memref<16x1152xbf16, #tpu.memory_space<vmem>>, vector<4x128xbf16>
    tpu.vector_store %arg5[%c4_81, %c768_82], %46 {strides = array<i32>} : memref<16x1152xbf16, #tpu.memory_space<vmem>>, vector<4x128xbf16>,
    %c0_83 = arith.constant 0 : index
    %c3_84 = arith.constant 3 : index
    %c1_85 = arith.constant 1 : index
    %c0_86 = arith.constant 0 : index
    %48 = vector.load %arg1[%c0_83, %c3_84, %c1_85, %c0_86] : memref<1x6x6x128xbf16, #tpu.memory_space<vmem>>, vector<1x1x4x128xbf16>
    %49 = vector.shape_cast %48 : vector<1x1x4x128xbf16> to vector<4x128xbf16>
    %c4_87 = arith.constant 4 : index
    %c896_88 = arith.constant 896 : index
    %50 = vector.load %arg5[%c4_87, %c896_88] : memref<16x1152xbf16, #tpu.memory_space<vmem>>, vector<4x128xbf16>
    tpu.vector_store %arg5[%c4_87, %c896_88], %49 {strides = array<i32>} : memref<16x1152xbf16, #tpu.memory_space<vmem>>, vector<4x128xbf16>,
    %c0_89 = arith.constant 0 : index
    %c3_90 = arith.constant 3 : index
    %c2_91 = arith.constant 2 : index
    %c0_92 = arith.constant 0 : index
    %51 = vector.load %arg1[%c0_89, %c3_90, %c2_91, %c0_92] : memref<1x6x6x128xbf16, #tpu.memory_space<vmem>>, vector<1x1x4x128xbf16>
    %52 = vector.shape_cast %51 : vector<1x1x4x128xbf16> to vector<4x128xbf16>
    %c4_93 = arith.constant 4 : index
    %c1024_94 = arith.constant 1024 : index
    %53 = vector.load %arg5[%c4_93, %c1024_94] : memref<16x1152xbf16, #tpu.memory_space<vmem>>, vector<4x128xbf16>
    tpu.vector_store %arg5[%c4_93, %c1024_94], %52 {strides = array<i32>} : memref<16x1152xbf16, #tpu.memory_space<vmem>>, vector<4x128xbf16>,
    %c0_95 = arith.constant 0 : index
    %c2_96 = arith.constant 2 : index
    %c0_97 = arith.constant 0 : index
    %c0_98 = arith.constant 0 : index
    %54 = vector.load %arg1[%c0_95, %c2_96, %c0_97, %c0_98] : memref<1x6x6x128xbf16, #tpu.memory_space<vmem>>, vector<1x1x4x128xbf16>
    %55 = vector.shape_cast %54 : vector<1x1x4x128xbf16> to vector<4x128xbf16>
    %c8 = arith.constant 8 : index
    %c0_99 = arith.constant 0 : index
    %56 = vector.load %arg5[%c8, %c0_99] : memref<16x1152xbf16, #tpu.memory_space<vmem>>, vector<4x128xbf16>
    tpu.vector_store %arg5[%c8, %c0_99], %55 {strides = array<i32>} : memref<16x1152xbf16, #tpu.memory_space<vmem>>, vector<4x128xbf16>,
    %c0_100 = arith.constant 0 : index
    %c2_101 = arith.constant 2 : index
    %c1_102 = arith.constant 1 : index
    %c0_103 = arith.constant 0 : index
    %57 = vector.load %arg1[%c0_100, %c2_101, %c1_102, %c0_103] : memref<1x6x6x128xbf16, #tpu.memory_space<vmem>>, vector<1x1x4x128xbf16>
    %58 = vector.shape_cast %57 : vector<1x1x4x128xbf16> to vector<4x128xbf16>
    %c8_104 = arith.constant 8 : index
    %c128_105 = arith.constant 128 : index
    %59 = vector.load %arg5[%c8_104, %c128_105] : memref<16x1152xbf16, #tpu.memory_space<vmem>>, vector<4x128xbf16>
    tpu.vector_store %arg5[%c8_104, %c128_105], %58 {strides = array<i32>} : memref<16x1152xbf16, #tpu.memory_space<vmem>>, vector<4x128xbf16>,
    %c0_106 = arith.constant 0 : index
    %c2_107 = arith.constant 2 : index
    %c2_108 = arith.constant 2 : index
    %c0_109 = arith.constant 0 : index
    %60 = vector.load %arg1[%c0_106, %c2_107, %c2_108, %c0_109] : memref<1x6x6x128xbf16, #tpu.memory_space<vmem>>, vector<1x1x4x128xbf16>
    %61 = vector.shape_cast %60 : vector<1x1x4x128xbf16> to vector<4x128xbf16>
    %c8_110 = arith.constant 8 : index
    %c256_111 = arith.constant 256 : index
    %62 = vector.load %arg5[%c8_110, %c256_111] : memref<16x1152xbf16, #tpu.memory_space<vmem>>, vector<4x128xbf16>
    tpu.vector_store %arg5[%c8_110, %c256_111], %61 {strides = array<i32>} : memref<16x1152xbf16, #tpu.memory_space<vmem>>, vector<4x128xbf16>,
    %c0_112 = arith.constant 0 : index
    %c3_113 = arith.constant 3 : index
    %c0_114 = arith.constant 0 : index
    %c0_115 = arith.constant 0 : index
    %63 = vector.load %arg1[%c0_112, %c3_113, %c0_114, %c0_115] : memref<1x6x6x128xbf16, #tpu.memory_space<vmem>>, vector<1x1x4x128xbf16>
    %64 = vector.shape_cast %63 : vector<1x1x4x128xbf16> to vector<4x128xbf16>
    %c8_116 = arith.constant 8 : index
    %c384_117 = arith.constant 384 : index
    %65 = vector.load %arg5[%c8_116, %c384_117] : memref<16x1152xbf16, #tpu.memory_space<vmem>>, vector<4x128xbf16>
    tpu.vector_store %arg5[%c8_116, %c384_117], %64 {strides = array<i32>} : memref<16x1152xbf16, #tpu.memory_space<vmem>>, vector<4x128xbf16>,
    %c0_118 = arith.constant 0 : index
    %c3_119 = arith.constant 3 : index
    %c1_120 = arith.constant 1 : index
    %c0_121 = arith.constant 0 : index
    %66 = vector.load %arg1[%c0_118, %c3_119, %c1_120, %c0_121] : memref<1x6x6x128xbf16, #tpu.memory_space<vmem>>, vector<1x1x4x128xbf16>
    %67 = vector.shape_cast %66 : vector<1x1x4x128xbf16> to vector<4x128xbf16>
    %c8_122 = arith.constant 8 : index
    %c512_123 = arith.constant 512 : index
    %68 = vector.load %arg5[%c8_122, %c512_123] : memref<16x1152xbf16, #tpu.memory_space<vmem>>, vector<4x128xbf16>
    tpu.vector_store %arg5[%c8_122, %c512_123], %67 {strides = array<i32>} : memref<16x1152xbf16, #tpu.memory_space<vmem>>, vector<4x128xbf16>,
    %c0_124 = arith.constant 0 : index
    %c3_125 = arith.constant 3 : index
    %c2_126 = arith.constant 2 : index
    %c0_127 = arith.constant 0 : index
    %69 = vector.load %arg1[%c0_124, %c3_125, %c2_126, %c0_127] : memref<1x6x6x128xbf16, #tpu.memory_space<vmem>>, vector<1x1x4x128xbf16>
    %70 = vector.shape_cast %69 : vector<1x1x4x128xbf16> to vector<4x128xbf16>
    %c8_128 = arith.constant 8 : index
    %c640_129 = arith.constant 640 : index
    %71 = vector.load %arg5[%c8_128, %c640_129] : memref<16x1152xbf16, #tpu.memory_space<vmem>>, vector<4x128xbf16>
    tpu.vector_store %arg5[%c8_128, %c640_129], %70 {strides = array<i32>} : memref<16x1152xbf16, #tpu.memory_space<vmem>>, vector<4x128xbf16>,
    %c0_130 = arith.constant 0 : index
    %c4_131 = arith.constant 4 : index
    %c0_132 = arith.constant 0 : index
    %c0_133 = arith.constant 0 : index
    %72 = vector.load %arg1[%c0_130, %c4_131, %c0_132, %c0_133] : memref<1x6x6x128xbf16, #tpu.memory_space<vmem>>, vector<1x1x4x128xbf16>
    %73 = vector.shape_cast %72 : vector<1x1x4x128xbf16> to vector<4x128xbf16>
    %c8_134 = arith.constant 8 : index
    %c768_135 = arith.constant 768 : index
    %74 = vector.load %arg5[%c8_134, %c768_135] : memref<16x1152xbf16, #tpu.memory_space<vmem>>, vector<4x128xbf16>
    tpu.vector_store %arg5[%c8_134, %c768_135], %73 {strides = array<i32>} : memref<16x1152xbf16, #tpu.memory_space<vmem>>, vector<4x128xbf16>,
    %c0_136 = arith.constant 0 : index
    %c4_137 = arith.constant 4 : index
    %c1_138 = arith.constant 1 : index
    %c0_139 = arith.constant 0 : index
    %75 = vector.load %arg1[%c0_136, %c4_137, %c1_138, %c0_139] : memref<1x6x6x128xbf16, #tpu.memory_space<vmem>>, vector<1x1x4x128xbf16>
    %76 = vector.shape_cast %75 : vector<1x1x4x128xbf16> to vector<4x128xbf16>
    %c8_140 = arith.constant 8 : index
    %c896_141 = arith.constant 896 : index
    %77 = vector.load %arg5[%c8_140, %c896_141] : memref<16x1152xbf16, #tpu.memory_space<vmem>>, vector<4x128xbf16>
    tpu.vector_store %arg5[%c8_140, %c896_141], %76 {strides = array<i32>} : memref<16x1152xbf16, #tpu.memory_space<vmem>>, vector<4x128xbf16>,
    %c0_142 = arith.constant 0 : index
    %c4_143 = arith.constant 4 : index
    %c2_144 = arith.constant 2 : index
    %c0_145 = arith.constant 0 : index
    %78 = vector.load %arg1[%c0_142, %c4_143, %c2_144, %c0_145] : memref<1x6x6x128xbf16, #tpu.memory_space<vmem>>, vector<1x1x4x128xbf16>
    %79 = vector.shape_cast %78 : vector<1x1x4x128xbf16> to vector<4x128xbf16>
    %c8_146 = arith.constant 8 : index
    %c1024_147 = arith.constant 1024 : index
    %80 = vector.load %arg5[%c8_146, %c1024_147] : memref<16x1152xbf16, #tpu.memory_space<vmem>>, vector<4x128xbf16>
    tpu.vector_store %arg5[%c8_146, %c1024_147], %79 {strides = array<i32>} : memref<16x1152xbf16, #tpu.memory_space<vmem>>, vector<4x128xbf16>,
    %c0_148 = arith.constant 0 : index
    %c3_149 = arith.constant 3 : index
    %c0_150 = arith.constant 0 : index
    %c0_151 = arith.constant 0 : index
    %81 = vector.load %arg1[%c0_148, %c3_149, %c0_150, %c0_151] : memref<1x6x6x128xbf16, #tpu.memory_space<vmem>>, vector<1x1x4x128xbf16>
    %82 = vector.shape_cast %81 : vector<1x1x4x128xbf16> to vector<4x128xbf16>
    %c12 = arith.constant 12 : index
    %c0_152 = arith.constant 0 : index
    %83 = vector.load %arg5[%c12, %c0_152] : memref<16x1152xbf16, #tpu.memory_space<vmem>>, vector<4x128xbf16>
    tpu.vector_store %arg5[%c12, %c0_152], %82 {strides = array<i32>} : memref<16x1152xbf16, #tpu.memory_space<vmem>>, vector<4x128xbf16>,
    %c0_153 = arith.constant 0 : index
    %c3_154 = arith.constant 3 : index
    %c1_155 = arith.constant 1 : index
    %c0_156 = arith.constant 0 : index
    %84 = vector.load %arg1[%c0_153, %c3_154, %c1_155, %c0_156] : memref<1x6x6x128xbf16, #tpu.memory_space<vmem>>, vector<1x1x4x128xbf16>
    %85 = vector.shape_cast %84 : vector<1x1x4x128xbf16> to vector<4x128xbf16>
    %c12_157 = arith.constant 12 : index
    %c128_158 = arith.constant 128 : index
    %86 = vector.load %arg5[%c12_157, %c128_158] : memref<16x1152xbf16, #tpu.memory_space<vmem>>, vector<4x128xbf16>
    tpu.vector_store %arg5[%c12_157, %c128_158], %85 {strides = array<i32>} : memref<16x1152xbf16, #tpu.memory_space<vmem>>, vector<4x128xbf16>,
    %c0_159 = arith.constant 0 : index
    %c3_160 = arith.constant 3 : index
    %c2_161 = arith.constant 2 : index
    %c0_162 = arith.constant 0 : index
    %87 = vector.load %arg1[%c0_159, %c3_160, %c2_161, %c0_162] : memref<1x6x6x128xbf16, #tpu.memory_space<vmem>>, vector<1x1x4x128xbf16>
    %88 = vector.shape_cast %87 : vector<1x1x4x128xbf16> to vector<4x128xbf16>
    %c12_163 = arith.constant 12 : index
    %c256_164 = arith.constant 256 : index
    %89 = vector.load %arg5[%c12_163, %c256_164] : memref<16x1152xbf16, #tpu.memory_space<vmem>>, vector<4x128xbf16>
    tpu.vector_store %arg5[%c12_163, %c256_164], %88 {strides = array<i32>} : memref<16x1152xbf16, #tpu.memory_space<vmem>>, vector<4x128xbf16>,
    %c0_165 = arith.constant 0 : index
    %c4_166 = arith.constant 4 : index
    %c0_167 = arith.constant 0 : index
    %c0_168 = arith.constant 0 : index
    %90 = vector.load %arg1[%c0_165, %c4_166, %c0_167, %c0_168] : memref<1x6x6x128xbf16, #tpu.memory_space<vmem>>, vector<1x1x4x128xbf16>
    %91 = vector.shape_cast %90 : vector<1x1x4x128xbf16> to vector<4x128xbf16>
    %c12_169 = arith.constant 12 : index
    %c384_170 = arith.constant 384 : index
    %92 = vector.load %arg5[%c12_169, %c384_170] : memref<16x1152xbf16, #tpu.memory_space<vmem>>, vector<4x128xbf16>
    tpu.vector_store %arg5[%c12_169, %c384_170], %91 {strides = array<i32>} : memref<16x1152xbf16, #tpu.memory_space<vmem>>, vector<4x128xbf16>,
    %c0_171 = arith.constant 0 : index
    %c4_172 = arith.constant 4 : index
    %c1_173 = arith.constant 1 : index
    %c0_174 = arith.constant 0 : index
    %93 = vector.load %arg1[%c0_171, %c4_172, %c1_173, %c0_174] : memref<1x6x6x128xbf16, #tpu.memory_space<vmem>>, vector<1x1x4x128xbf16>
    %94 = vector.shape_cast %93 : vector<1x1x4x128xbf16> to vector<4x128xbf16>
    %c12_175 = arith.constant 12 : index
    %c512_176 = arith.constant 512 : index
    %95 = vector.load %arg5[%c12_175, %c512_176] : memref<16x1152xbf16, #tpu.memory_space<vmem>>, vector<4x128xbf16>
    tpu.vector_store %arg5[%c12_175, %c512_176], %94 {strides = array<i32>} : memref<16x1152xbf16, #tpu.memory_space<vmem>>, vector<4x128xbf16>,
    %c0_177 = arith.constant 0 : index
    %c4_178 = arith.constant 4 : index
    %c2_179 = arith.constant 2 : index
    %c0_180 = arith.constant 0 : index
    %96 = vector.load %arg1[%c0_177, %c4_178, %c2_179, %c0_180] : memref<1x6x6x128xbf16, #tpu.memory_space<vmem>>, vector<1x1x4x128xbf16>
    %97 = vector.shape_cast %96 : vector<1x1x4x128xbf16> to vector<4x128xbf16>
    %c12_181 = arith.constant 12 : index
    %c640_182 = arith.constant 640 : index
    %98 = vector.load %arg5[%c12_181, %c640_182] : memref<16x1152xbf16, #tpu.memory_space<vmem>>, vector<4x128xbf16>
    tpu.vector_store %arg5[%c12_181, %c640_182], %97 {strides = array<i32>} : memref<16x1152xbf16, #tpu.memory_space<vmem>>, vector<4x128xbf16>,
    %c0_183 = arith.constant 0 : index
    %c5 = arith.constant 5 : index
    %c0_184 = arith.constant 0 : index
    %c0_185 = arith.constant 0 : index
    %99 = vector.load %arg1[%c0_183, %c5, %c0_184, %c0_185] : memref<1x6x6x128xbf16, #tpu.memory_space<vmem>>, vector<1x1x4x128xbf16>
    %100 = vector.shape_cast %99 : vector<1x1x4x128xbf16> to vector<4x128xbf16>
    %c12_186 = arith.constant 12 : index
    %c768_187 = arith.constant 768 : index
    %101 = vector.load %arg5[%c12_186, %c768_187] : memref<16x1152xbf16, #tpu.memory_space<vmem>>, vector<4x128xbf16>
    tpu.vector_store %arg5[%c12_186, %c768_187], %100 {strides = array<i32>} : memref<16x1152xbf16, #tpu.memory_space<vmem>>, vector<4x128xbf16>,
    %c0_188 = arith.constant 0 : index
    %c5_189 = arith.constant 5 : index
    %c1_190 = arith.constant 1 : index
    %c0_191 = arith.constant 0 : index
    %102 = vector.load %arg1[%c0_188, %c5_189, %c1_190, %c0_191] : memref<1x6x6x128xbf16, #tpu.memory_space<vmem>>, vector<1x1x4x128xbf16>
    %103 = vector.shape_cast %102 : vector<1x1x4x128xbf16> to vector<4x128xbf16>
    %c12_192 = arith.constant 12 : index
    %c896_193 = arith.constant 896 : index
    %104 = vector.load %arg5[%c12_192, %c896_193] : memref<16x1152xbf16, #tpu.memory_space<vmem>>, vector<4x128xbf16>
    tpu.vector_store %arg5[%c12_192, %c896_193], %103 {strides = array<i32>} : memref<16x1152xbf16, #tpu.memory_space<vmem>>, vector<4x128xbf16>,
    %c0_194 = arith.constant 0 : index
    %c5_195 = arith.constant 5 : index
    %c2_196 = arith.constant 2 : index
    %c0_197 = arith.constant 0 : index
    %105 = vector.load %arg1[%c0_194, %c5_195, %c2_196, %c0_197] : memref<1x6x6x128xbf16, #tpu.memory_space<vmem>>, vector<1x1x4x128xbf16>
    %106 = vector.shape_cast %105 : vector<1x1x4x128xbf16> to vector<4x128xbf16>
    %c12_198 = arith.constant 12 : index
    %c1024_199 = arith.constant 1024 : index
    %107 = vector.load %arg5[%c12_198, %c1024_199] : memref<16x1152xbf16, #tpu.memory_space<vmem>>, vector<4x128xbf16>
    tpu.vector_store %arg5[%c12_198, %c1024_199], %106 {strides = array<i32>} : memref<16x1152xbf16, #tpu.memory_space<vmem>>, vector<4x128xbf16>,
    %c0_200 = arith.constant 0 : index
    %c0_201 = arith.constant 0 : index
    %108 = vector.load %arg5[%c0_200, %c0_201] : memref<16x1152xbf16, #tpu.memory_space<vmem>>, vector<16x1152xbf16>
    %c0_202 = arith.constant 0 : index
    %c0_203 = arith.constant 0 : index
    %109 = vector.load %arg2[%c0_202, %c0_203] : memref<1152x256xbf16, #tpu.memory_space<vmem>>, vector<1152x256xbf16>
    %cst = arith.constant dense<0.000000e+00> : vector<16x256xf32>
    %110 = tpu.matmul %108, %109, %cst {dimension_numbers = #tpu.dot_dimension_numbers<[1], [0], [0], [1], [0, 0, 1, 1], [], []>} : vector<16x1152xbf16>, vector<1152x256xbf16>, vector<16x256xf32> -> vector<16x256xf32>
    %c0_204 = arith.constant 0 : index
    %c0_205 = arith.constant 0 : index
    %111 = vector.load %arg3[%c0_204, %c0_205] : memref<1x256xf32, #tpu.memory_space<vmem>>, vector<1x256xf32>
    %112 = vector.broadcast %111 : vector<1x256xf32> to vector<16x256xf32>
    %113 = arith.addf %110, %112 : vector<16x256xf32>
    %cst_206 = arith.constant 0.000000e+00 : f32
    %114 = vector.broadcast %cst_206 : f32 to vector<16x256xf32>
    %115 = arith.maximumf %113, %114 : vector<16x256xf32>
    %116 = arith.truncf %115 : vector<16x256xf32> to vector<16x256xbf16>
    %c0_207 = arith.constant 0 : index
    %c0_208 = arith.constant 0 : index
    %c0_209 = arith.constant 0 : index
    %117 = vector.load %arg4[%c0_207, %c0_208, %c0_209] : memref<1x16x256xbf16, #tpu.memory_space<vmem>>, vector<1x16x256xbf16>
    %118 = vector.shape_cast %117 : vector<1x16x256xbf16> to vector<16x256xbf16>
    %119 = vector.shape_cast %116 : vector<16x256xbf16> to vector<1x16x256xbf16>
    tpu.vector_store %arg4[%c0_207, %c0_208, %c0_209], %119 {strides = array<i32>} : memref<1x16x256xbf16, #tpu.memory_space<vmem>>, vector<1x16x256xbf16>,
    return
  }
  func.func @transform_0(%arg0: i32) -> (i32, i32, i32, i32) {
    %c0_i32 = arith.constant 0 : i32
    %c0_i32_0 = arith.constant 0 : i32
    %c0_i32_1 = arith.constant 0 : i32
    %c0_i32_2 = arith.constant 0 : i32
    return %arg0, %c0_i32, %c0_i32_0, %c0_i32_1 : i32, i32, i32, i32
  }
  func.func @transform_1(%arg0: i32) -> (i32, i32) {
    %c0_i32 = arith.constant 0 : i32
    %c0_i32_0 = arith.constant 0 : i32
    %c0_i32_1 = arith.constant 0 : i32
    return %c0_i32, %c0_i32_0 : i32, i32
  }
  func.func @transform_2(%arg0: i32) -> (i32, i32) {
    %c0_i32 = arith.constant 0 : i32
    %c0_i32_0 = arith.constant 0 : i32
    %c0_i32_1 = arith.constant 0 : i32
    return %c0_i32, %c0_i32_0 : i32, i32
  }
  func.func @transform_3(%arg0: i32) -> (i32, i32, i32) {
    %c0_i32 = arith.constant 0 : i32
    %c0_i32_0 = arith.constant 0 : i32
    %c0_i32_1 = arith.constant 0 : i32
    return %arg0, %c0_i32, %c0_i32_0 : i32, i32, i32
  }
}

module attributes {stable_mosaic.version = 11 : i64} {
  func.func @_conv_kernel(%arg0: i32, %arg1: memref<1x10x10x64xbf16, #tpu.memory_space<vmem>>, %arg2: memref<576x4xbf16, #tpu.memory_space<vmem>>, %arg3: memref<1x4xf32, #tpu.memory_space<vmem>>, %arg4: memref<1x64x4xf32, #tpu.memory_space<vmem>>, %arg5: memref<64x576xbf16, #tpu.memory_space<vmem>>) attributes {dimension_semantics = [#tpu.dimension_semantics<parallel>], iteration_bounds = array<i64: 2>, scalar_prefetch = 0 : i64, scratch_operands = 1 : i64, tpu.core_type = #tpu.core_type<tc>, window_params = [{transform_indices = @transform_0, window_bounds = array<i64: 1, 10, 10, 64>}, {pipeline_mode = #tpu.pipeline_mode<synchronous>, transform_indices = @transform_1, window_bounds = array<i64: 576, 4>}, {pipeline_mode = #tpu.pipeline_mode<synchronous>, transform_indices = @transform_2, window_bounds = array<i64: 1, 4>}, {transform_indices = @transform_3, window_bounds = array<i64: 1, 64, 4>}]} {
    %c0 = arith.constant 0 : index
    %c0_0 = arith.constant 0 : index
    %c0_1 = arith.constant 0 : index
    %c0_2 = arith.constant 0 : index
    %0 = vector.load %arg1[%c0, %c0_0, %c0_1, %c0_2] : memref<1x10x10x64xbf16, #tpu.memory_space<vmem>>, vector<1x1x8x64xbf16>
    %1 = vector.shape_cast %0 : vector<1x1x8x64xbf16> to vector<8x64xbf16>
    %c0_3 = arith.constant 0 : index
    %c0_4 = arith.constant 0 : index
    %2 = vector.load %arg5[%c0_3, %c0_4] : memref<64x576xbf16, #tpu.memory_space<vmem>>, vector<8x64xbf16>
    tpu.vector_store %arg5[%c0_3, %c0_4], %1 {strides = array<i32>} : memref<64x576xbf16, #tpu.memory_space<vmem>>, vector<8x64xbf16>,
    %c0_5 = arith.constant 0 : index
    %c0_6 = arith.constant 0 : index
    %c1 = arith.constant 1 : index
    %c0_7 = arith.constant 0 : index
    %3 = vector.load %arg1[%c0_5, %c0_6, %c1, %c0_7] : memref<1x10x10x64xbf16, #tpu.memory_space<vmem>>, vector<1x1x8x64xbf16>
    %4 = vector.shape_cast %3 : vector<1x1x8x64xbf16> to vector<8x64xbf16>
    %c0_8 = arith.constant 0 : index
    %c64 = arith.constant 64 : index
    %5 = vector.load %arg5[%c0_8, %c64] : memref<64x576xbf16, #tpu.memory_space<vmem>>, vector<8x64xbf16>
    tpu.vector_store %arg5[%c0_8, %c64], %4 {strides = array<i32>} : memref<64x576xbf16, #tpu.memory_space<vmem>>, vector<8x64xbf16>,
    %c0_9 = arith.constant 0 : index
    %c0_10 = arith.constant 0 : index
    %c2 = arith.constant 2 : index
    %c0_11 = arith.constant 0 : index
    %6 = vector.load %arg1[%c0_9, %c0_10, %c2, %c0_11] : memref<1x10x10x64xbf16, #tpu.memory_space<vmem>>, vector<1x1x8x64xbf16>
    %7 = vector.shape_cast %6 : vector<1x1x8x64xbf16> to vector<8x64xbf16>
    %c0_12 = arith.constant 0 : index
    %c128 = arith.constant 128 : index
    %8 = vector.load %arg5[%c0_12, %c128] : memref<64x576xbf16, #tpu.memory_space<vmem>>, vector<8x64xbf16>
    tpu.vector_store %arg5[%c0_12, %c128], %7 {strides = array<i32>} : memref<64x576xbf16, #tpu.memory_space<vmem>>, vector<8x64xbf16>,
    %c0_13 = arith.constant 0 : index
    %c1_14 = arith.constant 1 : index
    %c0_15 = arith.constant 0 : index
    %c0_16 = arith.constant 0 : index
    %9 = vector.load %arg1[%c0_13, %c1_14, %c0_15, %c0_16] : memref<1x10x10x64xbf16, #tpu.memory_space<vmem>>, vector<1x1x8x64xbf16>
    %10 = vector.shape_cast %9 : vector<1x1x8x64xbf16> to vector<8x64xbf16>
    %c0_17 = arith.constant 0 : index
    %c192 = arith.constant 192 : index
    %11 = vector.load %arg5[%c0_17, %c192] : memref<64x576xbf16, #tpu.memory_space<vmem>>, vector<8x64xbf16>
    tpu.vector_store %arg5[%c0_17, %c192], %10 {strides = array<i32>} : memref<64x576xbf16, #tpu.memory_space<vmem>>, vector<8x64xbf16>,
    %c0_18 = arith.constant 0 : index
    %c1_19 = arith.constant 1 : index
    %c1_20 = arith.constant 1 : index
    %c0_21 = arith.constant 0 : index
    %12 = vector.load %arg1[%c0_18, %c1_19, %c1_20, %c0_21] : memref<1x10x10x64xbf16, #tpu.memory_space<vmem>>, vector<1x1x8x64xbf16>
    %13 = vector.shape_cast %12 : vector<1x1x8x64xbf16> to vector<8x64xbf16>
    %c0_22 = arith.constant 0 : index
    %c256 = arith.constant 256 : index
    %14 = vector.load %arg5[%c0_22, %c256] : memref<64x576xbf16, #tpu.memory_space<vmem>>, vector<8x64xbf16>
    tpu.vector_store %arg5[%c0_22, %c256], %13 {strides = array<i32>} : memref<64x576xbf16, #tpu.memory_space<vmem>>, vector<8x64xbf16>,
    %c0_23 = arith.constant 0 : index
    %c1_24 = arith.constant 1 : index
    %c2_25 = arith.constant 2 : index
    %c0_26 = arith.constant 0 : index
    %15 = vector.load %arg1[%c0_23, %c1_24, %c2_25, %c0_26] : memref<1x10x10x64xbf16, #tpu.memory_space<vmem>>, vector<1x1x8x64xbf16>
    %16 = vector.shape_cast %15 : vector<1x1x8x64xbf16> to vector<8x64xbf16>
    %c0_27 = arith.constant 0 : index
    %c320 = arith.constant 320 : index
    %17 = vector.load %arg5[%c0_27, %c320] : memref<64x576xbf16, #tpu.memory_space<vmem>>, vector<8x64xbf16>
    tpu.vector_store %arg5[%c0_27, %c320], %16 {strides = array<i32>} : memref<64x576xbf16, #tpu.memory_space<vmem>>, vector<8x64xbf16>,
    %c0_28 = arith.constant 0 : index
    %c2_29 = arith.constant 2 : index
    %c0_30 = arith.constant 0 : index
    %c0_31 = arith.constant 0 : index
    %18 = vector.load %arg1[%c0_28, %c2_29, %c0_30, %c0_31] : memref<1x10x10x64xbf16, #tpu.memory_space<vmem>>, vector<1x1x8x64xbf16>
    %19 = vector.shape_cast %18 : vector<1x1x8x64xbf16> to vector<8x64xbf16>
    %c0_32 = arith.constant 0 : index
    %c384 = arith.constant 384 : index
    %20 = vector.load %arg5[%c0_32, %c384] : memref<64x576xbf16, #tpu.memory_space<vmem>>, vector<8x64xbf16>
    tpu.vector_store %arg5[%c0_32, %c384], %19 {strides = array<i32>} : memref<64x576xbf16, #tpu.memory_space<vmem>>, vector<8x64xbf16>,
    %c0_33 = arith.constant 0 : index
    %c2_34 = arith.constant 2 : index
    %c1_35 = arith.constant 1 : index
    %c0_36 = arith.constant 0 : index
    %21 = vector.load %arg1[%c0_33, %c2_34, %c1_35, %c0_36] : memref<1x10x10x64xbf16, #tpu.memory_space<vmem>>, vector<1x1x8x64xbf16>
    %22 = vector.shape_cast %21 : vector<1x1x8x64xbf16> to vector<8x64xbf16>
    %c0_37 = arith.constant 0 : index
    %c448 = arith.constant 448 : index
    %23 = vector.load %arg5[%c0_37, %c448] : memref<64x576xbf16, #tpu.memory_space<vmem>>, vector<8x64xbf16>
    tpu.vector_store %arg5[%c0_37, %c448], %22 {strides = array<i32>} : memref<64x576xbf16, #tpu.memory_space<vmem>>, vector<8x64xbf16>,
    %c0_38 = arith.constant 0 : index
    %c2_39 = arith.constant 2 : index
    %c2_40 = arith.constant 2 : index
    %c0_41 = arith.constant 0 : index
    %24 = vector.load %arg1[%c0_38, %c2_39, %c2_40, %c0_41] : memref<1x10x10x64xbf16, #tpu.memory_space<vmem>>, vector<1x1x8x64xbf16>
    %25 = vector.shape_cast %24 : vector<1x1x8x64xbf16> to vector<8x64xbf16>
    %c0_42 = arith.constant 0 : index
    %c512 = arith.constant 512 : index
    %26 = vector.load %arg5[%c0_42, %c512] : memref<64x576xbf16, #tpu.memory_space<vmem>>, vector<8x64xbf16>
    tpu.vector_store %arg5[%c0_42, %c512], %25 {strides = array<i32>} : memref<64x576xbf16, #tpu.memory_space<vmem>>, vector<8x64xbf16>,
    %c0_43 = arith.constant 0 : index
    %c1_44 = arith.constant 1 : index
    %c0_45 = arith.constant 0 : index
    %c0_46 = arith.constant 0 : index
    %27 = vector.load %arg1[%c0_43, %c1_44, %c0_45, %c0_46] : memref<1x10x10x64xbf16, #tpu.memory_space<vmem>>, vector<1x1x8x64xbf16>
    %28 = vector.shape_cast %27 : vector<1x1x8x64xbf16> to vector<8x64xbf16>
    %c8 = arith.constant 8 : index
    %c0_47 = arith.constant 0 : index
    %29 = vector.load %arg5[%c8, %c0_47] : memref<64x576xbf16, #tpu.memory_space<vmem>>, vector<8x64xbf16>
    tpu.vector_store %arg5[%c8, %c0_47], %28 {strides = array<i32>} : memref<64x576xbf16, #tpu.memory_space<vmem>>, vector<8x64xbf16>,
    %c0_48 = arith.constant 0 : index
    %c1_49 = arith.constant 1 : index
    %c1_50 = arith.constant 1 : index
    %c0_51 = arith.constant 0 : index
    %30 = vector.load %arg1[%c0_48, %c1_49, %c1_50, %c0_51] : memref<1x10x10x64xbf16, #tpu.memory_space<vmem>>, vector<1x1x8x64xbf16>
    %31 = vector.shape_cast %30 : vector<1x1x8x64xbf16> to vector<8x64xbf16>
    %c8_52 = arith.constant 8 : index
    %c64_53 = arith.constant 64 : index
    %32 = vector.load %arg5[%c8_52, %c64_53] : memref<64x576xbf16, #tpu.memory_space<vmem>>, vector<8x64xbf16>
    tpu.vector_store %arg5[%c8_52, %c64_53], %31 {strides = array<i32>} : memref<64x576xbf16, #tpu.memory_space<vmem>>, vector<8x64xbf16>,
    %c0_54 = arith.constant 0 : index
    %c1_55 = arith.constant 1 : index
    %c2_56 = arith.constant 2 : index
    %c0_57 = arith.constant 0 : index
    %33 = vector.load %arg1[%c0_54, %c1_55, %c2_56, %c0_57] : memref<1x10x10x64xbf16, #tpu.memory_space<vmem>>, vector<1x1x8x64xbf16>
    %34 = vector.shape_cast %33 : vector<1x1x8x64xbf16> to vector<8x64xbf16>
    %c8_58 = arith.constant 8 : index
    %c128_59 = arith.constant 128 : index
    %35 = vector.load %arg5[%c8_58, %c128_59] : memref<64x576xbf16, #tpu.memory_space<vmem>>, vector<8x64xbf16>
    tpu.vector_store %arg5[%c8_58, %c128_59], %34 {strides = array<i32>} : memref<64x576xbf16, #tpu.memory_space<vmem>>, vector<8x64xbf16>,
    %c0_60 = arith.constant 0 : index
    %c2_61 = arith.constant 2 : index
    %c0_62 = arith.constant 0 : index
    %c0_63 = arith.constant 0 : index
    %36 = vector.load %arg1[%c0_60, %c2_61, %c0_62, %c0_63] : memref<1x10x10x64xbf16, #tpu.memory_space<vmem>>, vector<1x1x8x64xbf16>
    %37 = vector.shape_cast %36 : vector<1x1x8x64xbf16> to vector<8x64xbf16>
    %c8_64 = arith.constant 8 : index
    %c192_65 = arith.constant 192 : index
    %38 = vector.load %arg5[%c8_64, %c192_65] : memref<64x576xbf16, #tpu.memory_space<vmem>>, vector<8x64xbf16>
    tpu.vector_store %arg5[%c8_64, %c192_65], %37 {strides = array<i32>} : memref<64x576xbf16, #tpu.memory_space<vmem>>, vector<8x64xbf16>,
    %c0_66 = arith.constant 0 : index
    %c2_67 = arith.constant 2 : index
    %c1_68 = arith.constant 1 : index
    %c0_69 = arith.constant 0 : index
    %39 = vector.load %arg1[%c0_66, %c2_67, %c1_68, %c0_69] : memref<1x10x10x64xbf16, #tpu.memory_space<vmem>>, vector<1x1x8x64xbf16>
    %40 = vector.shape_cast %39 : vector<1x1x8x64xbf16> to vector<8x64xbf16>
    %c8_70 = arith.constant 8 : index
    %c256_71 = arith.constant 256 : index
    %41 = vector.load %arg5[%c8_70, %c256_71] : memref<64x576xbf16, #tpu.memory_space<vmem>>, vector<8x64xbf16>
    tpu.vector_store %arg5[%c8_70, %c256_71], %40 {strides = array<i32>} : memref<64x576xbf16, #tpu.memory_space<vmem>>, vector<8x64xbf16>,
    %c0_72 = arith.constant 0 : index
    %c2_73 = arith.constant 2 : index
    %c2_74 = arith.constant 2 : index
    %c0_75 = arith.constant 0 : index
    %42 = vector.load %arg1[%c0_72, %c2_73, %c2_74, %c0_75] : memref<1x10x10x64xbf16, #tpu.memory_space<vmem>>, vector<1x1x8x64xbf16>
    %43 = vector.shape_cast %42 : vector<1x1x8x64xbf16> to vector<8x64xbf16>
    %c8_76 = arith.constant 8 : index
    %c320_77 = arith.constant 320 : index
    %44 = vector.load %arg5[%c8_76, %c320_77] : memref<64x576xbf16, #tpu.memory_space<vmem>>, vector<8x64xbf16>
    tpu.vector_store %arg5[%c8_76, %c320_77], %43 {strides = array<i32>} : memref<64x576xbf16, #tpu.memory_space<vmem>>, vector<8x64xbf16>,
    %c0_78 = arith.constant 0 : index
    %c3 = arith.constant 3 : index
    %c0_79 = arith.constant 0 : index
    %c0_80 = arith.constant 0 : index
    %45 = vector.load %arg1[%c0_78, %c3, %c0_79, %c0_80] : memref<1x10x10x64xbf16, #tpu.memory_space<vmem>>, vector<1x1x8x64xbf16>
    %46 = vector.shape_cast %45 : vector<1x1x8x64xbf16> to vector<8x64xbf16>
    %c8_81 = arith.constant 8 : index
    %c384_82 = arith.constant 384 : index
    %47 = vector.load %arg5[%c8_81, %c384_82] : memref<64x576xbf16, #tpu.memory_space<vmem>>, vector<8x64xbf16>
    tpu.vector_store %arg5[%c8_81, %c384_82], %46 {strides = array<i32>} : memref<64x576xbf16, #tpu.memory_space<vmem>>, vector<8x64xbf16>,
    %c0_83 = arith.constant 0 : index
    %c3_84 = arith.constant 3 : index
    %c1_85 = arith.constant 1 : index
    %c0_86 = arith.constant 0 : index
    %48 = vector.load %arg1[%c0_83, %c3_84, %c1_85, %c0_86] : memref<1x10x10x64xbf16, #tpu.memory_space<vmem>>, vector<1x1x8x64xbf16>
    %49 = vector.shape_cast %48 : vector<1x1x8x64xbf16> to vector<8x64xbf16>
    %c8_87 = arith.constant 8 : index
    %c448_88 = arith.constant 448 : index
    %50 = vector.load %arg5[%c8_87, %c448_88] : memref<64x576xbf16, #tpu.memory_space<vmem>>, vector<8x64xbf16>
    tpu.vector_store %arg5[%c8_87, %c448_88], %49 {strides = array<i32>} : memref<64x576xbf16, #tpu.memory_space<vmem>>, vector<8x64xbf16>,
    %c0_89 = arith.constant 0 : index
    %c3_90 = arith.constant 3 : index
    %c2_91 = arith.constant 2 : index
    %c0_92 = arith.constant 0 : index
    %51 = vector.load %arg1[%c0_89, %c3_90, %c2_91, %c0_92] : memref<1x10x10x64xbf16, #tpu.memory_space<vmem>>, vector<1x1x8x64xbf16>
    %52 = vector.shape_cast %51 : vector<1x1x8x64xbf16> to vector<8x64xbf16>
    %c8_93 = arith.constant 8 : index
    %c512_94 = arith.constant 512 : index
    %53 = vector.load %arg5[%c8_93, %c512_94] : memref<64x576xbf16, #tpu.memory_space<vmem>>, vector<8x64xbf16>
    tpu.vector_store %arg5[%c8_93, %c512_94], %52 {strides = array<i32>} : memref<64x576xbf16, #tpu.memory_space<vmem>>, vector<8x64xbf16>,
    %c0_95 = arith.constant 0 : index
    %c2_96 = arith.constant 2 : index
    %c0_97 = arith.constant 0 : index
    %c0_98 = arith.constant 0 : index
    %54 = vector.load %arg1[%c0_95, %c2_96, %c0_97, %c0_98] : memref<1x10x10x64xbf16, #tpu.memory_space<vmem>>, vector<1x1x8x64xbf16>
    %55 = vector.shape_cast %54 : vector<1x1x8x64xbf16> to vector<8x64xbf16>
    %c16 = arith.constant 16 : index
    %c0_99 = arith.constant 0 : index
    %56 = vector.load %arg5[%c16, %c0_99] : memref<64x576xbf16, #tpu.memory_space<vmem>>, vector<8x64xbf16>
    tpu.vector_store %arg5[%c16, %c0_99], %55 {strides = array<i32>} : memref<64x576xbf16, #tpu.memory_space<vmem>>, vector<8x64xbf16>,
    %c0_100 = arith.constant 0 : index
    %c2_101 = arith.constant 2 : index
    %c1_102 = arith.constant 1 : index
    %c0_103 = arith.constant 0 : index
    %57 = vector.load %arg1[%c0_100, %c2_101, %c1_102, %c0_103] : memref<1x10x10x64xbf16, #tpu.memory_space<vmem>>, vector<1x1x8x64xbf16>
    %58 = vector.shape_cast %57 : vector<1x1x8x64xbf16> to vector<8x64xbf16>
    %c16_104 = arith.constant 16 : index
    %c64_105 = arith.constant 64 : index
    %59 = vector.load %arg5[%c16_104, %c64_105] : memref<64x576xbf16, #tpu.memory_space<vmem>>, vector<8x64xbf16>
    tpu.vector_store %arg5[%c16_104, %c64_105], %58 {strides = array<i32>} : memref<64x576xbf16, #tpu.memory_space<vmem>>, vector<8x64xbf16>,
    %c0_106 = arith.constant 0 : index
    %c2_107 = arith.constant 2 : index
    %c2_108 = arith.constant 2 : index
    %c0_109 = arith.constant 0 : index
    %60 = vector.load %arg1[%c0_106, %c2_107, %c2_108, %c0_109] : memref<1x10x10x64xbf16, #tpu.memory_space<vmem>>, vector<1x1x8x64xbf16>
    %61 = vector.shape_cast %60 : vector<1x1x8x64xbf16> to vector<8x64xbf16>
    %c16_110 = arith.constant 16 : index
    %c128_111 = arith.constant 128 : index
    %62 = vector.load %arg5[%c16_110, %c128_111] : memref<64x576xbf16, #tpu.memory_space<vmem>>, vector<8x64xbf16>
    tpu.vector_store %arg5[%c16_110, %c128_111], %61 {strides = array<i32>} : memref<64x576xbf16, #tpu.memory_space<vmem>>, vector<8x64xbf16>,
    %c0_112 = arith.constant 0 : index
    %c3_113 = arith.constant 3 : index
    %c0_114 = arith.constant 0 : index
    %c0_115 = arith.constant 0 : index
    %63 = vector.load %arg1[%c0_112, %c3_113, %c0_114, %c0_115] : memref<1x10x10x64xbf16, #tpu.memory_space<vmem>>, vector<1x1x8x64xbf16>
    %64 = vector.shape_cast %63 : vector<1x1x8x64xbf16> to vector<8x64xbf16>
    %c16_116 = arith.constant 16 : index
    %c192_117 = arith.constant 192 : index
    %65 = vector.load %arg5[%c16_116, %c192_117] : memref<64x576xbf16, #tpu.memory_space<vmem>>, vector<8x64xbf16>
    tpu.vector_store %arg5[%c16_116, %c192_117], %64 {strides = array<i32>} : memref<64x576xbf16, #tpu.memory_space<vmem>>, vector<8x64xbf16>,
    %c0_118 = arith.constant 0 : index
    %c3_119 = arith.constant 3 : index
    %c1_120 = arith.constant 1 : index
    %c0_121 = arith.constant 0 : index
    %66 = vector.load %arg1[%c0_118, %c3_119, %c1_120, %c0_121] : memref<1x10x10x64xbf16, #tpu.memory_space<vmem>>, vector<1x1x8x64xbf16>
    %67 = vector.shape_cast %66 : vector<1x1x8x64xbf16> to vector<8x64xbf16>
    %c16_122 = arith.constant 16 : index
    %c256_123 = arith.constant 256 : index
    %68 = vector.load %arg5[%c16_122, %c256_123] : memref<64x576xbf16, #tpu.memory_space<vmem>>, vector<8x64xbf16>
    tpu.vector_store %arg5[%c16_122, %c256_123], %67 {strides = array<i32>} : memref<64x576xbf16, #tpu.memory_space<vmem>>, vector<8x64xbf16>,
    %c0_124 = arith.constant 0 : index
    %c3_125 = arith.constant 3 : index
    %c2_126 = arith.constant 2 : index
    %c0_127 = arith.constant 0 : index
    %69 = vector.load %arg1[%c0_124, %c3_125, %c2_126, %c0_127] : memref<1x10x10x64xbf16, #tpu.memory_space<vmem>>, vector<1x1x8x64xbf16>
    %70 = vector.shape_cast %69 : vector<1x1x8x64xbf16> to vector<8x64xbf16>
    %c16_128 = arith.constant 16 : index
    %c320_129 = arith.constant 320 : index
    %71 = vector.load %arg5[%c16_128, %c320_129] : memref<64x576xbf16, #tpu.memory_space<vmem>>, vector<8x64xbf16>
    tpu.vector_store %arg5[%c16_128, %c320_129], %70 {strides = array<i32>} : memref<64x576xbf16, #tpu.memory_space<vmem>>, vector<8x64xbf16>,
    %c0_130 = arith.constant 0 : index
    %c4 = arith.constant 4 : index
    %c0_131 = arith.constant 0 : index
    %c0_132 = arith.constant 0 : index
    %72 = vector.load %arg1[%c0_130, %c4, %c0_131, %c0_132] : memref<1x10x10x64xbf16, #tpu.memory_space<vmem>>, vector<1x1x8x64xbf16>
    %73 = vector.shape_cast %72 : vector<1x1x8x64xbf16> to vector<8x64xbf16>
    %c16_133 = arith.constant 16 : index
    %c384_134 = arith.constant 384 : index
    %74 = vector.load %arg5[%c16_133, %c384_134] : memref<64x576xbf16, #tpu.memory_space<vmem>>, vector<8x64xbf16>
    tpu.vector_store %arg5[%c16_133, %c384_134], %73 {strides = array<i32>} : memref<64x576xbf16, #tpu.memory_space<vmem>>, vector<8x64xbf16>,
    %c0_135 = arith.constant 0 : index
    %c4_136 = arith.constant 4 : index
    %c1_137 = arith.constant 1 : index
    %c0_138 = arith.constant 0 : index
    %75 = vector.load %arg1[%c0_135, %c4_136, %c1_137, %c0_138] : memref<1x10x10x64xbf16, #tpu.memory_space<vmem>>, vector<1x1x8x64xbf16>
    %76 = vector.shape_cast %75 : vector<1x1x8x64xbf16> to vector<8x64xbf16>
    %c16_139 = arith.constant 16 : index
    %c448_140 = arith.constant 448 : index
    %77 = vector.load %arg5[%c16_139, %c448_140] : memref<64x576xbf16, #tpu.memory_space<vmem>>, vector<8x64xbf16>
    tpu.vector_store %arg5[%c16_139, %c448_140], %76 {strides = array<i32>} : memref<64x576xbf16, #tpu.memory_space<vmem>>, vector<8x64xbf16>,
    %c0_141 = arith.constant 0 : index
    %c4_142 = arith.constant 4 : index
    %c2_143 = arith.constant 2 : index
    %c0_144 = arith.constant 0 : index
    %78 = vector.load %arg1[%c0_141, %c4_142, %c2_143, %c0_144] : memref<1x10x10x64xbf16, #tpu.memory_space<vmem>>, vector<1x1x8x64xbf16>
    %79 = vector.shape_cast %78 : vector<1x1x8x64xbf16> to vector<8x64xbf16>
    %c16_145 = arith.constant 16 : index
    %c512_146 = arith.constant 512 : index
    %80 = vector.load %arg5[%c16_145, %c512_146] : memref<64x576xbf16, #tpu.memory_space<vmem>>, vector<8x64xbf16>
    tpu.vector_store %arg5[%c16_145, %c512_146], %79 {strides = array<i32>} : memref<64x576xbf16, #tpu.memory_space<vmem>>, vector<8x64xbf16>,
    %c0_147 = arith.constant 0 : index
    %c3_148 = arith.constant 3 : index
    %c0_149 = arith.constant 0 : index
    %c0_150 = arith.constant 0 : index
    %81 = vector.load %arg1[%c0_147, %c3_148, %c0_149, %c0_150] : memref<1x10x10x64xbf16, #tpu.memory_space<vmem>>, vector<1x1x8x64xbf16>
    %82 = vector.shape_cast %81 : vector<1x1x8x64xbf16> to vector<8x64xbf16>
    %c24 = arith.constant 24 : index
    %c0_151 = arith.constant 0 : index
    %83 = vector.load %arg5[%c24, %c0_151] : memref<64x576xbf16, #tpu.memory_space<vmem>>, vector<8x64xbf16>
    tpu.vector_store %arg5[%c24, %c0_151], %82 {strides = array<i32>} : memref<64x576xbf16, #tpu.memory_space<vmem>>, vector<8x64xbf16>,
    %c0_152 = arith.constant 0 : index
    %c3_153 = arith.constant 3 : index
    %c1_154 = arith.constant 1 : index
    %c0_155 = arith.constant 0 : index
    %84 = vector.load %arg1[%c0_152, %c3_153, %c1_154, %c0_155] : memref<1x10x10x64xbf16, #tpu.memory_space<vmem>>, vector<1x1x8x64xbf16>
    %85 = vector.shape_cast %84 : vector<1x1x8x64xbf16> to vector<8x64xbf16>
    %c24_156 = arith.constant 24 : index
    %c64_157 = arith.constant 64 : index
    %86 = vector.load %arg5[%c24_156, %c64_157] : memref<64x576xbf16, #tpu.memory_space<vmem>>, vector<8x64xbf16>
    tpu.vector_store %arg5[%c24_156, %c64_157], %85 {strides = array<i32>} : memref<64x576xbf16, #tpu.memory_space<vmem>>, vector<8x64xbf16>,
    %c0_158 = arith.constant 0 : index
    %c3_159 = arith.constant 3 : index
    %c2_160 = arith.constant 2 : index
    %c0_161 = arith.constant 0 : index
    %87 = vector.load %arg1[%c0_158, %c3_159, %c2_160, %c0_161] : memref<1x10x10x64xbf16, #tpu.memory_space<vmem>>, vector<1x1x8x64xbf16>
    %88 = vector.shape_cast %87 : vector<1x1x8x64xbf16> to vector<8x64xbf16>
    %c24_162 = arith.constant 24 : index
    %c128_163 = arith.constant 128 : index
    %89 = vector.load %arg5[%c24_162, %c128_163] : memref<64x576xbf16, #tpu.memory_space<vmem>>, vector<8x64xbf16>
    tpu.vector_store %arg5[%c24_162, %c128_163], %88 {strides = array<i32>} : memref<64x576xbf16, #tpu.memory_space<vmem>>, vector<8x64xbf16>,
    %c0_164 = arith.constant 0 : index
    %c4_165 = arith.constant 4 : index
    %c0_166 = arith.constant 0 : index
    %c0_167 = arith.constant 0 : index
    %90 = vector.load %arg1[%c0_164, %c4_165, %c0_166, %c0_167] : memref<1x10x10x64xbf16, #tpu.memory_space<vmem>>, vector<1x1x8x64xbf16>
    %91 = vector.shape_cast %90 : vector<1x1x8x64xbf16> to vector<8x64xbf16>
    %c24_168 = arith.constant 24 : index
    %c192_169 = arith.constant 192 : index
    %92 = vector.load %arg5[%c24_168, %c192_169] : memref<64x576xbf16, #tpu.memory_space<vmem>>, vector<8x64xbf16>
    tpu.vector_store %arg5[%c24_168, %c192_169], %91 {strides = array<i32>} : memref<64x576xbf16, #tpu.memory_space<vmem>>, vector<8x64xbf16>,
    %c0_170 = arith.constant 0 : index
    %c4_171 = arith.constant 4 : index
    %c1_172 = arith.constant 1 : index
    %c0_173 = arith.constant 0 : index
    %93 = vector.load %arg1[%c0_170, %c4_171, %c1_172, %c0_173] : memref<1x10x10x64xbf16, #tpu.memory_space<vmem>>, vector<1x1x8x64xbf16>
    %94 = vector.shape_cast %93 : vector<1x1x8x64xbf16> to vector<8x64xbf16>
    %c24_174 = arith.constant 24 : index
    %c256_175 = arith.constant 256 : index
    %95 = vector.load %arg5[%c24_174, %c256_175] : memref<64x576xbf16, #tpu.memory_space<vmem>>, vector<8x64xbf16>
    tpu.vector_store %arg5[%c24_174, %c256_175], %94 {strides = array<i32>} : memref<64x576xbf16, #tpu.memory_space<vmem>>, vector<8x64xbf16>,
    %c0_176 = arith.constant 0 : index
    %c4_177 = arith.constant 4 : index
    %c2_178 = arith.constant 2 : index
    %c0_179 = arith.constant 0 : index
    %96 = vector.load %arg1[%c0_176, %c4_177, %c2_178, %c0_179] : memref<1x10x10x64xbf16, #tpu.memory_space<vmem>>, vector<1x1x8x64xbf16>
    %97 = vector.shape_cast %96 : vector<1x1x8x64xbf16> to vector<8x64xbf16>
    %c24_180 = arith.constant 24 : index
    %c320_181 = arith.constant 320 : index
    %98 = vector.load %arg5[%c24_180, %c320_181] : memref<64x576xbf16, #tpu.memory_space<vmem>>, vector<8x64xbf16>
    tpu.vector_store %arg5[%c24_180, %c320_181], %97 {strides = array<i32>} : memref<64x576xbf16, #tpu.memory_space<vmem>>, vector<8x64xbf16>,
    %c0_182 = arith.constant 0 : index
    %c5 = arith.constant 5 : index
    %c0_183 = arith.constant 0 : index
    %c0_184 = arith.constant 0 : index
    %99 = vector.load %arg1[%c0_182, %c5, %c0_183, %c0_184] : memref<1x10x10x64xbf16, #tpu.memory_space<vmem>>, vector<1x1x8x64xbf16>
    %100 = vector.shape_cast %99 : vector<1x1x8x64xbf16> to vector<8x64xbf16>
    %c24_185 = arith.constant 24 : index
    %c384_186 = arith.constant 384 : index
    %101 = vector.load %arg5[%c24_185, %c384_186] : memref<64x576xbf16, #tpu.memory_space<vmem>>, vector<8x64xbf16>
    tpu.vector_store %arg5[%c24_185, %c384_186], %100 {strides = array<i32>} : memref<64x576xbf16, #tpu.memory_space<vmem>>, vector<8x64xbf16>,
    %c0_187 = arith.constant 0 : index
    %c5_188 = arith.constant 5 : index
    %c1_189 = arith.constant 1 : index
    %c0_190 = arith.constant 0 : index
    %102 = vector.load %arg1[%c0_187, %c5_188, %c1_189, %c0_190] : memref<1x10x10x64xbf16, #tpu.memory_space<vmem>>, vector<1x1x8x64xbf16>
    %103 = vector.shape_cast %102 : vector<1x1x8x64xbf16> to vector<8x64xbf16>
    %c24_191 = arith.constant 24 : index
    %c448_192 = arith.constant 448 : index
    %104 = vector.load %arg5[%c24_191, %c448_192] : memref<64x576xbf16, #tpu.memory_space<vmem>>, vector<8x64xbf16>
    tpu.vector_store %arg5[%c24_191, %c448_192], %103 {strides = array<i32>} : memref<64x576xbf16, #tpu.memory_space<vmem>>, vector<8x64xbf16>,
    %c0_193 = arith.constant 0 : index
    %c5_194 = arith.constant 5 : index
    %c2_195 = arith.constant 2 : index
    %c0_196 = arith.constant 0 : index
    %105 = vector.load %arg1[%c0_193, %c5_194, %c2_195, %c0_196] : memref<1x10x10x64xbf16, #tpu.memory_space<vmem>>, vector<1x1x8x64xbf16>
    %106 = vector.shape_cast %105 : vector<1x1x8x64xbf16> to vector<8x64xbf16>
    %c24_197 = arith.constant 24 : index
    %c512_198 = arith.constant 512 : index
    %107 = vector.load %arg5[%c24_197, %c512_198] : memref<64x576xbf16, #tpu.memory_space<vmem>>, vector<8x64xbf16>
    tpu.vector_store %arg5[%c24_197, %c512_198], %106 {strides = array<i32>} : memref<64x576xbf16, #tpu.memory_space<vmem>>, vector<8x64xbf16>,
    %c0_199 = arith.constant 0 : index
    %c4_200 = arith.constant 4 : index
    %c0_201 = arith.constant 0 : index
    %c0_202 = arith.constant 0 : index
    %108 = vector.load %arg1[%c0_199, %c4_200, %c0_201, %c0_202] : memref<1x10x10x64xbf16, #tpu.memory_space<vmem>>, vector<1x1x8x64xbf16>
    %109 = vector.shape_cast %108 : vector<1x1x8x64xbf16> to vector<8x64xbf16>
    %c32 = arith.constant 32 : index
    %c0_203 = arith.constant 0 : index
    %110 = vector.load %arg5[%c32, %c0_203] : memref<64x576xbf16, #tpu.memory_space<vmem>>, vector<8x64xbf16>
    tpu.vector_store %arg5[%c32, %c0_203], %109 {strides = array<i32>} : memref<64x576xbf16, #tpu.memory_space<vmem>>, vector<8x64xbf16>,
    %c0_204 = arith.constant 0 : index
    %c4_205 = arith.constant 4 : index
    %c1_206 = arith.constant 1 : index
    %c0_207 = arith.constant 0 : index
    %111 = vector.load %arg1[%c0_204, %c4_205, %c1_206, %c0_207] : memref<1x10x10x64xbf16, #tpu.memory_space<vmem>>, vector<1x1x8x64xbf16>
    %112 = vector.shape_cast %111 : vector<1x1x8x64xbf16> to vector<8x64xbf16>
    %c32_208 = arith.constant 32 : index
    %c64_209 = arith.constant 64 : index
    %113 = vector.load %arg5[%c32_208, %c64_209] : memref<64x576xbf16, #tpu.memory_space<vmem>>, vector<8x64xbf16>
    tpu.vector_store %arg5[%c32_208, %c64_209], %112 {strides = array<i32>} : memref<64x576xbf16, #tpu.memory_space<vmem>>, vector<8x64xbf16>,
    %c0_210 = arith.constant 0 : index
    %c4_211 = arith.constant 4 : index
    %c2_212 = arith.constant 2 : index
    %c0_213 = arith.constant 0 : index
    %114 = vector.load %arg1[%c0_210, %c4_211, %c2_212, %c0_213] : memref<1x10x10x64xbf16, #tpu.memory_space<vmem>>, vector<1x1x8x64xbf16>
    %115 = vector.shape_cast %114 : vector<1x1x8x64xbf16> to vector<8x64xbf16>
    %c32_214 = arith.constant 32 : index
    %c128_215 = arith.constant 128 : index
    %116 = vector.load %arg5[%c32_214, %c128_215] : memref<64x576xbf16, #tpu.memory_space<vmem>>, vector<8x64xbf16>
    tpu.vector_store %arg5[%c32_214, %c128_215], %115 {strides = array<i32>} : memref<64x576xbf16, #tpu.memory_space<vmem>>, vector<8x64xbf16>,
    %c0_216 = arith.constant 0 : index
    %c5_217 = arith.constant 5 : index
    %c0_218 = arith.constant 0 : index
    %c0_219 = arith.constant 0 : index
    %117 = vector.load %arg1[%c0_216, %c5_217, %c0_218, %c0_219] : memref<1x10x10x64xbf16, #tpu.memory_space<vmem>>, vector<1x1x8x64xbf16>
    %118 = vector.shape_cast %117 : vector<1x1x8x64xbf16> to vector<8x64xbf16>
    %c32_220 = arith.constant 32 : index
    %c192_221 = arith.constant 192 : index
    %119 = vector.load %arg5[%c32_220, %c192_221] : memref<64x576xbf16, #tpu.memory_space<vmem>>, vector<8x64xbf16>
    tpu.vector_store %arg5[%c32_220, %c192_221], %118 {strides = array<i32>} : memref<64x576xbf16, #tpu.memory_space<vmem>>, vector<8x64xbf16>,
    %c0_222 = arith.constant 0 : index
    %c5_223 = arith.constant 5 : index
    %c1_224 = arith.constant 1 : index
    %c0_225 = arith.constant 0 : index
    %120 = vector.load %arg1[%c0_222, %c5_223, %c1_224, %c0_225] : memref<1x10x10x64xbf16, #tpu.memory_space<vmem>>, vector<1x1x8x64xbf16>
    %121 = vector.shape_cast %120 : vector<1x1x8x64xbf16> to vector<8x64xbf16>
    %c32_226 = arith.constant 32 : index
    %c256_227 = arith.constant 256 : index
    %122 = vector.load %arg5[%c32_226, %c256_227] : memref<64x576xbf16, #tpu.memory_space<vmem>>, vector<8x64xbf16>
    tpu.vector_store %arg5[%c32_226, %c256_227], %121 {strides = array<i32>} : memref<64x576xbf16, #tpu.memory_space<vmem>>, vector<8x64xbf16>,
    %c0_228 = arith.constant 0 : index
    %c5_229 = arith.constant 5 : index
    %c2_230 = arith.constant 2 : index
    %c0_231 = arith.constant 0 : index
    %123 = vector.load %arg1[%c0_228, %c5_229, %c2_230, %c0_231] : memref<1x10x10x64xbf16, #tpu.memory_space<vmem>>, vector<1x1x8x64xbf16>
    %124 = vector.shape_cast %123 : vector<1x1x8x64xbf16> to vector<8x64xbf16>
    %c32_232 = arith.constant 32 : index
    %c320_233 = arith.constant 320 : index
    %125 = vector.load %arg5[%c32_232, %c320_233] : memref<64x576xbf16, #tpu.memory_space<vmem>>, vector<8x64xbf16>
    tpu.vector_store %arg5[%c32_232, %c320_233], %124 {strides = array<i32>} : memref<64x576xbf16, #tpu.memory_space<vmem>>, vector<8x64xbf16>,
    %c0_234 = arith.constant 0 : index
    %c6 = arith.constant 6 : index
    %c0_235 = arith.constant 0 : index
    %c0_236 = arith.constant 0 : index
    %126 = vector.load %arg1[%c0_234, %c6, %c0_235, %c0_236] : memref<1x10x10x64xbf16, #tpu.memory_space<vmem>>, vector<1x1x8x64xbf16>
    %127 = vector.shape_cast %126 : vector<1x1x8x64xbf16> to vector<8x64xbf16>
    %c32_237 = arith.constant 32 : index
    %c384_238 = arith.constant 384 : index
    %128 = vector.load %arg5[%c32_237, %c384_238] : memref<64x576xbf16, #tpu.memory_space<vmem>>, vector<8x64xbf16>
    tpu.vector_store %arg5[%c32_237, %c384_238], %127 {strides = array<i32>} : memref<64x576xbf16, #tpu.memory_space<vmem>>, vector<8x64xbf16>,
    %c0_239 = arith.constant 0 : index
    %c6_240 = arith.constant 6 : index
    %c1_241 = arith.constant 1 : index
    %c0_242 = arith.constant 0 : index
    %129 = vector.load %arg1[%c0_239, %c6_240, %c1_241, %c0_242] : memref<1x10x10x64xbf16, #tpu.memory_space<vmem>>, vector<1x1x8x64xbf16>
    %130 = vector.shape_cast %129 : vector<1x1x8x64xbf16> to vector<8x64xbf16>
    %c32_243 = arith.constant 32 : index
    %c448_244 = arith.constant 448 : index
    %131 = vector.load %arg5[%c32_243, %c448_244] : memref<64x576xbf16, #tpu.memory_space<vmem>>, vector<8x64xbf16>
    tpu.vector_store %arg5[%c32_243, %c448_244], %130 {strides = array<i32>} : memref<64x576xbf16, #tpu.memory_space<vmem>>, vector<8x64xbf16>,
    %c0_245 = arith.constant 0 : index
    %c6_246 = arith.constant 6 : index
    %c2_247 = arith.constant 2 : index
    %c0_248 = arith.constant 0 : index
    %132 = vector.load %arg1[%c0_245, %c6_246, %c2_247, %c0_248] : memref<1x10x10x64xbf16, #tpu.memory_space<vmem>>, vector<1x1x8x64xbf16>
    %133 = vector.shape_cast %132 : vector<1x1x8x64xbf16> to vector<8x64xbf16>
    %c32_249 = arith.constant 32 : index
    %c512_250 = arith.constant 512 : index
    %134 = vector.load %arg5[%c32_249, %c512_250] : memref<64x576xbf16, #tpu.memory_space<vmem>>, vector<8x64xbf16>
    tpu.vector_store %arg5[%c32_249, %c512_250], %133 {strides = array<i32>} : memref<64x576xbf16, #tpu.memory_space<vmem>>, vector<8x64xbf16>,
    %c0_251 = arith.constant 0 : index
    %c5_252 = arith.constant 5 : index
    %c0_253 = arith.constant 0 : index
    %c0_254 = arith.constant 0 : index
    %135 = vector.load %arg1[%c0_251, %c5_252, %c0_253, %c0_254] : memref<1x10x10x64xbf16, #tpu.memory_space<vmem>>, vector<1x1x8x64xbf16>
    %136 = vector.shape_cast %135 : vector<1x1x8x64xbf16> to vector<8x64xbf16>
    %c40 = arith.constant 40 : index
    %c0_255 = arith.constant 0 : index
    %137 = vector.load %arg5[%c40, %c0_255] : memref<64x576xbf16, #tpu.memory_space<vmem>>, vector<8x64xbf16>
    tpu.vector_store %arg5[%c40, %c0_255], %136 {strides = array<i32>} : memref<64x576xbf16, #tpu.memory_space<vmem>>, vector<8x64xbf16>,
    %c0_256 = arith.constant 0 : index
    %c5_257 = arith.constant 5 : index
    %c1_258 = arith.constant 1 : index
    %c0_259 = arith.constant 0 : index
    %138 = vector.load %arg1[%c0_256, %c5_257, %c1_258, %c0_259] : memref<1x10x10x64xbf16, #tpu.memory_space<vmem>>, vector<1x1x8x64xbf16>
    %139 = vector.shape_cast %138 : vector<1x1x8x64xbf16> to vector<8x64xbf16>
    %c40_260 = arith.constant 40 : index
    %c64_261 = arith.constant 64 : index
    %140 = vector.load %arg5[%c40_260, %c64_261] : memref<64x576xbf16, #tpu.memory_space<vmem>>, vector<8x64xbf16>
    tpu.vector_store %arg5[%c40_260, %c64_261], %139 {strides = array<i32>} : memref<64x576xbf16, #tpu.memory_space<vmem>>, vector<8x64xbf16>,
    %c0_262 = arith.constant 0 : index
    %c5_263 = arith.constant 5 : index
    %c2_264 = arith.constant 2 : index
    %c0_265 = arith.constant 0 : index
    %141 = vector.load %arg1[%c0_262, %c5_263, %c2_264, %c0_265] : memref<1x10x10x64xbf16, #tpu.memory_space<vmem>>, vector<1x1x8x64xbf16>
    %142 = vector.shape_cast %141 : vector<1x1x8x64xbf16> to vector<8x64xbf16>
    %c40_266 = arith.constant 40 : index
    %c128_267 = arith.constant 128 : index
    %143 = vector.load %arg5[%c40_266, %c128_267] : memref<64x576xbf16, #tpu.memory_space<vmem>>, vector<8x64xbf16>
    tpu.vector_store %arg5[%c40_266, %c128_267], %142 {strides = array<i32>} : memref<64x576xbf16, #tpu.memory_space<vmem>>, vector<8x64xbf16>,
    %c0_268 = arith.constant 0 : index
    %c6_269 = arith.constant 6 : index
    %c0_270 = arith.constant 0 : index
    %c0_271 = arith.constant 0 : index
    %144 = vector.load %arg1[%c0_268, %c6_269, %c0_270, %c0_271] : memref<1x10x10x64xbf16, #tpu.memory_space<vmem>>, vector<1x1x8x64xbf16>
    %145 = vector.shape_cast %144 : vector<1x1x8x64xbf16> to vector<8x64xbf16>
    %c40_272 = arith.constant 40 : index
    %c192_273 = arith.constant 192 : index
    %146 = vector.load %arg5[%c40_272, %c192_273] : memref<64x576xbf16, #tpu.memory_space<vmem>>, vector<8x64xbf16>
    tpu.vector_store %arg5[%c40_272, %c192_273], %145 {strides = array<i32>} : memref<64x576xbf16, #tpu.memory_space<vmem>>, vector<8x64xbf16>,
    %c0_274 = arith.constant 0 : index
    %c6_275 = arith.constant 6 : index
    %c1_276 = arith.constant 1 : index
    %c0_277 = arith.constant 0 : index
    %147 = vector.load %arg1[%c0_274, %c6_275, %c1_276, %c0_277] : memref<1x10x10x64xbf16, #tpu.memory_space<vmem>>, vector<1x1x8x64xbf16>
    %148 = vector.shape_cast %147 : vector<1x1x8x64xbf16> to vector<8x64xbf16>
    %c40_278 = arith.constant 40 : index
    %c256_279 = arith.constant 256 : index
    %149 = vector.load %arg5[%c40_278, %c256_279] : memref<64x576xbf16, #tpu.memory_space<vmem>>, vector<8x64xbf16>
    tpu.vector_store %arg5[%c40_278, %c256_279], %148 {strides = array<i32>} : memref<64x576xbf16, #tpu.memory_space<vmem>>, vector<8x64xbf16>,
    %c0_280 = arith.constant 0 : index
    %c6_281 = arith.constant 6 : index
    %c2_282 = arith.constant 2 : index
    %c0_283 = arith.constant 0 : index
    %150 = vector.load %arg1[%c0_280, %c6_281, %c2_282, %c0_283] : memref<1x10x10x64xbf16, #tpu.memory_space<vmem>>, vector<1x1x8x64xbf16>
    %151 = vector.shape_cast %150 : vector<1x1x8x64xbf16> to vector<8x64xbf16>
    %c40_284 = arith.constant 40 : index
    %c320_285 = arith.constant 320 : index
    %152 = vector.load %arg5[%c40_284, %c320_285] : memref<64x576xbf16, #tpu.memory_space<vmem>>, vector<8x64xbf16>
    tpu.vector_store %arg5[%c40_284, %c320_285], %151 {strides = array<i32>} : memref<64x576xbf16, #tpu.memory_space<vmem>>, vector<8x64xbf16>,
    %c0_286 = arith.constant 0 : index
    %c7 = arith.constant 7 : index
    %c0_287 = arith.constant 0 : index
    %c0_288 = arith.constant 0 : index
    %153 = vector.load %arg1[%c0_286, %c7, %c0_287, %c0_288] : memref<1x10x10x64xbf16, #tpu.memory_space<vmem>>, vector<1x1x8x64xbf16>
    %154 = vector.shape_cast %153 : vector<1x1x8x64xbf16> to vector<8x64xbf16>
    %c40_289 = arith.constant 40 : index
    %c384_290 = arith.constant 384 : index
    %155 = vector.load %arg5[%c40_289, %c384_290] : memref<64x576xbf16, #tpu.memory_space<vmem>>, vector<8x64xbf16>
    tpu.vector_store %arg5[%c40_289, %c384_290], %154 {strides = array<i32>} : memref<64x576xbf16, #tpu.memory_space<vmem>>, vector<8x64xbf16>,
    %c0_291 = arith.constant 0 : index
    %c7_292 = arith.constant 7 : index
    %c1_293 = arith.constant 1 : index
    %c0_294 = arith.constant 0 : index
    %156 = vector.load %arg1[%c0_291, %c7_292, %c1_293, %c0_294] : memref<1x10x10x64xbf16, #tpu.memory_space<vmem>>, vector<1x1x8x64xbf16>
    %157 = vector.shape_cast %156 : vector<1x1x8x64xbf16> to vector<8x64xbf16>
    %c40_295 = arith.constant 40 : index
    %c448_296 = arith.constant 448 : index
    %158 = vector.load %arg5[%c40_295, %c448_296] : memref<64x576xbf16, #tpu.memory_space<vmem>>, vector<8x64xbf16>
    tpu.vector_store %arg5[%c40_295, %c448_296], %157 {strides = array<i32>} : memref<64x576xbf16, #tpu.memory_space<vmem>>, vector<8x64xbf16>,
    %c0_297 = arith.constant 0 : index
    %c7_298 = arith.constant 7 : index
    %c2_299 = arith.constant 2 : index
    %c0_300 = arith.constant 0 : index
    %159 = vector.load %arg1[%c0_297, %c7_298, %c2_299, %c0_300] : memref<1x10x10x64xbf16, #tpu.memory_space<vmem>>, vector<1x1x8x64xbf16>
    %160 = vector.shape_cast %159 : vector<1x1x8x64xbf16> to vector<8x64xbf16>
    %c40_301 = arith.constant 40 : index
    %c512_302 = arith.constant 512 : index
    %161 = vector.load %arg5[%c40_301, %c512_302] : memref<64x576xbf16, #tpu.memory_space<vmem>>, vector<8x64xbf16>
    tpu.vector_store %arg5[%c40_301, %c512_302], %160 {strides = array<i32>} : memref<64x576xbf16, #tpu.memory_space<vmem>>, vector<8x64xbf16>,
    %c0_303 = arith.constant 0 : index
    %c6_304 = arith.constant 6 : index
    %c0_305 = arith.constant 0 : index
    %c0_306 = arith.constant 0 : index
    %162 = vector.load %arg1[%c0_303, %c6_304, %c0_305, %c0_306] : memref<1x10x10x64xbf16, #tpu.memory_space<vmem>>, vector<1x1x8x64xbf16>
    %163 = vector.shape_cast %162 : vector<1x1x8x64xbf16> to vector<8x64xbf16>
    %c48 = arith.constant 48 : index
    %c0_307 = arith.constant 0 : index
    %164 = vector.load %arg5[%c48, %c0_307] : memref<64x576xbf16, #tpu.memory_space<vmem>>, vector<8x64xbf16>
    tpu.vector_store %arg5[%c48, %c0_307], %163 {strides = array<i32>} : memref<64x576xbf16, #tpu.memory_space<vmem>>, vector<8x64xbf16>,
    %c0_308 = arith.constant 0 : index
    %c6_309 = arith.constant 6 : index
    %c1_310 = arith.constant 1 : index
    %c0_311 = arith.constant 0 : index
    %165 = vector.load %arg1[%c0_308, %c6_309, %c1_310, %c0_311] : memref<1x10x10x64xbf16, #tpu.memory_space<vmem>>, vector<1x1x8x64xbf16>
    %166 = vector.shape_cast %165 : vector<1x1x8x64xbf16> to vector<8x64xbf16>
    %c48_312 = arith.constant 48 : index
    %c64_313 = arith.constant 64 : index
    %167 = vector.load %arg5[%c48_312, %c64_313] : memref<64x576xbf16, #tpu.memory_space<vmem>>, vector<8x64xbf16>
    tpu.vector_store %arg5[%c48_312, %c64_313], %166 {strides = array<i32>} : memref<64x576xbf16, #tpu.memory_space<vmem>>, vector<8x64xbf16>,
    %c0_314 = arith.constant 0 : index
    %c6_315 = arith.constant 6 : index
    %c2_316 = arith.constant 2 : index
    %c0_317 = arith.constant 0 : index
    %168 = vector.load %arg1[%c0_314, %c6_315, %c2_316, %c0_317] : memref<1x10x10x64xbf16, #tpu.memory_space<vmem>>, vector<1x1x8x64xbf16>
    %169 = vector.shape_cast %168 : vector<1x1x8x64xbf16> to vector<8x64xbf16>
    %c48_318 = arith.constant 48 : index
    %c128_319 = arith.constant 128 : index
    %170 = vector.load %arg5[%c48_318, %c128_319] : memref<64x576xbf16, #tpu.memory_space<vmem>>, vector<8x64xbf16>
    tpu.vector_store %arg5[%c48_318, %c128_319], %169 {strides = array<i32>} : memref<64x576xbf16, #tpu.memory_space<vmem>>, vector<8x64xbf16>,
    %c0_320 = arith.constant 0 : index
    %c7_321 = arith.constant 7 : index
    %c0_322 = arith.constant 0 : index
    %c0_323 = arith.constant 0 : index
    %171 = vector.load %arg1[%c0_320, %c7_321, %c0_322, %c0_323] : memref<1x10x10x64xbf16, #tpu.memory_space<vmem>>, vector<1x1x8x64xbf16>
    %172 = vector.shape_cast %171 : vector<1x1x8x64xbf16> to vector<8x64xbf16>
    %c48_324 = arith.constant 48 : index
    %c192_325 = arith.constant 192 : index
    %173 = vector.load %arg5[%c48_324, %c192_325] : memref<64x576xbf16, #tpu.memory_space<vmem>>, vector<8x64xbf16>
    tpu.vector_store %arg5[%c48_324, %c192_325], %172 {strides = array<i32>} : memref<64x576xbf16, #tpu.memory_space<vmem>>, vector<8x64xbf16>,
    %c0_326 = arith.constant 0 : index
    %c7_327 = arith.constant 7 : index
    %c1_328 = arith.constant 1 : index
    %c0_329 = arith.constant 0 : index
    %174 = vector.load %arg1[%c0_326, %c7_327, %c1_328, %c0_329] : memref<1x10x10x64xbf16, #tpu.memory_space<vmem>>, vector<1x1x8x64xbf16>
    %175 = vector.shape_cast %174 : vector<1x1x8x64xbf16> to vector<8x64xbf16>
    %c48_330 = arith.constant 48 : index
    %c256_331 = arith.constant 256 : index
    %176 = vector.load %arg5[%c48_330, %c256_331] : memref<64x576xbf16, #tpu.memory_space<vmem>>, vector<8x64xbf16>
    tpu.vector_store %arg5[%c48_330, %c256_331], %175 {strides = array<i32>} : memref<64x576xbf16, #tpu.memory_space<vmem>>, vector<8x64xbf16>,
    %c0_332 = arith.constant 0 : index
    %c7_333 = arith.constant 7 : index
    %c2_334 = arith.constant 2 : index
    %c0_335 = arith.constant 0 : index
    %177 = vector.load %arg1[%c0_332, %c7_333, %c2_334, %c0_335] : memref<1x10x10x64xbf16, #tpu.memory_space<vmem>>, vector<1x1x8x64xbf16>
    %178 = vector.shape_cast %177 : vector<1x1x8x64xbf16> to vector<8x64xbf16>
    %c48_336 = arith.constant 48 : index
    %c320_337 = arith.constant 320 : index
    %179 = vector.load %arg5[%c48_336, %c320_337] : memref<64x576xbf16, #tpu.memory_space<vmem>>, vector<8x64xbf16>
    tpu.vector_store %arg5[%c48_336, %c320_337], %178 {strides = array<i32>} : memref<64x576xbf16, #tpu.memory_space<vmem>>, vector<8x64xbf16>,
    %c0_338 = arith.constant 0 : index
    %c8_339 = arith.constant 8 : index
    %c0_340 = arith.constant 0 : index
    %c0_341 = arith.constant 0 : index
    %180 = vector.load %arg1[%c0_338, %c8_339, %c0_340, %c0_341] : memref<1x10x10x64xbf16, #tpu.memory_space<vmem>>, vector<1x1x8x64xbf16>
    %181 = vector.shape_cast %180 : vector<1x1x8x64xbf16> to vector<8x64xbf16>
    %c48_342 = arith.constant 48 : index
    %c384_343 = arith.constant 384 : index
    %182 = vector.load %arg5[%c48_342, %c384_343] : memref<64x576xbf16, #tpu.memory_space<vmem>>, vector<8x64xbf16>
    tpu.vector_store %arg5[%c48_342, %c384_343], %181 {strides = array<i32>} : memref<64x576xbf16, #tpu.memory_space<vmem>>, vector<8x64xbf16>,
    %c0_344 = arith.constant 0 : index
    %c8_345 = arith.constant 8 : index
    %c1_346 = arith.constant 1 : index
    %c0_347 = arith.constant 0 : index
    %183 = vector.load %arg1[%c0_344, %c8_345, %c1_346, %c0_347] : memref<1x10x10x64xbf16, #tpu.memory_space<vmem>>, vector<1x1x8x64xbf16>
    %184 = vector.shape_cast %183 : vector<1x1x8x64xbf16> to vector<8x64xbf16>
    %c48_348 = arith.constant 48 : index
    %c448_349 = arith.constant 448 : index
    %185 = vector.load %arg5[%c48_348, %c448_349] : memref<64x576xbf16, #tpu.memory_space<vmem>>, vector<8x64xbf16>
    tpu.vector_store %arg5[%c48_348, %c448_349], %184 {strides = array<i32>} : memref<64x576xbf16, #tpu.memory_space<vmem>>, vector<8x64xbf16>,
    %c0_350 = arith.constant 0 : index
    %c8_351 = arith.constant 8 : index
    %c2_352 = arith.constant 2 : index
    %c0_353 = arith.constant 0 : index
    %186 = vector.load %arg1[%c0_350, %c8_351, %c2_352, %c0_353] : memref<1x10x10x64xbf16, #tpu.memory_space<vmem>>, vector<1x1x8x64xbf16>
    %187 = vector.shape_cast %186 : vector<1x1x8x64xbf16> to vector<8x64xbf16>
    %c48_354 = arith.constant 48 : index
    %c512_355 = arith.constant 512 : index
    %188 = vector.load %arg5[%c48_354, %c512_355] : memref<64x576xbf16, #tpu.memory_space<vmem>>, vector<8x64xbf16>
    tpu.vector_store %arg5[%c48_354, %c512_355], %187 {strides = array<i32>} : memref<64x576xbf16, #tpu.memory_space<vmem>>, vector<8x64xbf16>,
    %c0_356 = arith.constant 0 : index
    %c7_357 = arith.constant 7 : index
    %c0_358 = arith.constant 0 : index
    %c0_359 = arith.constant 0 : index
    %189 = vector.load %arg1[%c0_356, %c7_357, %c0_358, %c0_359] : memref<1x10x10x64xbf16, #tpu.memory_space<vmem>>, vector<1x1x8x64xbf16>
    %190 = vector.shape_cast %189 : vector<1x1x8x64xbf16> to vector<8x64xbf16>
    %c56 = arith.constant 56 : index
    %c0_360 = arith.constant 0 : index
    %191 = vector.load %arg5[%c56, %c0_360] : memref<64x576xbf16, #tpu.memory_space<vmem>>, vector<8x64xbf16>
    tpu.vector_store %arg5[%c56, %c0_360], %190 {strides = array<i32>} : memref<64x576xbf16, #tpu.memory_space<vmem>>, vector<8x64xbf16>,
    %c0_361 = arith.constant 0 : index
    %c7_362 = arith.constant 7 : index
    %c1_363 = arith.constant 1 : index
    %c0_364 = arith.constant 0 : index
    %192 = vector.load %arg1[%c0_361, %c7_362, %c1_363, %c0_364] : memref<1x10x10x64xbf16, #tpu.memory_space<vmem>>, vector<1x1x8x64xbf16>
    %193 = vector.shape_cast %192 : vector<1x1x8x64xbf16> to vector<8x64xbf16>
    %c56_365 = arith.constant 56 : index
    %c64_366 = arith.constant 64 : index
    %194 = vector.load %arg5[%c56_365, %c64_366] : memref<64x576xbf16, #tpu.memory_space<vmem>>, vector<8x64xbf16>
    tpu.vector_store %arg5[%c56_365, %c64_366], %193 {strides = array<i32>} : memref<64x576xbf16, #tpu.memory_space<vmem>>, vector<8x64xbf16>,
    %c0_367 = arith.constant 0 : index
    %c7_368 = arith.constant 7 : index
    %c2_369 = arith.constant 2 : index
    %c0_370 = arith.constant 0 : index
    %195 = vector.load %arg1[%c0_367, %c7_368, %c2_369, %c0_370] : memref<1x10x10x64xbf16, #tpu.memory_space<vmem>>, vector<1x1x8x64xbf16>
    %196 = vector.shape_cast %195 : vector<1x1x8x64xbf16> to vector<8x64xbf16>
    %c56_371 = arith.constant 56 : index
    %c128_372 = arith.constant 128 : index
    %197 = vector.load %arg5[%c56_371, %c128_372] : memref<64x576xbf16, #tpu.memory_space<vmem>>, vector<8x64xbf16>
    tpu.vector_store %arg5[%c56_371, %c128_372], %196 {strides = array<i32>} : memref<64x576xbf16, #tpu.memory_space<vmem>>, vector<8x64xbf16>,
    %c0_373 = arith.constant 0 : index
    %c8_374 = arith.constant 8 : index
    %c0_375 = arith.constant 0 : index
    %c0_376 = arith.constant 0 : index
    %198 = vector.load %arg1[%c0_373, %c8_374, %c0_375, %c0_376] : memref<1x10x10x64xbf16, #tpu.memory_space<vmem>>, vector<1x1x8x64xbf16>
    %199 = vector.shape_cast %198 : vector<1x1x8x64xbf16> to vector<8x64xbf16>
    %c56_377 = arith.constant 56 : index
    %c192_378 = arith.constant 192 : index
    %200 = vector.load %arg5[%c56_377, %c192_378] : memref<64x576xbf16, #tpu.memory_space<vmem>>, vector<8x64xbf16>
    tpu.vector_store %arg5[%c56_377, %c192_378], %199 {strides = array<i32>} : memref<64x576xbf16, #tpu.memory_space<vmem>>, vector<8x64xbf16>,
    %c0_379 = arith.constant 0 : index
    %c8_380 = arith.constant 8 : index
    %c1_381 = arith.constant 1 : index
    %c0_382 = arith.constant 0 : index
    %201 = vector.load %arg1[%c0_379, %c8_380, %c1_381, %c0_382] : memref<1x10x10x64xbf16, #tpu.memory_space<vmem>>, vector<1x1x8x64xbf16>
    %202 = vector.shape_cast %201 : vector<1x1x8x64xbf16> to vector<8x64xbf16>
    %c56_383 = arith.constant 56 : index
    %c256_384 = arith.constant 256 : index
    %203 = vector.load %arg5[%c56_383, %c256_384] : memref<64x576xbf16, #tpu.memory_space<vmem>>, vector<8x64xbf16>
    tpu.vector_store %arg5[%c56_383, %c256_384], %202 {strides = array<i32>} : memref<64x576xbf16, #tpu.memory_space<vmem>>, vector<8x64xbf16>,
    %c0_385 = arith.constant 0 : index
    %c8_386 = arith.constant 8 : index
    %c2_387 = arith.constant 2 : index
    %c0_388 = arith.constant 0 : index
    %204 = vector.load %arg1[%c0_385, %c8_386, %c2_387, %c0_388] : memref<1x10x10x64xbf16, #tpu.memory_space<vmem>>, vector<1x1x8x64xbf16>
    %205 = vector.shape_cast %204 : vector<1x1x8x64xbf16> to vector<8x64xbf16>
    %c56_389 = arith.constant 56 : index
    %c320_390 = arith.constant 320 : index
    %206 = vector.load %arg5[%c56_389, %c320_390] : memref<64x576xbf16, #tpu.memory_space<vmem>>, vector<8x64xbf16>
    tpu.vector_store %arg5[%c56_389, %c320_390], %205 {strides = array<i32>} : memref<64x576xbf16, #tpu.memory_space<vmem>>, vector<8x64xbf16>,
    %c0_391 = arith.constant 0 : index
    %c9 = arith.constant 9 : index
    %c0_392 = arith.constant 0 : index
    %c0_393 = arith.constant 0 : index
    %207 = vector.load %arg1[%c0_391, %c9, %c0_392, %c0_393] : memref<1x10x10x64xbf16, #tpu.memory_space<vmem>>, vector<1x1x8x64xbf16>
    %208 = vector.shape_cast %207 : vector<1x1x8x64xbf16> to vector<8x64xbf16>
    %c56_394 = arith.constant 56 : index
    %c384_395 = arith.constant 384 : index
    %209 = vector.load %arg5[%c56_394, %c384_395] : memref<64x576xbf16, #tpu.memory_space<vmem>>, vector<8x64xbf16>
    tpu.vector_store %arg5[%c56_394, %c384_395], %208 {strides = array<i32>} : memref<64x576xbf16, #tpu.memory_space<vmem>>, vector<8x64xbf16>,
    %c0_396 = arith.constant 0 : index
    %c9_397 = arith.constant 9 : index
    %c1_398 = arith.constant 1 : index
    %c0_399 = arith.constant 0 : index
    %210 = vector.load %arg1[%c0_396, %c9_397, %c1_398, %c0_399] : memref<1x10x10x64xbf16, #tpu.memory_space<vmem>>, vector<1x1x8x64xbf16>
    %211 = vector.shape_cast %210 : vector<1x1x8x64xbf16> to vector<8x64xbf16>
    %c56_400 = arith.constant 56 : index
    %c448_401 = arith.constant 448 : index
    %212 = vector.load %arg5[%c56_400, %c448_401] : memref<64x576xbf16, #tpu.memory_space<vmem>>, vector<8x64xbf16>
    tpu.vector_store %arg5[%c56_400, %c448_401], %211 {strides = array<i32>} : memref<64x576xbf16, #tpu.memory_space<vmem>>, vector<8x64xbf16>,
    %c0_402 = arith.constant 0 : index
    %c9_403 = arith.constant 9 : index
    %c2_404 = arith.constant 2 : index
    %c0_405 = arith.constant 0 : index
    %213 = vector.load %arg1[%c0_402, %c9_403, %c2_404, %c0_405] : memref<1x10x10x64xbf16, #tpu.memory_space<vmem>>, vector<1x1x8x64xbf16>
    %214 = vector.shape_cast %213 : vector<1x1x8x64xbf16> to vector<8x64xbf16>
    %c56_406 = arith.constant 56 : index
    %c512_407 = arith.constant 512 : index
    %215 = vector.load %arg5[%c56_406, %c512_407] : memref<64x576xbf16, #tpu.memory_space<vmem>>, vector<8x64xbf16>
    tpu.vector_store %arg5[%c56_406, %c512_407], %214 {strides = array<i32>} : memref<64x576xbf16, #tpu.memory_space<vmem>>, vector<8x64xbf16>,
    %c0_408 = arith.constant 0 : index
    %c0_409 = arith.constant 0 : index
    %216 = vector.load %arg5[%c0_408, %c0_409] : memref<64x576xbf16, #tpu.memory_space<vmem>>, vector<64x576xbf16>
    %c0_410 = arith.constant 0 : index
    %c0_411 = arith.constant 0 : index
    %217 = vector.load %arg2[%c0_410, %c0_411] : memref<576x4xbf16, #tpu.memory_space<vmem>>, vector<576x4xbf16>
    %cst = arith.constant dense<0.000000e+00> : vector<64x4xf32>
    %218 = tpu.matmul %216, %217, %cst {dimension_numbers = #tpu.dot_dimension_numbers<[1], [0], [0], [1], [0, 0, 1, 1], [], []>} : vector<64x576xbf16>, vector<576x4xbf16>, vector<64x4xf32> -> vector<64x4xf32>
    %c0_412 = arith.constant 0 : index
    %c0_413 = arith.constant 0 : index
    %219 = vector.load %arg3[%c0_412, %c0_413] : memref<1x4xf32, #tpu.memory_space<vmem>>, vector<1x4xf32>
    %220 = vector.broadcast %219 : vector<1x4xf32> to vector<64x4xf32>
    %221 = arith.addf %218, %220 : vector<64x4xf32>
    %222 = math.tanh %221 : vector<64x4xf32>
    %c0_414 = arith.constant 0 : index
    %c0_415 = arith.constant 0 : index
    %c0_416 = arith.constant 0 : index
    %223 = vector.load %arg4[%c0_414, %c0_415, %c0_416] : memref<1x64x4xf32, #tpu.memory_space<vmem>>, vector<1x64x4xf32>
    %224 = vector.shape_cast %223 : vector<1x64x4xf32> to vector<64x4xf32>
    %225 = vector.shape_cast %222 : vector<64x4xf32> to vector<1x64x4xf32>
    tpu.vector_store %arg4[%c0_414, %c0_415, %c0_416], %225 {strides = array<i32>} : memref<1x64x4xf32, #tpu.memory_space<vmem>>, vector<1x64x4xf32>,
    return
  }
  func.func @transform_0(%arg0: i32) -> (i32, i32, i32, i32) {
    %c0_i32 = arith.constant 0 : i32
    %c0_i32_0 = arith.constant 0 : i32
    %c0_i32_1 = arith.constant 0 : i32
    %c0_i32_2 = arith.constant 0 : i32
    return %arg0, %c0_i32, %c0_i32_0, %c0_i32_1 : i32, i32, i32, i32
  }
  func.func @transform_1(%arg0: i32) -> (i32, i32) {
    %c0_i32 = arith.constant 0 : i32
    %c0_i32_0 = arith.constant 0 : i32
    %c0_i32_1 = arith.constant 0 : i32
    return %c0_i32, %c0_i32_0 : i32, i32
  }
  func.func @transform_2(%arg0: i32) -> (i32, i32) {
    %c0_i32 = arith.constant 0 : i32
    %c0_i32_0 = arith.constant 0 : i32
    %c0_i32_1 = arith.constant 0 : i32
    return %c0_i32, %c0_i32_0 : i32, i32
  }
  func.func @transform_3(%arg0: i32) -> (i32, i32, i32) {
    %c0_i32 = arith.constant 0 : i32
    %c0_i32_0 = arith.constant 0 : i32
    %c0_i32_1 = arith.constant 0 : i32
    return %arg0, %c0_i32, %c0_i32_0 : i32, i32, i32
  }
}

</mosaic_0001>

<bundles_post_ra>
// kernel: tile.18
= control target key start
LH: loop header
LB: loop body
LE: loop exit
PB: predicated region body
PF: predicated region fallthrough
CT: control target
= control target key end

     0   :  { %s22_s0 = inlined_call_operand.vmem [shape: f32[64], index: 0, kind: input, shape index: {}]   ;;  %s23_s1 = inlined_call_operand.vmem [shape: f32[4,64], index: 1, kind: output, shape index: {}]  }
   0x1   :  { %v4_v0 = vld [vmem:[%s22_s0] ss:$0 sm:$0xff] }
   0x2   :  { %5 = vst [vmem:[%s23_s1] sm:$0xf] %v4_v0 }

// kernel: mul.17
= control target key start
LH: loop header
LB: loop body
LE: loop exit
PB: predicated region body
PF: predicated region fallthrough
CT: control target
= control target key end

     0   :  { %s6_s8 = smov 3  ;;  %vm8_vm0 = vcmask 523264   ;;  %s24_s9 = smov 64   ;;  %vm15_vm1 = vcmask 1048064   ;;  %s41_s0 = inlined_call_operand.vmem [shape: f32[4,64], index: 0, kind: input, shape index: {}]   ;;  %s42_s1 = inlined_call_operand.vmem [shape: f32[256], index: 1, kind: output, shape index: {}]  }
   0x1   :  { %v4_v0 = vld [vmem:[%s41_s0] sm:$0xf]  ;;  %s11_s0 = smov 3 }
   0x2   :  { %5 = vst [vmem:[#allocation1] sm:$0xf] %v4_v0 }
   0x9   :  { %v12_v1 = vld [vmem:[#allocation1 + $0x1] ss:$2 sm:%s11_s0]   ;;  %v7_v2 = vld [vmem:[#allocation1] ss:$2 sm:%s6_s8]  }
   0xa   :  { %13 = vrot.lane.b32.xlu0 %v12_v1, %s24_s9  ;;  %9 = vst.msk [vmem:[#allocation0] sm:$0x3] %vm8_vm0, %v7_v2  }
  0x7c   :  { %v14_v3 = vpop.permute.xlu0 %13  }
  0x7d   :  { %16 = vst.msk [vmem:[#allocation0] sm:$0x3] %vm15_vm1, %v14_v3  }
  0x84   :  { %v20_v4 = vld [vmem:[#allocation0] sm:$0x3] }
  0x85   :  { %22 = vst [vmem:[%s42_s1] sm:$0x3] %v20_v4 }

// kernel: tile.24
= control target key start
LH: loop header
LB: loop body
LE: loop exit
PB: predicated region body
PF: predicated region fallthrough
CT: control target
= control target key end

     0   :  { %s6_s8 = smov 3  ;;  %vm8_vm0 = vcmask 523264   ;;  %s30_s9 = smov 64   ;;  %vm15_vm1 = vcmask 1048064   ;;  %s50_s0 = inlined_call_operand.vmem [shape: f32[4,64], index: 0, kind: input, shape index: {}]   ;;  %s51_s1 = inlined_call_operand.vmem [shape: f32[1,256], index: 1, kind: output, shape index: {}]  }
   0x1   :  { %v4_v0 = vld [vmem:[%s50_s0] sm:$0xf]  ;;  %s11_s0 = smov 3 }
   0x2   :  { %5 = vst [vmem:[#allocation1] sm:$0xf] %v4_v0 }
   0x9   :  { %v12_v1 = vld [vmem:[#allocation1 + $0x1] ss:$2 sm:%s11_s0]   ;;  %v7_v2 = vld [vmem:[#allocation1] ss:$2 sm:%s6_s8]  }
   0xa   :  { %13 = vrot.lane.b32.xlu0 %v12_v1, %s30_s9  ;;  %9 = vst.msk [vmem:[#allocation0] ss:$8 sm:$0x3] %vm8_vm0, %v7_v2  }
  0x7c   :  { %v14_v3 = vpop.permute.xlu0 %13  }
  0x7d   :  { %16 = vst.msk [vmem:[#allocation0] ss:$8 sm:$0x3] %vm15_vm1, %v14_v3  }
  0x84   :  { %v20_v4 = vld [vmem:[#allocation0] sm:$0x1]  ;;  %v24_v5 = vld [vmem:[#allocation0 + $0x8] sm:$0x1] }
  0x85   :  { %22 = vst [vmem:[%s51_s1] sm:$0x1] %v20_v4  ;;  %28 = vst [vmem:[%s51_s1 + $0x1] sm:$0x1] %v24_v5 }

// kernel: generator_forward.4
= control target key start
LH: loop header
LB: loop body
LE: loop exit
PB: predicated region body
PF: predicated region fallthrough
CT: control target
= control target key end

     0   :  { %s991_s12 = smov 0   ;;  %s1129_s0 = inlined_call_operand.vmem [shape: bf16[2,9,9,8], index: 0, kind: input, shape index: {}]   ;;  %s1130_s1 = inlined_call_operand.vmem [shape: bf16[32,64], index: 1, kind: input, shape index: {}]   ;;  %s1131_s2 = inlined_call_operand.vmem [shape: f32[1,64], index: 2, kind: input, shape index: {}]   ;;  %s1132_s3 = inlined_call_operand.vmem [shape: bf16[2,64,64], index: 3, kind: output, shape index: {}]  }
   0x1 LB: > { %s789_s13 = sadd.s32 4294967295, %s966_s12   ;;  %p793_p0 = scmp.ge.s32.totalorder %s966_s12, 1  ;;  %s966_s12 = sphi %s991_s12, %s13_s12  }
   0x2   : > { %p137_p1 = scmp.lt.s32.totalorder %s966_s12, 3 }
   0x4   : > { %p138_p2 = pnand %p793_p0, %p137_p1 }
   0x5   : > { %p161_p3 = scmp.lt.s32.totalorder (!%p138_p2), %s789_s13, 1  ;;  %s968_s18 = smov (!%p138_p2), 16   ;;  %vm173_vm0 = vcmask (!%p138_p2), 60416   ;;  %vm228_vm1 = vcmask (!%p138_p2), 64516   ;;  %vm192_vm2 = vcmask (!%p138_p2), 126016   ;;  %vm202_vm3 = vcmask (!%p138_p2), 191616  }
   0x6   : > { %141 = sbr.rel (%p138_p2) target bundleno = 408 (0x198), region = 32  ;;  %s969_s19 = smov (!%p138_p2), 8   ;;  %vm248_vm4 = vcmask (!%p138_p2), 130116   ;;  %vm258_vm5 = vcmask (!%p138_p2), 195716   ;;  %vm278_vm6 = vcmask (!%p138_p2), 261316   ;;  %vm221_vm7 = vcmask (!%p138_p2), 257216  }
   0x7   : > { %s970_s20 = smov (!%p138_p2), 24   ;;  %vm607_vm8 = vcmask (!%p138_p2), 261120   ;;  %vm725_vm9 = vcmask (!%p138_p2), 519168  }
   0xd   : > { %s1134_s13 = smov (!%p161_p3, %s789_s13), 1 }
   0xe   : > { %s918_s14 = smul.u32 72, %s1134_s13  ;;  %s887_s27 = sshll.u32 %s1134_s13, 5 }
   0xf   : > { %s1108_s30 = scalar_lea.vmem %s1132_s3, %s887_s27 }
  0x10   : > { %s1005_s17 = scalar_lea.vmem %s1129_s0, %s918_s14 }
  0x11   : > { %v930_v0 = vld [vmem:[%s1005_s17 + $0x10] ss:$0 sps:$4 sm:$0xff]   ;;  %v931_v1 = vld [vmem:[%s1005_s17 + $0x8] ss:$0 sps:$4 sm:$0xff]   ;;  %v934_v4 = vld [vmem:[%s1005_s17 + $0x20] sm:$0x1f]  }
  0x12   : > { %v932_v2 = vld [vmem:[%s1005_s17 + $0x30] ss:$0 sps:$4 sm:$0xff]   ;;  %255 = vrot.lane.b32.xlu1 %v930_v0, %s968_s18  ;;  %v933_v3 = vld [vmem:[%s1005_s17 + $0x28] ss:$0 sps:$4 sm:$0xff]   ;;  %199 = vrot.lane.b32.xlu0 %v931_v1, %s968_s18  ;;  %v390_v6 = vshrl.u32 %v934_v4, 16  ;;  %v392_v7 = vshll.u32 %v934_v4, 16 }
  0x13   : > { %v935_v5 = vld [vmem:[%s1005_s17] sm:$0x1f]   ;;  %v936_v8 = vld [vmem:[%s1005_s17 + $0x28] sm:$0x1f]   ;;  %v938_v20 = vld [vmem:[%s1005_s17 + $0x18] sm:$0x1f]  }
  0x14   : > { %v183_v9 = vshrl.u32 %v935_v5, 16  ;;  %v185_v10 = vshll.u32 %v935_v5, 16  ;;  %v394_v11 = vrot.slane %v392_v7, 1  ;;  %v441_v12 = vshrl.u32 %v936_v8, 16  ;;  %v937_v14 = vld [vmem:[%s1005_s17 + $0x8] sm:$0x1f]  }
  0x15   : > { %v444_v13 = vshll.u32 %v936_v8, 16  ;;  %v238_v19 = vshrl.u32 %v937_v14, 16  ;;  %v241_v22 = vshll.u32 %v937_v14, 16  ;;  %v341_v25 = vshrl.u32 %v938_v20, 16  ;;  %v939_v27 = vld [vmem:[%s1005_s17 + $0x10] sm:$0x1f]  }
  0x16   : > { %457 = vrot.lane.b32.xlu1 %v932_v2, %s968_s18  ;;  %405 = vrot.lane.b32.xlu0 %v933_v3, %s968_s18  ;;  %v187_v15 = vrot.slane %v185_v10, 1  ;;  %v395_v16 = vor.u32 %v394_v11, %v390_v6  ;;  %v443_v17 = vrot.slane %v441_v12, 4  ;;  %v344_v26 = vshll.u32 %v938_v20, 16  ;;  %v940_v33 = vld [vmem:[%s1005_s17 + $0x38] sm:$0x1f]  }
  0x17   : > { %v446_v18 = vrot.slane %v444_v13, 5  ;;  %v240_v24 = vrot.slane %v238_v19, 4  ;;  %v243_v28 = vrot.slane %v241_v22, 5  ;;  %v343_v29 = vrot.slane %v341_v25, 4  ;;  %v941_v35 = vld [vmem:[%s1005_s17 + $0x30] sm:$0x1f]  }
  0x18   : > { %v188_v21 = vor.u32 %v187_v15, %v183_v9  ;;  %v346_v30 = vrot.slane %v344_v26, 5  ;;  %v290_v31 = vshrl.u32 %v939_v27, 16  ;;  %v292_v32 = vshll.u32 %v939_v27, 16  ;;  %v942_v42 = vld [vmem:[%s1005_s17 + $0x10] sm:$0x1f]   ;;  %v958_v19 = vld [vmem:[%s1130_s1] sm:$0xff]  }
  0x19   : > { %v447_v23 = vor.u32 %v446_v18, %v443_v17  ;;  %v244_v34 = vor.u32 %v243_v28, %v240_v24  ;;  %v541_v38 = vshrl.u32 %v940_v33, 16  ;;  %v544_v39 = vshll.u32 %v940_v33, 16  ;;  %v943_v49 = vld [vmem:[%s1005_s17 + $0x8] sm:$0x1f]   ;;  %v946_v56 = vld [vmem:[%s1005_s17 + $0x30] sm:$0x1f]   ;;  %902 = vmatprep.subr.bf16.mxu0 %v958_v19  ;;  %914 = vmatprep.subr.bf16.mxu1 %v958_v19 }
  0x1a   : > { %396 = vrot.lane.b32.xlu1 %v395_v16, %s969_s19  ;;  %189 = vrot.lane.b32.xlu0 %v188_v21, %s969_s19  ;;  %v347_v36 = vor.u32 %v346_v30, %v343_v29  ;;  %v294_v37 = vrot.slane %v292_v32, 1  ;;  %v490_v40 = vshrl.u32 %v941_v35, 16  ;;  %v492_v41 = vshll.u32 %v941_v35, 16  ;;  %v947_v59 = vld [vmem:[%s1005_s17 + $0x28] sm:$0x1f]  }
  0x1b   : > { %v543_v44 = vrot.slane %v541_v38, 4  ;;  %v546_v45 = vrot.slane %v544_v39, 5  ;;  %v268_v47 = vshrl.u32 %v942_v42, 16  ;;  %v271_v48 = vshll.u32 %v942_v42, 16  ;;  %v944_v63 = vld [vmem:[%s1005_s17 + $0x20] ss:$0 sps:$4 sm:$0xff]   ;;  %903 = vmatpush3.bf16.msra.mxu0 %v958_v19  ;;  %916 = vmatpush3.bf16.msra.mxu1 %v958_v19 }
  0x1c   : > { %v295_v43 = vor.u32 %v294_v37, %v290_v31  ;;  %v494_v46 = vrot.slane %v492_v41, 1  ;;  %v212_v54 = vshrl.u32 %v943_v49, 16  ;;  %v214_v55 = vshll.u32 %v943_v49, 16  ;;  %v945_v1 = vld [vmem:[%s1005_s17 + $0x18] ss:$0 sps:$4 sm:$0xff]   ;;  %v959_v31 = vld [vmem:[%s1130_s1 + $0x8] sm:$0xff]  }
  0x1d   : > { %v547_v50 = vor.u32 %v546_v45, %v543_v44  ;;  %v270_v52 = vrot.slane %v268_v47, 4  ;;  %v273_v53 = vrot.slane %v271_v48, 5  ;;  %v469_v60 = vshrl.u32 %v946_v56, 16  ;;  %v950_v4 = vld [vmem:[%s1005_s17 + $0x20] sm:$0x1f]   ;;  %904 = vmatprep.subr.bf16.mxu0 %v959_v31  ;;  %915 = vmatprep.subr.bf16.mxu1 %v959_v31 }
  0x1e   : > { %448 = vrot.lane.b32.xlu1 %v447_v23, %s969_s19  ;;  %245 = vrot.lane.b32.xlu0 %v244_v34, %s969_s19  ;;  %v495_v51 = vor.u32 %v494_v46, %v490_v40  ;;  %v216_v58 = vrot.slane %v214_v55, 1  ;;  %v472_v61 = vshll.u32 %v946_v56, 16  ;;  %v419_v0 = vshll.u32 %v947_v59, 16  ;;  %v951_v9 = vld [vmem:[%s1005_s17 + $0x18] sm:$0x1f]  }
  0x1f   : > { %v274_v57 = vor.u32 %v273_v53, %v270_v52  ;;  %v471_v2 = vrot.slane %v469_v60, 4  ;;  %v417_v3 = vshrl.u32 %v947_v59, 16  ;;  %v369_v7 = vshrl.u32 %v950_v4, 16  ;;  %v952_v10 = vld [vmem:[%s1005_s17 + $0x40] sm:$0x1f]   ;;  %905 = vmatpush3.bf16.msra.mxu0 %v959_v31  ;;  %917 = vmatpush3.bf16.msra.mxu1 %v959_v31 }
  0x20   : > { %v217_v62 = vor.u32 %v216_v58, %v212_v54  ;;  %v474_v5 = vrot.slane %v472_v61, 5  ;;  %v421_v6 = vrot.slane %v419_v0, 1  ;;  %v372_v8 = vshll.u32 %v950_v4, 16  ;;  %v953_v14 = vld [vmem:[%s1005_s17 + $0x38] sm:$0x1f]  }
  0x21   : > { %v319_v11 = vshll.u32 %v951_v9, 16  ;;  %v371_v13 = vrot.slane %v369_v7, 4  ;;  %v832_v15 = vld [vmem:[%s1005_s17 + $0x20] sm:$0xf]  ;;  %v317_v21 = vshrl.u32 %v951_v9, 16  ;;  %v569_v23 = vshrl.u32 %v952_v10, 16 }
  0x22   : > { %348 = vrot.lane.b32.xlu1 %v347_v36, %s969_s19  ;;  %296 = vrot.lane.b32.xlu0 %v295_v43, %s969_s19  ;;  %v475_v12 = vor.u32 %v474_v5, %v471_v2  ;;  %v422_v16 = vor.u32 %v421_v6, %v417_v3  ;;  %v374_v17 = vrot.slane %v372_v8, 5  ;;  %381 = vst.msk [vmem:[#allocation2 + $0x10] sm:$0xf] %vm173_vm0, %v832_v15  ;;  %v172_v18 = vld [vmem:[%s1005_s17] sm:$0xf]  ;;  %v572_v24 = vshll.u32 %v952_v10, 16 }
  0x23   : > { %v948_v20 = vld [vmem:[%s1005_s17 + $0x40] ss:$0 sps:$4 sm:$0xff]   ;;  %v321_v22 = vrot.slane %v319_v11, 1  ;;  %174 = vst.msk [vmem:[#allocation2] sm:$0xf] %vm173_vm0, %v172_v18  ;;  %v519_v28 = vshll.u32 %v953_v14, 16 }
  0x24   : > { %v954_v25 = vld [vmem:[%s1005_s17 + $0x28] ss:$0 sps:$4 sm:$0xff]   ;;  %v949_v26 = vld [vmem:[%s1005_s17 + $0x38] ss:$0 sps:$4 sm:$0xff]   ;;  %v813_v30 = vld [vmem:[%s1005_s17 + $0x10] sm:$0xf]  ;;  %v375_v34 = vor.u32 %v374_v17, %v371_v13 }
  0x25   : > { %v955_v27 = vld [vmem:[%s1005_s17 + $0x8] ss:$0 sps:$4 sm:$0xff]   ;;  %432 = vst.msk [vmem:[#allocation2 + $0x10] sm:$0xf0] %vm228_vm1, %v954_v25  ;;  %v956_v29 = vld [vmem:[%s1005_s17 + $0x18] ss:$0 sps:$4 sm:$0xff]   ;;  %v322_v37 = vor.u32 %v321_v22, %v317_v21 }
  0x26   : > { %548 = vrot.lane.b32.xlu1 %v547_v50, %s969_s19  ;;  %496 = vrot.lane.b32.xlu0 %v495_v51, %s969_s19  ;;  %229 = vst.msk [vmem:[#allocation2] sm:$0xf0] %vm228_vm1, %v955_v27  ;;  %v957_v32 = vld [vmem:[%s1005_s17 + $0x38] ss:$0 sps:$4 sm:$0xff]   ;;  %v851_v33 = vld [vmem:[%s1005_s17 + $0x30] sm:$0xf] }
  0x27   : > { %281 = vst.msk [vmem:[#allocation2 + $0x8] sm:$0xf] %vm173_vm0, %v813_v30  ;;  %481 = vst.msk [vmem:[#allocation2 + $0x18] sm:$0xf] %vm173_vm0, %v851_v33  ;;  %v571_v35 = vrot.slane %v569_v23, 4  ;;  %v574_v36 = vrot.slane %v572_v24, 5 }
  0x28   : > { %332 = vst.msk [vmem:[#allocation2 + $0x8] sm:$0xf0] %vm228_vm1, %v956_v29  ;;  %532 = vst.msk [vmem:[#allocation2 + $0x18] sm:$0xf0] %vm228_vm1, %v957_v32  ;;  %v517_v38 = vshrl.u32 %v953_v14, 16  ;;  %v521_v39 = vrot.slane %v519_v28, 1 }
  0x29   : > { %v575_v40 = vor.u32 %v574_v36, %v571_v35  ;;  %v870_v6 = vld [vmem:[%s1131_s2] ss:$0 sm:$0xff] }
  0x2a   : > { %275 = vrot.lane.b32.xlu1 %v274_v57, %s970_s20  ;;  %218 = vrot.lane.b32.xlu0 %v217_v62, %s970_s20  ;;  %v522_v41 = vor.u32 %v521_v39, %v517_v38 }
  0x2e   : > { %357 = vrot.lane.b32.xlu1 %v944_v63, %s968_s18  ;;  %305 = vrot.lane.b32.xlu0 %v945_v1, %s968_s18 }
  0x32   : > { %476 = vrot.lane.b32.xlu1 %v475_v12, %s970_s20  ;;  %423 = vrot.lane.b32.xlu0 %v422_v16, %s970_s20 }
  0x36   : > { %557 = vrot.lane.b32.xlu1 %v948_v20, %s968_s18  ;;  %505 = vrot.lane.b32.xlu0 %v949_v26, %s968_s18 }
  0x3a   : > { %376 = vrot.lane.b32.xlu1 %v375_v34, %s970_s20  ;;  %323 = vrot.lane.b32.xlu0 %v322_v37, %s970_s20 }
  0x3e   : > { %576 = vrot.lane.b32.xlu1 %v575_v40, %s970_s20  ;;  %523 = vrot.lane.b32.xlu0 %v522_v41, %s970_s20 }
  0x84   : > { %v256_v42 = vpop.permute.xlu1 %255  ;;  %v200_v43 = vpop.permute.xlu0 %199 }
  0x88   : > { %v458_v44 = vpop.permute.xlu1 %457  ;;  %v406_v45 = vpop.permute.xlu0 %405 }
  0x8c   : > { %v397_v46 = vpop.permute.xlu1 %396  ;;  %v190_v47 = vpop.permute.xlu0 %189 }
  0x8d   : > { %399 = vst.msk [vmem:[#allocation2 + $0x10] sm:$0xf] %vm192_vm2, %v397_v46  ;;  %193 = vst.msk [vmem:[#allocation2] sm:$0xf] %vm192_vm2, %v190_v47 }
  0x8e   : > { %408 = vst.msk [vmem:[#allocation2 + $0x10] sm:$0xf] %vm202_vm3, %v406_v45  ;;  %203 = vst.msk [vmem:[#allocation2] sm:$0xf] %vm202_vm3, %v200_v43 }
  0x90   : > { %v449_v48 = vpop.permute.xlu1 %448  ;;  %v246_v49 = vpop.permute.xlu0 %245 }
  0x91   : > { %451 = vst.msk [vmem:[#allocation2 + $0x10] sm:$0xf0] %vm248_vm4, %v449_v48  ;;  %249 = vst.msk [vmem:[#allocation2] sm:$0xf0] %vm248_vm4, %v246_v49 }
  0x92   : > { %460 = vst.msk [vmem:[#allocation2 + $0x10] sm:$0xf0] %vm258_vm5, %v458_v44  ;;  %259 = vst.msk [vmem:[#allocation2] sm:$0xf0] %vm258_vm5, %v256_v42 }
  0x94   : > { %v349_v50 = vpop.permute.xlu1 %348  ;;  %v297_v51 = vpop.permute.xlu0 %296 }
  0x95   : > { %351 = vst.msk [vmem:[#allocation2 + $0x8] sm:$0xf0] %vm248_vm4, %v349_v50 }
  0x96   : > { %299 = vst.msk [vmem:[#allocation2 + $0x8] sm:$0xf] %vm192_vm2, %v297_v51 }
  0x98   : > { %v549_v52 = vpop.permute.xlu1 %548  ;;  %v497_v53 = vpop.permute.xlu0 %496 }
  0x99   : > { %551 = vst.msk [vmem:[#allocation2 + $0x18] sm:$0xf0] %vm248_vm4, %v549_v52 }
  0x9a   : > { %499 = vst.msk [vmem:[#allocation2 + $0x18] sm:$0xf] %vm192_vm2, %v497_v53 }
  0x9c   : > { %v276_v54 = vpop.permute.xlu1 %275  ;;  %v219_v55 = vpop.permute.xlu0 %218 }
  0x9d   : > { %279 = vst.msk [vmem:[#allocation2] sm:$0xf0] %vm278_vm6, %v276_v54 }
  0x9e   : > { %222 = vst.msk [vmem:[#allocation2] sm:$0xf] %vm221_vm7, %v219_v55 }
  0xa0   : > { %v358_v56 = vpop.permute.xlu1 %357  ;;  %v306_v57 = vpop.permute.xlu0 %305 }
  0xa1   : > { %360 = vst.msk [vmem:[#allocation2 + $0x8] sm:$0xf0] %vm258_vm5, %v358_v56 }
  0xa2   : > { %308 = vst.msk [vmem:[#allocation2 + $0x8] sm:$0xf] %vm202_vm3, %v306_v57 }
  0xa4   : > { %v477_v58 = vpop.permute.xlu1 %476  ;;  %v424_v59 = vpop.permute.xlu0 %423 }
  0xa5   : > { %479 = vst.msk [vmem:[#allocation2 + $0x10] sm:$0xf0] %vm278_vm6, %v477_v58  ;;  %v580_v60 = vld [vmem:[#allocation2] sm:$0xff] }
  0xa6   : > { %426 = vst.msk [vmem:[#allocation2 + $0x10] sm:$0xf] %vm221_vm7, %v424_v59  ;;  %906 = vmatprep.mubr.msk.bf16.mxu0 %vm607_vm8, %v580_v60 }
  0xa8   : > { %v558_v61 = vpop.permute.xlu1 %557  ;;  %v506_v62 = vpop.permute.xlu0 %505 }
  0xa9   : > { %560 = vst.msk [vmem:[#allocation2 + $0x18] sm:$0xf0] %vm258_vm5, %v558_v61 }
  0xaa   : > { %508 = vst.msk [vmem:[#allocation2 + $0x18] sm:$0xf] %vm202_vm3, %v506_v62 }
  0xac   : > { %v377_v63 = vpop.permute.xlu1 %376  ;;  %v324_v0 = vpop.permute.xlu0 %323 }
  0xad   : > { %379 = vst.msk [vmem:[#allocation2 + $0x8] sm:$0xf0] %vm278_vm6, %v377_v63  ;;  %v582_v1 = vld [vmem:[#allocation2 + $0x10] sm:$0xff] }
  0xae   : > { %326 = vst.msk [vmem:[#allocation2 + $0x8] sm:$0xf] %vm221_vm7, %v324_v0  ;;  %910 = vmatprep.mubr.msk.bf16.mxu1 %vm607_vm8, %v582_v1 }
  0xb0   : > { %v577_v2 = vpop.permute.xlu1 %576  ;;  %v524_v3 = vpop.permute.xlu0 %523 }
  0xb1   : > { %579 = vst.msk [vmem:[#allocation2 + $0x18] sm:$0xf0] %vm278_vm6, %v577_v2 }
  0xb2   : > { %526 = vst.msk [vmem:[#allocation2 + $0x18] sm:$0xf] %vm221_vm7, %v524_v3 }
  0xb5   : > { %v581_v4 = vld [vmem:[#allocation2 + $0x8] sm:$0xff] }
  0xb6   : > { %907 = vmatmul.mubr.msk.bf16.vlgmr.msra.gmra.mrb[0].mxu0 %vm607_vm8, %v581_v4 }
  0xb9   : > { %v583_v5 = vld [vmem:[#allocation2 + $0x18] sm:$0xff] }
  0xba   : > { %911 = vmatmul.mubr.msk.bf16.vlgmr.msra.gmra.mrb[0].mxu1 %vm607_vm8, %v583_v5 }
 0x189   : > { %v908_v7 = vpop.f32.mrb[0].mxu0 }
 0x18a   : > { %v663_v8 = vadd.f32 %v908_v7, %v870_v6  ;;  %v654_v9 = vpop.f32.mrb[1].mxu0 }
 0x18b   : > { %v655_v10 = vadd.f32 %v870_v6, %v654_v9  ;;  %v909_v11 = vpop.f32.mrb[2].mxu0 }
 0x18c   : > { %v687_v12 = vmax.f32 %v663_v8, 0.0  ;;  %v666_v13 = vadd.f32 %v909_v11, %v870_v6  ;;  %v657_v14 = vpop.f32.mrb[3].mxu0 }
 0x18d   : > { %v685_v15 = vmax.f32 %v655_v10, 0.0  ;;  %v658_v16 = vadd.f32 %v870_v6, %v657_v14  ;;  %v912_v17 = vpop.f32.mrb[0].mxu1 }
 0x18e   : > { %v890_v18 = vpack.c.bf16 %v687_v12, %v687_v12  ;;  %v688_v19 = vmax.f32 %v666_v13, 0.0  ;;  %v679_v20 = vadd.f32 %v912_v17, %v870_v6  ;;  %v670_v21 = vpop.f32.mrb[1].mxu1 }
 0x18f   : > { %v888_v22 = vpack.c.bf16 %v685_v15, %v685_v15  ;;  %v686_v23 = vmax.f32 %v658_v16, 0.0  ;;  %v671_v24 = vadd.f32 %v870_v6, %v670_v21  ;;  %v913_v25 = vpop.f32.mrb[2].mxu1 }
 0x190   : > { %728 = vst.msk [vmem:[%s1108_s30 + $0x8] sm:$0xf] %vm725_vm9, %v890_v18  ;;  %v891_v26 = vpack.c.bf16 %v688_v19, %v688_v19  ;;  %v691_v27 = vmax.f32 %v679_v20, 0.0  ;;  %v682_v28 = vadd.f32 %v913_v25, %v870_v6  ;;  %v673_v29 = vpop.f32.mrb[3].mxu1 }
 0x191   : > { %726 = vst.msk [vmem:[%s1108_s30] sm:$0xf] %vm725_vm9, %v888_v22  ;;  %v889_v30 = vpack.c.bf16 %v686_v23, %v686_v23  ;;  %v689_v31 = vmax.f32 %v671_v24, 0.0  ;;  %v674_v32 = vadd.f32 %v870_v6, %v673_v29 }
 0x192   : > { %729 = vst.msk [vmem:[%s1108_s30 + $0xc] sm:$0xf] %vm725_vm9, %v891_v26  ;;  %v894_v33 = vpack.c.bf16 %v691_v27, %v691_v27  ;;  %v692_v34 = vmax.f32 %v682_v28, 0.0 }
 0x193   : > { %727 = vst.msk [vmem:[%s1108_s30 + $0x4] sm:$0xf] %vm725_vm9, %v889_v30  ;;  %v892_v35 = vpack.c.bf16 %v689_v31, %v689_v31  ;;  %v690_v36 = vmax.f32 %v674_v32, 0.0 }
 0x194   : > { %732 = vst.msk [vmem:[%s1108_s30 + $0x18] sm:$0xf] %vm725_vm9, %v894_v33  ;;  %v895_v37 = vpack.c.bf16 %v692_v34, %v692_v34 }
 0x195   : > { %730 = vst.msk [vmem:[%s1108_s30 + $0x10] sm:$0xf] %vm725_vm9, %v892_v35  ;;  %v893_v38 = vpack.c.bf16 %v690_v36, %v690_v36 }
 0x196   : > { %733 = vst.msk [vmem:[%s1108_s30 + $0x1c] sm:$0xf] %vm725_vm9, %v895_v37 }
 0x197   : > { %731 = vst.msk [vmem:[%s1108_s30 + $0x14] sm:$0xf] %vm725_vm9, %v893_v38 }
 0x198 PF: > { %s13_s12 = sadd.s32 1, %s966_s12  }
 0x199   : > { %p10_p4 = scmp.ge.s32.totalorder %s13_s12, 4  }
 0x19b   :  { %12 = sbr.rel (!%p10_p4) target bundleno = 1 (0x1), region = 70 }

// kernel: generator_forward.5
= control target key start
LH: loop header
LB: loop body
LE: loop exit
PB: predicated region body
PF: predicated region fallthrough
CT: control target
= control target key end

     0   :  { %s1578_s12 = smov 0   ;;  %s1822_s0 = inlined_call_operand.vmem [shape: bf16[2,5,5,256], index: 0, kind: input, shape index: {}]   ;;  %s1823_s1 = inlined_call_operand.vmem [shape: bf16[1024,128], index: 1, kind: input, shape index: {}]   ;;  %s1824_s2 = inlined_call_operand.vmem [shape: f32[1,128], index: 2, kind: input, shape index: {}]   ;;  %s1825_s3 = inlined_call_operand.vmem [shape: bf16[2,16,128], index: 3, kind: output, shape index: {}]  }
   0x1 LB: > { %s1226_s13 = sadd.s32 4294967295, %s1556_s12   ;;  %p1230_p0 = scmp.ge.s32.totalorder %s1556_s12, 1  ;;  %s1556_s12 = sphi %s1578_s12, %s13_s12  }
   0x2   : > { %p137_p1 = scmp.lt.s32.totalorder %s1556_s12, 3 }
   0x4   : > { %p138_p2 = pnand %p1230_p0, %p137_p1 }
   0x5   : > { %v1454_v0 = vld [vmem:[%s1823_s1 + $0x40] sm:$0xff] (!%p138_p2)   ;;  %v1458_v4 = vld [vmem:[%s1823_s1 + $0x48] sm:$0xff] (!%p138_p2)   ;;  %v1462_v8 = vld [vmem:[%s1823_s1 + $0x50] sm:$0xff] (!%p138_p2)   ;;  %p161_p3 = scmp.lt.s32.totalorder (!%p138_p2), %s1226_s13, 1 }
   0x6   : > { %141 = sbr.rel (%p138_p2) target bundleno = 307 (0x133), region = 32  ;;  %v1455_v1 = vld [vmem:[%s1823_s1 + $0xc0] sm:$0xff] (!%p138_p2)   ;;  %1357 = vmatprep.subr.bf16.mxu0 (!%p138_p2), %v1454_v0  ;;  %v1459_v5 = vld [vmem:[%s1823_s1 + $0xc8] sm:$0xff] (!%p138_p2)   ;;  %v1463_v9 = vld [vmem:[%s1823_s1 + $0xd0] sm:$0xff] (!%p138_p2)  }
   0x7   : > { %v1456_v2 = vld [vmem:[%s1823_s1] sm:$0xff] (!%p138_p2)   ;;  %1379 = vmatprep.subr.bf16.mxu1 (!%p138_p2), %v1455_v1  ;;  %v1460_v6 = vld [vmem:[%s1823_s1 + $0x8] sm:$0xff] (!%p138_p2)   ;;  %v1464_v10 = vld [vmem:[%s1823_s1 + $0x10] sm:$0xff] (!%p138_p2)  }
   0x8   : > { %v1457_v3 = vld [vmem:[%s1823_s1 + $0x80] sm:$0xff] (!%p138_p2)   ;;  %1358 = vmatpush3.bf16.msra.mxu0 (!%p138_p2), %v1456_v2  ;;  %v1461_v7 = vld [vmem:[%s1823_s1 + $0x88] sm:$0xff] (!%p138_p2)   ;;  %v1465_v11 = vld [vmem:[%s1823_s1 + $0x90] sm:$0xff] (!%p138_p2)  }
   0x9   : > { %1380 = vmatpush3.bf16.msra.mxu1 (!%p138_p2), %v1457_v3  ;;  %1359 = vmatprep.subr.bf16.mxu0 (!%p138_p2), %v1458_v4  ;;  %v1466_v12 = vld [vmem:[%s1823_s1 + $0x58] sm:$0xff] (!%p138_p2)   ;;  %v1470_v16 = vld [vmem:[%s1823_s1 + $0x60] sm:$0xff] (!%p138_p2)   ;;  %v1474_v20 = vld [vmem:[%s1823_s1 + $0x68] sm:$0xff] (!%p138_p2)  }
   0xa   : > { %1381 = vmatprep.subr.bf16.mxu1 (!%p138_p2), %v1459_v5  ;;  %v1467_v13 = vld [vmem:[%s1823_s1 + $0xd8] sm:$0xff] (!%p138_p2)   ;;  %v1471_v17 = vld [vmem:[%s1823_s1 + $0xe0] sm:$0xff] (!%p138_p2)   ;;  %v1475_v21 = vld [vmem:[%s1823_s1 + $0xe8] sm:$0xff] (!%p138_p2)  }
   0xb   : > { %v1468_v14 = vld [vmem:[%s1823_s1 + $0x18] sm:$0xff] (!%p138_p2)   ;;  %v1472_v18 = vld [vmem:[%s1823_s1 + $0x20] sm:$0xff] (!%p138_p2)   ;;  %v1476_v22 = vld [vmem:[%s1823_s1 + $0x28] sm:$0xff] (!%p138_p2)  }
   0xc   : > { %1360 = vmatpush3.bf16.msra.mxu0 (!%p138_p2), %v1460_v6  ;;  %v1469_v15 = vld [vmem:[%s1823_s1 + $0x98] sm:$0xff] (!%p138_p2)   ;;  %v1473_v19 = vld [vmem:[%s1823_s1 + $0xa0] sm:$0xff] (!%p138_p2)   ;;  %v1477_v23 = vld [vmem:[%s1823_s1 + $0xa8] sm:$0xff] (!%p138_p2)  }
   0xd   : > { %1382 = vmatpush3.bf16.msra.mxu1 %v1461_v7  ;;  %1361 = vmatprep.subr.bf16.mxu0 %v1462_v8  ;;  %s1827_s13 = smov (!%p161_p3, %s1226_s13), 1  ;;  %v1478_v24 = vld [vmem:[%s1823_s1 + $0x70] sm:$0xff]   ;;  %v1482_v28 = vld [vmem:[%s1823_s1 + $0x78] sm:$0xff]   ;;  %v1502_v52 = vld [vmem:[%s1823_s1 + $0x140] sm:$0xff]  }
   0xe   : > { %1383 = vmatprep.subr.bf16.mxu1 %v1463_v9  ;;  %v1479_v25 = vld [vmem:[%s1823_s1 + $0xf0] sm:$0xff]   ;;  %s1445_s18 = smul.u32 40, %s1827_s13  ;;  %v1483_v29 = vld [vmem:[%s1823_s1 + $0xf8] sm:$0xff]   ;;  %v1503_v61 = vld [vmem:[%s1823_s1 + $0x1c0] sm:$0xff]   ;;  %s1349_s24 = sshll.u32 %s1827_s13, 3 }
   0xf   : > { %v1480_v26 = vld [vmem:[%s1823_s1 + $0x30] sm:$0xff]   ;;  %v1484_v30 = vld [vmem:[%s1823_s1 + $0x38] sm:$0xff]   ;;  %s170_s27 = scalar_lea.vmem %s1825_s3, %s1349_s24 }
  0x10   : > { %1362 = vmatpush3.bf16.msra.mxu0 %v1464_v10  ;;  %v1481_v27 = vld [vmem:[%s1823_s1 + $0xb0] sm:$0xff]   ;;  %s1689_s29 = scalar_lea.vmem %s1822_s0, %s1445_s18  ;;  %v1485_v31 = vld [vmem:[%s1823_s1 + $0xb8] sm:$0xff]  }
  0x11   : > { %1384 = vmatpush3.bf16.msra.mxu1 %v1465_v11  ;;  %1363 = vmatprep.subr.bf16.mxu0 %v1466_v12  ;;  %v172_v32 = vld [vmem:[%s1689_s29] sm:$0x33]  ;;  %v1244_v33 = vld [vmem:[%s1689_s29 + $0x8] sm:$0x33]  ;;  %v1256_v34 = vld [vmem:[%s1689_s29 + $0x10] sm:$0x33] }
  0x12   : > { %1385 = vmatprep.subr.bf16.mxu1 %v1467_v13  ;;  %v1235_v35 = vcombine.high %v172_v32, %v172_v32  ;;  %v1246_v36 = vcombine.high %v1244_v33, %v1244_v33  ;;  %v1258_v37 = vcombine.high %v1256_v34, %v1256_v34  ;;  %v1268_v38 = vld [vmem:[%s1689_s29 + $0x18] sm:$0x33]  ;;  %v182_v39 = vld [vmem:[%s1689_s29] sm:$0x77]  ;;  %v1247_v40 = vld [vmem:[%s1689_s29 + $0x8] sm:$0x77]  ;;  %v1234_v41 = vcombine.low %v172_v32, %v172_v32 }
  0x13   : > { %v1270_v42 = vcombine.high %v1268_v38, %v1268_v38  ;;  %v1237_v43 = vcombine.high %v182_v39, %v182_v39  ;;  %v1249_v44 = vcombine.high %v1247_v40, %v1247_v40  ;;  %v1259_v45 = vld [vmem:[%s1689_s29 + $0x10] sm:$0x77]  ;;  %v1271_v46 = vld [vmem:[%s1689_s29 + $0x18] sm:$0x77]  ;;  %v1245_v47 = vcombine.low %v1244_v33, %v1244_v33 }
  0x14   : > { %1364 = vmatpush3.bf16.msra.mxu0 %v1468_v14  ;;  %181 = vst [vmem:[#allocation2 + $0x8] sm:$0x3] %v1235_v35  ;;  %v248_v48 = vrot.slane %v1246_v36, 6  ;;  %327 = vst [vmem:[#allocation2 + $0x8] sm:$0x30] %v1258_v37  ;;  %v1261_v49 = vcombine.high %v1259_v45, %v1259_v45  ;;  %v1273_v50 = vcombine.high %v1271_v46, %v1271_v46  ;;  %v1504_v36 = vld [vmem:[%s1823_s1 + $0x100] sm:$0xff]  }
  0x15   : > { %1386 = vmatpush3.bf16.msra.mxu1 %v1469_v15  ;;  %1365 = vmatprep.subr.bf16.mxu0 %v1470_v16  ;;  %180 = vst [vmem:[#allocation2] sm:$0x3] %v1234_v41  ;;  %v1257_v51 = vcombine.low %v1256_v34, %v1256_v34  ;;  %v398_v53 = vrot.slane %v1270_v42, 2  ;;  %v196_v54 = vshrl.u32 %v1237_v43, 16  ;;  %v198_v55 = vshll.u32 %v1237_v43, 16  ;;  %v1508_v41 = vld [vmem:[%s1823_s1 + $0x108] sm:$0xff]  }
  0x16   : > { %1387 = vmatprep.subr.bf16.mxu1 %v1471_v17  ;;  %v268_v56 = vshrl.u32 %v1249_v44, 16  ;;  %252 = vst [vmem:[#allocation2 + $0x8] sm:$0xc] %v248_v48  ;;  %v271_v57 = vshll.u32 %v1249_v44, 16  ;;  %v343_v58 = vshrl.u32 %v1261_v49, 16  ;;  %v346_v59 = vshll.u32 %v1261_v49, 16 }
  0x17   : > { %v418_v60 = vshrl.u32 %v1273_v50, 16  ;;  %326 = vst [vmem:[#allocation2] sm:$0x30] %v1257_v51  ;;  %402 = vst [vmem:[#allocation2 + $0x8] sm:$0xc0] %v398_v53  ;;  %v200_v62 = vrot.slane %v198_v55, 1  ;;  %v1269_v8 = vcombine.low %v1268_v38, %v1268_v38  ;;  %v1236_v9 = vcombine.low %v182_v39, %v182_v39 }
  0x18   : > { %1366 = vmatpush3.bf16.msra.mxu0 %v1472_v18  ;;  %v270_v63 = vrot.slane %v268_v56, 6  ;;  %v421_v0 = vshll.u32 %v1273_v50, 16  ;;  %v247_v1 = vrot.slane %v1245_v47, 6  ;;  %v273_v2 = vrot.slane %v271_v57, 7  ;;  %v1506_v38 = vld [vmem:[%s1823_s1 + $0x148] sm:$0xff]   ;;  %v1510_v42 = vld [vmem:[%s1823_s1 + $0x150] sm:$0xff]  }
  0x19   : > { %1388 = vmatpush3.bf16.msra.mxu1 %v1473_v19  ;;  %1367 = vmatprep.subr.bf16.mxu0 %v1474_v20  ;;  %v345_v3 = vrot.slane %v343_v58, 4  ;;  %v348_v4 = vrot.slane %v346_v59, 5  ;;  %v420_v5 = vrot.slane %v418_v60, 2  ;;  %v201_v6 = vor.u32 %v200_v62, %v196_v54  ;;  %v1505_v43 = vld [vmem:[%s1823_s1 + $0x180] sm:$0xff]   ;;  %v1507_v44 = vld [vmem:[%s1823_s1 + $0x1c8] sm:$0xff]   ;;  %v1511_v49 = vld [vmem:[%s1823_s1 + $0x1d0] sm:$0xff]  }
  0x1a   : > { %1389 = vmatprep.subr.bf16.mxu1 %v1475_v21  ;;  %v423_v7 = vrot.slane %v421_v0, 3  ;;  %251 = vst [vmem:[#allocation2] sm:$0xc] %v247_v1  ;;  %v274_v10 = vor.u32 %v273_v2, %v270_v63  ;;  %v1248_v12 = vcombine.low %v1247_v40, %v1247_v40  ;;  %v1260_v13 = vcombine.low %v1259_v45, %v1259_v45  ;;  %v1512_v45 = vld [vmem:[%s1823_s1 + $0x110] sm:$0xff]   ;;  %v1509_v48 = vld [vmem:[%s1823_s1 + $0x188] sm:$0xff]   ;;  %v1516_v50 = vld [vmem:[%s1823_s1 + $0x118] sm:$0xff]  }
  0x1b   : > { %v349_v11 = vor.u32 %v348_v4, %v345_v3  ;;  %205 = vst [vmem:[#allocation2 + $0x18] sm:$0x3] %v201_v6  ;;  %v397_v15 = vrot.slane %v1269_v8, 2  ;;  %v189_v16 = vshrl.u32 %v1236_v9, 16  ;;  %v191_v17 = vshll.u32 %v1236_v9, 16  ;;  %v1518_v51 = vld [vmem:[%s1823_s1 + $0x160] sm:$0xff]  }
  0x1c   : > { %1368 = vmatpush3.bf16.msra.mxu0 %v1476_v22  ;;  %v424_v14 = vor.u32 %v423_v7, %v420_v5  ;;  %278 = vst [vmem:[#allocation2 + $0x18] sm:$0xc] %v274_v10  ;;  %v260_v18 = vshrl.u32 %v1248_v12, 16  ;;  %v263_v19 = vshll.u32 %v1248_v12, 16  ;;  %v335_v20 = vshrl.u32 %v1260_v13, 16  ;;  %v1515_v53 = vld [vmem:[%s1823_s1 + $0x1d8] sm:$0xff]  }
  0x1d   : > { %1390 = vmatpush3.bf16.msra.mxu1 %v1477_v23  ;;  %1369 = vmatprep.subr.bf16.mxu0 %v1478_v24  ;;  %353 = vst [vmem:[#allocation2 + $0x18] sm:$0x30] %v349_v11  ;;  %v338_v21 = vshll.u32 %v1260_v13, 16  ;;  %401 = vst [vmem:[#allocation2] sm:$0xc0] %v397_v15  ;;  %v193_v22 = vrot.slane %v191_v17, 1  ;;  %v1272_v23 = vcombine.low %v1271_v46, %v1271_v46 }
  0x1e   : > { %1391 = vmatprep.subr.bf16.mxu1 %v1479_v25  ;;  %428 = vst [vmem:[#allocation2 + $0x18] sm:$0xc0] %v424_v14  ;;  %v469_v24 = vld [vmem:[#allocation2 + $0x8] sm:$0xff]  ;;  %v262_v25 = vrot.slane %v260_v18, 6  ;;  %v1514_v46 = vld [vmem:[%s1823_s1 + $0x158] sm:$0xff]   ;;  %v1520_v54 = vld [vmem:[%s1823_s1 + $0x120] sm:$0xff]  }
  0x1f   : > { %1027 = vmatprep.mubr.bf16.mxu0 %v469_v24  ;;  %v1522_v55 = vld [vmem:[%s1823_s1 + $0x168] sm:$0xff]   ;;  %v1517_v56 = vld [vmem:[%s1823_s1 + $0x198] sm:$0xff]   ;;  %v1519_v57 = vld [vmem:[%s1823_s1 + $0x1e0] sm:$0xff]  }
  0x20   : > { %1370 = vmatpush3.bf16.msra.mxu0 %v1480_v26  ;;  %v265_v26 = vrot.slane %v263_v19, 7  ;;  %v1524_v58 = vld [vmem:[%s1823_s1 + $0x128] sm:$0xff]   ;;  %v1526_v59 = vld [vmem:[%s1823_s1 + $0x170] sm:$0xff]   ;;  %v1521_v60 = vld [vmem:[%s1823_s1 + $0x1a0] sm:$0xff]  }
  0x21   : > { %1392 = vmatpush3.bf16.msra.mxu1 %v1481_v27  ;;  %1371 = vmatprep.subr.bf16.mxu0 %v1482_v28  ;;  %v337_v27 = vrot.slane %v335_v20, 4  ;;  %v340_v28 = vrot.slane %v338_v21, 5  ;;  %v1523_v62 = vld [vmem:[%s1823_s1 + $0x1e8] sm:$0xff]   ;;  %v1530_v63 = vld [vmem:[%s1823_s1 + $0x178] sm:$0xff]   ;;  %v1250_v1 = vld [vmem:[%s1689_s29 + $0x10] sm:$0x33] }
  0x22   : > { %1393 = vmatprep.subr.bf16.mxu1 %v1483_v29  ;;  %v194_v29 = vor.u32 %v193_v22, %v189_v16  ;;  %v266_v32 = vor.u32 %v265_v26, %v262_v25  ;;  %v1238_v0 = vld [vmem:[%s1689_s29 + $0x8] sm:$0x33]  ;;  %v1252_v3 = vcombine.high %v1250_v1, %v1250_v1  ;;  %v1262_v4 = vld [vmem:[%s1689_s29 + $0x18] sm:$0x33]  ;;  %v1784_v5 = vld [vmem:[%s1689_s29 + $0x20] sm:$0x33]  ;;  %v1251_v21 = vcombine.low %v1250_v1, %v1250_v1 }
  0x23   : > { %v341_v33 = vor.u32 %v340_v28, %v337_v27  ;;  %v1240_v2 = vcombine.high %v1238_v0, %v1238_v0  ;;  %v1241_v6 = vld [vmem:[%s1689_s29 + $0x8] sm:$0x77]  ;;  %v1239_v7 = vcombine.low %v1238_v0, %v1238_v0  ;;  %v1264_v8 = vcombine.high %v1262_v4, %v1262_v4  ;;  %v1253_v11 = vld [vmem:[%s1689_s29 + $0x10] sm:$0x77]  ;;  %v1265_v12 = vld [vmem:[%s1689_s29 + $0x18] sm:$0x77] }
  0x24   : > { %1372 = vmatpush3.bf16.msra.mxu0 %v1484_v30  ;;  %v410_v30 = vshrl.u32 %v1272_v23, 16  ;;  %204 = vst [vmem:[#allocation2 + $0x10] sm:$0x3] %v194_v29  ;;  %277 = vst [vmem:[#allocation2 + $0x10] sm:$0xc] %v266_v32  ;;  %v468_v40 = vld [vmem:[#allocation2] sm:$0xff]  ;;  %v1276_v9 = vcombine.high %v1784_v5, %v1784_v5  ;;  %v1243_v10 = vcombine.high %v1241_v6, %v1241_v6 }
  0x25   : > { %1394 = vmatpush3.bf16.msra.mxu1 %v1485_v31  ;;  %1401 = vmatprep.subr.bf16.mxu0 %v1502_v52  ;;  %v413_v31 = vshll.u32 %v1272_v23, 16  ;;  %352 = vst [vmem:[#allocation2 + $0x10] sm:$0x30] %v341_v33  ;;  %v471_v39 = vld [vmem:[#allocation2 + $0x18] sm:$0xff]  ;;  %v1513_v52 = vld [vmem:[%s1823_s1 + $0x190] sm:$0xff]   ;;  %v287_v14 = vrot.slane %v1252_v3, 6  ;;  %v1255_v15 = vcombine.high %v1253_v11, %v1253_v11  ;;  %v1267_v16 = vcombine.high %v1265_v12, %v1265_v12 }
  0x26   : > { %1423 = vmatprep.subr.bf16.mxu1 %v1503_v61  ;;  %v412_v34 = vrot.slane %v410_v30, 2  ;;  %1068 = vmatprep.mubr.bf16.mxu1 %v471_v39  ;;  %v1528_v61 = vld [vmem:[%s1823_s1 + $0x130] sm:$0xff]   ;;  %v1277_v13 = vld [vmem:[%s1689_s29 + $0x20] sm:$0x77]  ;;  %216 = vst [vmem:[#allocation2 + $0x28] sm:$0x3] %v1240_v2 }
  0x27   : > { %v415_v35 = vrot.slane %v413_v31, 3  ;;  %1028 = vmatmul.mubr.bf16.vlgmr.msra.gmra.mrb[0].mxu0 %v468_v40  ;;  %v1279_v17 = vcombine.high %v1277_v13, %v1277_v13  ;;  %215 = vst [vmem:[#allocation2 + $0x20] sm:$0x3] %v1239_v7  ;;  %364 = vst [vmem:[#allocation2 + $0x28] sm:$0x30] %v1264_v8  ;;  %v437_v18 = vrot.slane %v1276_v9, 2  ;;  %v1263_v40 = vcombine.low %v1262_v4, %v1262_v4 }
  0x28   : > { %1402 = vmatpush3.bf16.msra.mxu0 %v1504_v36  ;;  %v231_v19 = vshrl.u32 %v1243_v10, 16  ;;  %v233_v20 = vshll.u32 %v1243_v10, 16  ;;  %v1525_v22 = vld [vmem:[%s1823_s1 + $0x1a8] sm:$0xff]   ;;  %v1532_v23 = vld [vmem:[%s1823_s1 + $0x138] sm:$0xff]   ;;  %291 = vst [vmem:[#allocation2 + $0x28] sm:$0xc] %v287_v14 }
  0x29   : > { %v416_v37 = vor.u32 %v415_v35, %v412_v34  ;;  %1403 = vmatprep.subr.bf16.mxu0 %v1506_v38  ;;  %v307_v24 = vshrl.u32 %v1255_v15, 16  ;;  %v310_v25 = vshll.u32 %v1255_v15, 16  ;;  %v380_v26 = vshrl.u32 %v1267_v16, 16  ;;  %v1527_v28 = vld [vmem:[%s1823_s1 + $0x1f0] sm:$0xff]   ;;  %441 = vst [vmem:[#allocation2 + $0x28] sm:$0xc0] %v437_v18 }
  0x2a   : > { %v383_v27 = vshll.u32 %v1267_v16, 16  ;;  %v235_v29 = vrot.slane %v233_v20, 1  ;;  %v457_v30 = vshrl.u32 %v1279_v17, 16  ;;  %v460_v31 = vshll.u32 %v1279_v17, 16  ;;  %363 = vst [vmem:[#allocation2 + $0x20] sm:$0x30] %v1263_v40 }
  0x2b   : > { %427 = vst [vmem:[#allocation2 + $0x10] sm:$0xc0] %v416_v37  ;;  %v286_v32 = vrot.slane %v1251_v21, 6  ;;  %v309_v33 = vrot.slane %v307_v24, 6  ;;  %v312_v34 = vrot.slane %v310_v25, 7  ;;  %v382_v35 = vrot.slane %v380_v26, 4 }
  0x2c   : > { %1404 = vmatpush3.bf16.msra.mxu0 %v1508_v41  ;;  %v385_v36 = vrot.slane %v383_v27, 5  ;;  %v236_v37 = vor.u32 %v235_v29, %v231_v19  ;;  %v459_v38 = vrot.slane %v457_v30, 2  ;;  %v462_v39 = vrot.slane %v460_v31, 3  ;;  %v1529_v41 = vld [vmem:[%s1823_s1 + $0x1b0] sm:$0xff]   ;;  %v1280_v18 = vld [vmem:[%s1824_s2] ss:$0 sm:$0xff] }
  0x2d   : > { %1405 = vmatprep.subr.bf16.mxu0 %v1510_v42  ;;  %290 = vst [vmem:[#allocation2 + $0x20] sm:$0xc] %v286_v32  ;;  %v313_v42 = vor.u32 %v312_v34, %v309_v33 }
  0x2e   : > { %240 = vst [vmem:[#allocation2 + $0x38] sm:$0x3] %v236_v37 }
  0x2f   : > { %317 = vst [vmem:[#allocation2 + $0x38] sm:$0xc] %v313_v42 }
  0x30   : > { %1406 = vmatpush3.bf16.msra.mxu0 %v1512_v45  ;;  %v1531_v45 = vld [vmem:[%s1823_s1 + $0x1f8] sm:$0xff]  }
  0x31   : > { %1407 = vmatprep.subr.bf16.mxu0 %v1514_v46  ;;  %v463_v46 = vor.u32 %v462_v39, %v459_v38 }
  0x32   : > { %v470_v47 = vld [vmem:[#allocation2 + $0x10] sm:$0xff] }
  0x33   : > { %1069 = vmatmul.mubr.bf16.vlgmr.msra.gmra.mrb[0].mxu1 %v470_v47  ;;  %v1242_v47 = vcombine.low %v1241_v6, %v1241_v6  ;;  %467 = vst [vmem:[#allocation2 + $0x38] sm:$0xc0] %v463_v46 }
  0x34   : > { %1424 = vmatpush3.bf16.msra.mxu1 %v1505_v43  ;;  %1408 = vmatpush3.bf16.msra.mxu0 %v1516_v50  ;;  %v386_v43 = vor.u32 %v385_v36, %v382_v35 }
  0x35   : > { %1425 = vmatprep.subr.bf16.mxu1 %v1507_v44  ;;  %1409 = vmatprep.subr.bf16.mxu0 %v1518_v51  ;;  %v1275_v44 = vcombine.low %v1784_v5, %v1784_v5  ;;  %v1278_v51 = vcombine.low %v1277_v13, %v1277_v13 }
  0x36   : > { %390 = vst [vmem:[#allocation2 + $0x38] sm:$0x30] %v386_v43 }
  0x37   : > { %v436_v50 = vrot.slane %v1275_v44, 2 }
  0x38   : > { %1426 = vmatpush3.bf16.msra.mxu1 %v1509_v48  ;;  %1410 = vmatpush3.bf16.msra.mxu0 %v1520_v54  ;;  %v1254_v48 = vcombine.low %v1253_v11, %v1253_v11 }
  0x39   : > { %1427 = vmatprep.subr.bf16.mxu1 %v1511_v49  ;;  %1411 = vmatprep.subr.bf16.mxu0 %v1522_v55  ;;  %v1266_v49 = vcombine.low %v1265_v12, %v1265_v12  ;;  %440 = vst [vmem:[#allocation2 + $0x20] sm:$0xc0] %v436_v50 }
  0x3a   : > { %v299_v54 = vshrl.u32 %v1254_v48, 16  ;;  %v302_v55 = vshll.u32 %v1254_v48, 16 }
  0x3c   : > { %1428 = vmatpush3.bf16.msra.mxu1 %v1513_v52  ;;  %1412 = vmatpush3.bf16.msra.mxu0 %v1524_v58  ;;  %v224_v52 = vshrl.u32 %v1242_v47, 16  ;;  %v372_v58 = vshrl.u32 %v1266_v49, 16  ;;  %v304_v0 = vrot.slane %v302_v55, 7 }
  0x3d   : > { %1429 = vmatprep.subr.bf16.mxu1 %v1515_v53  ;;  %1413 = vmatprep.subr.bf16.mxu0 %v1526_v59  ;;  %v226_v53 = vshll.u32 %v1242_v47, 16  ;;  %v375_v59 = vshll.u32 %v1266_v49, 16  ;;  %v475_v9 = vld [vmem:[#allocation2 + $0x38] sm:$0xff] }
  0x3e   : > { %v374_v1 = vrot.slane %v372_v58, 4  ;;  %1150 = vmatprep.mubr.bf16.mxu1 %v475_v9 }
  0x3f   : > { %v377_v2 = vrot.slane %v375_v59, 5 }
  0x40   : > { %1430 = vmatpush3.bf16.msra.mxu1 %v1517_v56  ;;  %1414 = vmatpush3.bf16.msra.mxu0 %v1528_v61  ;;  %v1533_v56 = vld [vmem:[%s1823_s1 + $0x1b8] sm:$0xff]   ;;  %v452_v61 = vshll.u32 %v1278_v51, 16  ;;  %v472_v10 = vld [vmem:[#allocation2 + $0x20] sm:$0xff] }
  0x41   : > { %1431 = vmatprep.subr.bf16.mxu1 %v1519_v57  ;;  %1415 = vmatprep.subr.bf16.mxu0 %v1530_v63  ;;  %v473_v57 = vld [vmem:[#allocation2 + $0x28] sm:$0xff]  ;;  %v301_v63 = vrot.slane %v299_v54, 6  ;;  %v378_v7 = vor.u32 %v377_v2, %v374_v1 }
  0x42   : > { %1109 = vmatprep.mubr.bf16.mxu0 %v473_v57  ;;  %v454_v4 = vrot.slane %v452_v61, 3 }
  0x43   : > { %v305_v6 = vor.u32 %v304_v0, %v301_v63  ;;  %389 = vst [vmem:[#allocation2 + $0x30] sm:$0x30] %v378_v7 }
  0x44   : > { %1432 = vmatpush3.bf16.msra.mxu1 %v1521_v60  ;;  %1416 = vmatpush3.bf16.msra.mxu0 %v1532_v23  ;;  %v449_v60 = vshrl.u32 %v1278_v51, 16 }
  0x45   : > { %1433 = vmatprep.subr.bf16.mxu1 %v1523_v62  ;;  %v228_v62 = vrot.slane %v226_v53, 1  ;;  %316 = vst [vmem:[#allocation2 + $0x30] sm:$0xc] %v305_v6 }
  0x46   : > { %v451_v3 = vrot.slane %v449_v60, 2 }
  0x47   : > { %v229_v5 = vor.u32 %v228_v62, %v224_v52  ;;  %1110 = vmatmul.mubr.bf16.vlgmr.msra.gmra.mrb[4].mxu0 %v472_v10 }
  0x48   : > { %1434 = vmatpush3.bf16.msra.mxu1 %v1525_v22  ;;  %v455_v8 = vor.u32 %v454_v4, %v451_v3 }
  0x49   : > { %1435 = vmatprep.subr.bf16.mxu1 %v1527_v28  ;;  %239 = vst [vmem:[#allocation2 + $0x30] sm:$0x3] %v229_v5 }
  0x4a   : > { %466 = vst [vmem:[#allocation2 + $0x30] sm:$0xc0] %v455_v8 }
  0x4c   : > { %1436 = vmatpush3.bf16.msra.mxu1 %v1529_v41 }
  0x4d   : > { %1437 = vmatprep.subr.bf16.mxu1 %v1531_v45 }
  0x50   : > { %1438 = vmatpush3.bf16.msra.mxu1 %v1533_v56 }
  0x51   : > { %v474_v11 = vld [vmem:[#allocation2 + $0x30] sm:$0xff] }
  0x53   : > { %1151 = vmatmul.mubr.bf16.vlgmr.msra.gmra.mrb[4].mxu1 %v474_v11 }
  0xfa   : > { %v1373_v12 = vpop.f32.mrb[0].mxu0 }
  0xfb   : > { %v1374_v13 = vpop.f32.mrb[1].mxu0 }
  0xfc   : > { %v1375_v14 = vadd.f32 %v1374_v13, %v1373_v12  ;;  %v1376_v15 = vpop.f32.mrb[2].mxu0 }
  0xfd   : > { %v1377_v16 = vpop.f32.mrb[3].mxu0 }
  0xfe   : > { %v1378_v17 = vadd.f32 %v1377_v16, %v1376_v15  ;;  %v1030_v20 = vadd.f32 %v1375_v14, %v1280_v18 }
 0x100   : > { %v1033_v24 = vadd.f32 %v1378_v17, %v1280_v18 }
 0x106   : > { %v1395_v19 = vpop.f32.mrb[0].mxu1 }
 0x107   : > { %v1396_v21 = vpop.f32.mrb[1].mxu1 }
 0x108   : > { %v1397_v22 = vadd.f32 %v1396_v21, %v1395_v19  ;;  %v1398_v23 = vpop.f32.mrb[2].mxu1 }
 0x109   : > { %v1399_v25 = vpop.f32.mrb[3].mxu1 }
 0x10a   : > { %v1071_v26 = vadd.f32 %v1397_v22, %v1030_v20  ;;  %v1400_v27 = vadd.f32 %v1399_v25, %v1398_v23 }
 0x10c   : > { %v1074_v28 = vadd.f32 %v1400_v27, %v1033_v24 }
 0x11a   : > { %v1417_v29 = vpop.f32.mrb[4].mxu0 }
 0x11b   : > { %v1418_v30 = vpop.f32.mrb[5].mxu0 }
 0x11c   : > { %v1419_v31 = vadd.f32 %v1418_v30, %v1417_v29  ;;  %v1420_v32 = vpop.f32.mrb[6].mxu0 }
 0x11d   : > { %v1421_v33 = vpop.f32.mrb[7].mxu0 }
 0x11e   : > { %v1112_v34 = vadd.f32 %v1419_v31, %v1071_v26  ;;  %v1422_v35 = vadd.f32 %v1421_v33, %v1420_v32 }
 0x120   : > { %v1115_v37 = vadd.f32 %v1422_v35, %v1074_v28 }
 0x126   : > { %v1439_v36 = vpop.f32.mrb[4].mxu1 }
 0x127   : > { %v1440_v38 = vpop.f32.mrb[5].mxu1 }
 0x128   : > { %v1441_v39 = vadd.f32 %v1440_v38, %v1439_v36  ;;  %v1442_v40 = vpop.f32.mrb[6].mxu1 }
 0x129   : > { %v1443_v41 = vpop.f32.mrb[7].mxu1 }
 0x12a   : > { %v1153_v42 = vadd.f32 %v1441_v39, %v1112_v34  ;;  %v1444_v43 = vadd.f32 %v1443_v41, %v1442_v40 }
 0x12c   : > { %v1156_v44 = vadd.f32 %v1444_v43, %v1115_v37  ;;  %v1159_v45 = vmax.f32 %v1153_v42, 0.0 }
 0x12e   : > { %v1160_v46 = vmax.f32 %v1156_v44, 0.0 }
 0x130   : > { %v1355_v47 = vpack.c.bf16 %v1160_v46, %v1159_v45 }
 0x132   : > { %1356 = vst [vmem:[%s170_s27] sm:$0xff] %v1355_v47  }
 0x133 PF: > { %s13_s12 = sadd.s32 1, %s1556_s12  }
 0x134   : > { %p10_p4 = scmp.ge.s32.totalorder %s13_s12, 4  }
 0x136   :  { %12 = sbr.rel (!%p10_p4) target bundleno = 1 (0x1), region = 66 }

// kernel: generator_forward.6
= control target key start
LH: loop header
LB: loop body
LE: loop exit
PB: predicated region body
PF: predicated region fallthrough
CT: control target
= control target key end

     0   :  { %s2198_s12 = smov 0   ;;  %s2696_s0 = inlined_call_operand.vmem [shape: bf16[2,6,6,128], index: 0, kind: input, shape index: {}]   ;;  %s2697_s1 = inlined_call_operand.vmem [shape: bf16[1152,256], index: 1, kind: input, shape index: {}]   ;;  %s2698_s2 = inlined_call_operand.vmem [shape: f32[1,256], index: 2, kind: input, shape index: {}]   ;;  %s2699_s3 = inlined_call_operand.vmem [shape: bf16[2,16,256], index: 3, kind: output, shape index: {}]  }
   0x1 LB: > { %s1665_s13 = sadd.s32 4294967295, %s2175_s12   ;;  %p1669_p0 = scmp.ge.s32.totalorder %s2175_s12, 1  ;;  %s2175_s12 = sphi %s2198_s12, %s13_s12  }
   0x2   : > { %p137_p1 = scmp.lt.s32.totalorder %s2175_s12, 3 }
   0x4   : > { %p138_p2 = pnand %p1669_p0, %p137_p1 }
   0x5   : > { %v1920_v0 = vld [vmem:[%s2697_s1 + $0x4] ss:$8 sps:$4 sm:$0xff] (!%p138_p2)   ;;  %v1924_v2 = vld [vmem:[%s2697_s1] ss:$8 sps:$4 sm:$0xff] (!%p138_p2)   ;;  %v1926_v4 = vld [vmem:[%s2697_s1 + $0x14] ss:$8 sps:$4 sm:$0xff] (!%p138_p2)  }
   0x6   : > { %141 = sbr.rel (%p138_p2) target bundleno = 389 (0x185), region = 32  ;;  %v1922_v1 = vld [vmem:[%s2697_s1 + $0x204] ss:$8 sps:$4 sm:$0xff] (!%p138_p2)   ;;  %1377 = vmatprep.subr.bf16.mxu1 (!%p138_p2), %v1920_v0  ;;  %v1925_v3 = vld [vmem:[%s2697_s1 + $0x200] ss:$8 sps:$4 sm:$0xff] (!%p138_p2)   ;;  %p161_p3 = scmp.lt.s32.totalorder (!%p138_p2), %s1665_s13, 1 }
   0x7   : > { %1463 = vmatprep.subr.bf16.mxu0 (!%p138_p2), %v1922_v1  ;;  %1378 = vmatpush1.bf16.msra.mxu1 (!%p138_p2), %v1924_v2  ;;  %v1928_v5 = vld [vmem:[%s2697_s1 + $0x214] ss:$8 sps:$4 sm:$0xff] (!%p138_p2)   ;;  %v1930_v6 = vld [vmem:[%s2697_s1 + $0x10] ss:$8 sps:$4 sm:$0xff] (!%p138_p2)   ;;  %v1932_v8 = vld [vmem:[%s2697_s1 + $0x24] ss:$8 sps:$4 sm:$0xff] (!%p138_p2)  }
   0x8   : > { %1464 = vmatpush1.bf16.msra.mxu0 (!%p138_p2), %v1925_v3  ;;  %1379 = vmatprep.subr.bf16.mxu1 (!%p138_p2), %v1926_v4  ;;  %v1931_v7 = vld [vmem:[%s2697_s1 + $0x210] ss:$8 sps:$4 sm:$0xff] (!%p138_p2)   ;;  %v1934_v9 = vld [vmem:[%s2697_s1 + $0x224] ss:$8 sps:$4 sm:$0xff] (!%p138_p2)   ;;  %v1936_v10 = vld [vmem:[%s2697_s1 + $0x20] ss:$8 sps:$4 sm:$0xff] (!%p138_p2)  }
   0x9   : > { %1465 = vmatprep.subr.bf16.mxu0 (!%p138_p2), %v1928_v5  ;;  %v1937_v11 = vld [vmem:[%s2697_s1 + $0x220] ss:$8 sps:$4 sm:$0xff] (!%p138_p2)   ;;  %v1938_v12 = vld [vmem:[%s2697_s1 + $0x34] ss:$8 sps:$4 sm:$0xff] (!%p138_p2)   ;;  %v1942_v14 = vld [vmem:[%s2697_s1 + $0x30] ss:$8 sps:$4 sm:$0xff] (!%p138_p2)  }
   0xa   : > { %v1940_v13 = vld [vmem:[%s2697_s1 + $0x234] ss:$8 sps:$4 sm:$0xff] (!%p138_p2)   ;;  %v1943_v15 = vld [vmem:[%s2697_s1 + $0x230] ss:$8 sps:$4 sm:$0xff] (!%p138_p2)   ;;  %v1944_v16 = vld [vmem:[%s2697_s1 + $0x44] ss:$8 sps:$4 sm:$0xff] (!%p138_p2)  }
   0xb   : > { %1380 = vmatpush1.bf16.msra.mxu1 (!%p138_p2), %v1930_v6  ;;  %v1946_v17 = vld [vmem:[%s2697_s1 + $0x244] ss:$8 sps:$4 sm:$0xff] (!%p138_p2)   ;;  %v1948_v18 = vld [vmem:[%s2697_s1 + $0x40] ss:$8 sps:$4 sm:$0xff] (!%p138_p2)   ;;  %v1950_v20 = vld [vmem:[%s2697_s1 + $0x54] ss:$8 sps:$4 sm:$0xff] (!%p138_p2)  }
   0xc   : > { %1466 = vmatpush1.bf16.msra.mxu0 (!%p138_p2), %v1931_v7  ;;  %1381 = vmatprep.subr.bf16.mxu1 (!%p138_p2), %v1932_v8  ;;  %v1949_v19 = vld [vmem:[%s2697_s1 + $0x240] ss:$8 sps:$4 sm:$0xff] (!%p138_p2)   ;;  %v1952_v21 = vld [vmem:[%s2697_s1 + $0x254] ss:$8 sps:$4 sm:$0xff] (!%p138_p2)   ;;  %v1954_v22 = vld [vmem:[%s2697_s1 + $0x50] ss:$8 sps:$4 sm:$0xff] (!%p138_p2)  }
   0xd   : > { %1467 = vmatprep.subr.bf16.mxu0 %v1934_v9  ;;  %v1955_v23 = vld [vmem:[%s2697_s1 + $0x250] ss:$8 sps:$4 sm:$0xff]   ;;  %v1956_v24 = vld [vmem:[%s2697_s1 + $0x64] ss:$8 sps:$4 sm:$0xff]   ;;  %v1960_v26 = vld [vmem:[%s2697_s1 + $0x60] ss:$8 sps:$4 sm:$0xff]  }
   0xe   : > { %v1958_v25 = vld [vmem:[%s2697_s1 + $0x264] ss:$8 sps:$4 sm:$0xff]   ;;  %v1961_v27 = vld [vmem:[%s2697_s1 + $0x260] ss:$8 sps:$4 sm:$0xff]   ;;  %v1962_v28 = vld [vmem:[%s2697_s1 + $0x74] ss:$8 sps:$4 sm:$0xff]  }
   0xf   : > { %1382 = vmatpush1.bf16.msra.mxu1 %v1936_v10  ;;  %v1964_v29 = vld [vmem:[%s2697_s1 + $0x274] ss:$8 sps:$4 sm:$0xff]   ;;  %v1966_v30 = vld [vmem:[%s2697_s1 + $0x70] ss:$8 sps:$4 sm:$0xff]   ;;  %v1968_v32 = vld [vmem:[%s2697_s1 + $0x84] ss:$8 sps:$4 sm:$0xff]  }
  0x10   : > { %1468 = vmatpush1.bf16.msra.mxu0 %v1937_v11  ;;  %1383 = vmatprep.subr.bf16.mxu1 %v1938_v12  ;;  %v1967_v31 = vld [vmem:[%s2697_s1 + $0x270] ss:$8 sps:$4 sm:$0xff]   ;;  %v1970_v33 = vld [vmem:[%s2697_s1 + $0x284] ss:$8 sps:$4 sm:$0xff]   ;;  %v1972_v34 = vld [vmem:[%s2697_s1 + $0x80] ss:$8 sps:$4 sm:$0xff]  }
  0x11   : > { %1469 = vmatprep.subr.bf16.mxu0 %v1940_v13  ;;  %v1973_v35 = vld [vmem:[%s2697_s1 + $0x280] ss:$8 sps:$4 sm:$0xff]   ;;  %v1974_v36 = vld [vmem:[%s2697_s1 + $0x94] ss:$8 sps:$4 sm:$0xff]   ;;  %s2701_s13 = smov (!%p161_p3, %s1665_s13), 1 }
  0x12   : > { %v1976_v37 = vld [vmem:[%s2697_s1 + $0x294] ss:$8 sps:$4 sm:$0xff]   ;;  %v1978_v38 = vld [vmem:[%s2697_s1 + $0x90] ss:$8 sps:$4 sm:$0xff]   ;;  %v1980_v40 = vld [vmem:[%s2697_s1 + $0xa4] ss:$8 sps:$4 sm:$0xff]  }
  0x13   : > { %1384 = vmatpush1.bf16.msra.mxu1 %v1942_v14  ;;  %v1979_v39 = vld [vmem:[%s2697_s1 + $0x290] ss:$8 sps:$4 sm:$0xff]   ;;  %s1910_s21 = smul.u32 24, %s2701_s13  ;;  %v1982_v41 = vld [vmem:[%s2697_s1 + $0x2a4] ss:$8 sps:$4 sm:$0xff]   ;;  %s1887_s14 = sshll.u32 %s2701_s13, 4 }
  0x14   : > { %1470 = vmatpush1.bf16.msra.mxu0 %v1943_v15  ;;  %1385 = vmatprep.subr.bf16.mxu1 %v1944_v16  ;;  %v1984_v42 = vld [vmem:[%s2697_s1 + $0xa0] ss:$8 sps:$4 sm:$0xff]   ;;  %v1986_v44 = vld [vmem:[%s2697_s1 + $0xb4] ss:$8 sps:$4 sm:$0xff]   ;;  %v1990_v46 = vld [vmem:[%s2697_s1 + $0xb0] ss:$8 sps:$4 sm:$0xff]   ;;  %s170_s17 = scalar_lea.vmem %s2699_s3, %s1887_s14 }
  0x15   : > { %1471 = vmatprep.subr.bf16.mxu0 %v1946_v17  ;;  %v1985_v43 = vld [vmem:[%s2697_s1 + $0x2a0] ss:$8 sps:$4 sm:$0xff]   ;;  %s2351_s5 = scalar_lea.vmem %s2696_s0, %s1910_s21  ;;  %v1988_v45 = vld [vmem:[%s2697_s1 + $0x2b4] ss:$8 sps:$4 sm:$0xff]   ;;  %v1991_v47 = vld [vmem:[%s2697_s1 + $0x2b0] ss:$8 sps:$4 sm:$0xff]  }
  0x16   : > { %v1992_v48 = vld [vmem:[%s2697_s1 + $0xc4] ss:$8 sps:$4 sm:$0xff]   ;;  %v2016_v50 = vld [vmem:[%s2351_s5] ss:$0 sps:$4 sm:$0x77]  }
  0x17   : > { %1386 = vmatpush1.bf16.msra.mxu1 %v1948_v18  ;;  %v1994_v49 = vld [vmem:[%s2697_s1 + $0x2c4] ss:$8 sps:$4 sm:$0xff]   ;;  %v179_v52 = vshrl.u32 %v2016_v50, 16  ;;  %v181_v53 = vshll.u32 %v2016_v50, 16  ;;  %v1996_v55 = vld [vmem:[%s2697_s1 + $0xc0] ss:$8 sps:$4 sm:$0xff]  }
  0x18   : > { %1472 = vmatpush1.bf16.msra.mxu0 %v1949_v19  ;;  %1387 = vmatprep.subr.bf16.mxu1 %v1950_v20  ;;  %v2017_v51 = vld [vmem:[%s2351_s5 + $0x4] ss:$0 sps:$4 sm:$0x77]   ;;  %v2018_v54 = vld [vmem:[%s2351_s5 + $0x8] ss:$0 sps:$4 sm:$0x77]  }
  0x19   : > { %1473 = vmatprep.subr.bf16.mxu0 %v1952_v21  ;;  %v1997_v56 = vld [vmem:[%s2697_s1 + $0x2c0] ss:$8 sps:$4 sm:$0xff]   ;;  %v252_v57 = vshrl.u32 %v2017_v51, 16  ;;  %v255_v58 = vshll.u32 %v2017_v51, 16  ;;  %v1998_v59 = vld [vmem:[%s2697_s1 + $0xd4] ss:$8 sps:$4 sm:$0xff]  }
  0x1a   : > { %v183_v60 = vrot.slane %v181_v53, 1  ;;  %v336_v61 = vshrl.u32 %v2018_v54, 16  ;;  %v339_v62 = vshll.u32 %v2018_v54, 16  ;;  %v2019_v63 = vld [vmem:[%s2351_s5 + $0xc] ss:$0 sps:$4 sm:$0x77]  }
  0x1b   : > { %1388 = vmatpush1.bf16.msra.mxu1 %v1954_v22  ;;  %v2000_v0 = vld [vmem:[%s2697_s1 + $0x2d4] ss:$8 sps:$4 sm:$0xff]   ;;  %v254_v1 = vrot.slane %v252_v57, 6  ;;  %v257_v2 = vrot.slane %v255_v58, 7  ;;  %v419_v6 = vshrl.u32 %v2019_v63, 16  ;;  %v422_v11 = vshll.u32 %v2019_v63, 16 }
  0x1c   : > { %1474 = vmatpush1.bf16.msra.mxu0 %v1955_v23  ;;  %1389 = vmatprep.subr.bf16.mxu1 %v1956_v24  ;;  %v184_v3 = vor.u32 %v183_v60, %v179_v52  ;;  %v338_v4 = vrot.slane %v336_v61, 4  ;;  %v341_v5 = vrot.slane %v339_v62, 5  ;;  %v2023_v7 = vld [vmem:[%s2351_s5 + $0x4] ss:$0 sps:$4 sm:$0x66]  }
  0x1d   : > { %1475 = vmatprep.subr.bf16.mxu0 %v1958_v25  ;;  %v2002_v8 = vld [vmem:[%s2697_s1 + $0xd0] ss:$8 sps:$4 sm:$0xff]   ;;  %v258_v10 = vor.u32 %v257_v2, %v254_v1  ;;  %v2024_v12 = vld [vmem:[%s2351_s5 + $0x8] ss:$0 sps:$4 sm:$0x66]   ;;  %v421_v15 = vrot.slane %v419_v6, 2 }
  0x1e   : > { %v2003_v9 = vld [vmem:[%s2697_s1 + $0x2d0] ss:$8 sps:$4 sm:$0xff]   ;;  %v2004_v13 = vld [vmem:[%s2697_s1 + $0xe4] ss:$8 sps:$4 sm:$0xff]   ;;  %186 = vst [vmem:[#allocation2 + $0x8] sm:$0x3] %v184_v3  ;;  %v342_v14 = vor.u32 %v341_v5, %v338_v4 }
  0x1f   : > { %1390 = vmatpush1.bf16.msra.mxu1 %v1960_v26  ;;  %v214_v16 = vrot.slane %v2023_v7, 1  ;;  %260 = vst [vmem:[#allocation2 + $0x8] sm:$0xc] %v258_v10  ;;  %v424_v17 = vrot.slane %v422_v11, 3  ;;  %v293_v18 = vrot.slane %v2024_v12, 7 }
  0x20   : > { %1476 = vmatpush1.bf16.msra.mxu0 %v1961_v27  ;;  %1391 = vmatprep.subr.bf16.mxu1 %v1962_v28  ;;  %v2025_v19 = vld [vmem:[%s2351_s5 + $0xc] ss:$0 sps:$4 sm:$0x66]   ;;  %344 = vst [vmem:[#allocation2 + $0x8] sm:$0x30] %v342_v14 }
  0x21   : > { %1477 = vmatprep.subr.bf16.mxu0 %v1964_v29  ;;  %v2006_v20 = vld [vmem:[%s2697_s1 + $0x2e4] ss:$8 sps:$4 sm:$0xff]   ;;  %216 = vst [vmem:[#allocation2 + $0x28] sm:$0x3] %v214_v16  ;;  %v2008_v22 = vld [vmem:[%s2697_s1 + $0xe0] ss:$8 sps:$4 sm:$0xff]   ;;  %v425_v24 = vor.u32 %v424_v17, %v421_v15 }
  0x22   : > { %v2026_v21 = vld [vmem:[%s2351_s5 + $0x10] ss:$0 sps:$4 sm:$0x66]   ;;  %v2009_v23 = vld [vmem:[%s2697_s1 + $0x2e0] ss:$8 sps:$4 sm:$0xff]   ;;  %v376_v25 = vrot.slane %v2025_v19, 5 }
  0x23   : > { %1392 = vmatpush1.bf16.msra.mxu1 %v1966_v30  ;;  %295 = vst [vmem:[#allocation2 + $0x28] sm:$0xc] %v293_v18  ;;  %v172_v26 = vld [vmem:[%s2351_s5] sm:$0x3]  ;;  %v2010_v27 = vld [vmem:[%s2697_s1 + $0xf4] ss:$8 sps:$4 sm:$0xff]  }
  0x24   : > { %1478 = vmatpush1.bf16.msra.mxu0 %v1967_v31  ;;  %1393 = vmatprep.subr.bf16.mxu1 %v1968_v32  ;;  %v2012_v28 = vld [vmem:[%s2697_s1 + $0x2f4] ss:$8 sps:$4 sm:$0xff]   ;;  %v460_v29 = vrot.slane %v2026_v21, 3  ;;  %173 = vst [vmem:[#allocation2] sm:$0x3] %v172_v26 }
  0x25   : > { %1479 = vmatprep.subr.bf16.mxu0 %v1970_v33  ;;  %v2030_v30 = vld [vmem:[%s2351_s5 + $0x4] ss:$0 sps:$4 sm:$0x33]   ;;  %427 = vst [vmem:[#allocation2 + $0x8] sm:$0xc0] %v425_v24 }
  0x26   : > { %378 = vst [vmem:[#allocation2 + $0x28] sm:$0x30] %v376_v25  ;;  %v2031_v31 = vld [vmem:[%s2351_s5 + $0x8] ss:$0 sps:$4 sm:$0x33]   ;;  %v244_v32 = vrot.slane %v2030_v30, 6 }
  0x27   : > { %1394 = vmatpush1.bf16.msra.mxu1 %v1972_v34  ;;  %462 = vst [vmem:[#allocation2 + $0x28] sm:$0xc0] %v460_v29  ;;  %v2032_v33 = vld [vmem:[%s2351_s5 + $0xc] ss:$0 sps:$4 sm:$0x33]  }
  0x28   : > { %1480 = vmatpush1.bf16.msra.mxu0 %v1973_v35  ;;  %1395 = vmatprep.subr.bf16.mxu1 %v1974_v36  ;;  %v2014_v34 = vld [vmem:[%s2697_s1 + $0xf0] ss:$8 sps:$4 sm:$0xff]   ;;  %330 = vst [vmem:[#allocation2] sm:$0x30] %v2031_v31  ;;  %246 = vst [vmem:[#allocation2] sm:$0xc] %v244_v32 }
  0x29   : > { %1481 = vmatprep.subr.bf16.mxu0 %v1976_v37  ;;  %v2015_v35 = vld [vmem:[%s2697_s1 + $0x2f0] ss:$8 sps:$4 sm:$0xff]   ;;  %v2033_v36 = vld [vmem:[%s2351_s5 + $0x4] ss:$0 sps:$4 sm:$0x77]  }
  0x2a   : > { %v2022_v37 = vld [vmem:[%s2697_s1 + $0x104] ss:$8 sps:$4 sm:$0xff]   ;;  %v2020_v60 = vld [vmem:[%s2697_s1 + $0x100] ss:$8 sps:$4 sm:$0xff]   ;;  %v2037_v3 = vld [vmem:[%s2697_s1 + $0x110] ss:$8 sps:$4 sm:$0xff]  }
  0x2b   : > { %1396 = vmatpush1.bf16.msra.mxu1 %v1978_v38  ;;  %v411_v38 = vrot.slane %v2032_v33, 2  ;;  %v2045_v4 = vld [vmem:[%s2697_s1 + $0x124] ss:$8 sps:$4 sm:$0xff]   ;;  %v2027_v5 = vld [vmem:[%s2697_s1 + $0x300] ss:$8 sps:$4 sm:$0xff]  }
  0x2c   : > { %1482 = vmatpush1.bf16.msra.mxu0 %v1979_v39  ;;  %1397 = vmatprep.subr.bf16.mxu1 %v1980_v40  ;;  %v2034_v39 = vld [vmem:[%s2351_s5 + $0x8] ss:$0 sps:$4 sm:$0x77]   ;;  %v202_v40 = vshrl.u32 %v2033_v36, 16  ;;  %v2051_v7 = vld [vmem:[%s2697_s1 + $0x134] ss:$8 sps:$4 sm:$0xff]  }
  0x2d   : > { %1483 = vmatprep.subr.bf16.mxu0 %v1982_v41  ;;  %v204_v41 = vshll.u32 %v2033_v36, 16  ;;  %413 = vst [vmem:[#allocation2] sm:$0xc0] %v411_v38  ;;  %v2043_v6 = vld [vmem:[%s2697_s1 + $0x120] ss:$8 sps:$4 sm:$0xff]  }
  0x2e   : > { %v497_v53 = vld [vmem:[#allocation2 + $0x28] sm:$0xff]  ;;  %v2040_v10 = vld [vmem:[%s2697_s1 + $0x310] ss:$8 sps:$4 sm:$0xff]   ;;  %v2063_v16 = vld [vmem:[%s2697_s1 + $0x154] ss:$8 sps:$4 sm:$0xff]  }
  0x2f   : > { %1398 = vmatpush1.bf16.msra.mxu1 %v1984_v42  ;;  %v280_v42 = vshrl.u32 %v2034_v39, 16  ;;  %1495 = vmatprep.mubr.bf16.mxu0 %v497_v53  ;;  %v2049_v11 = vld [vmem:[%s2697_s1 + $0x130] ss:$8 sps:$4 sm:$0xff]   ;;  %v2057_v12 = vld [vmem:[%s2697_s1 + $0x144] ss:$8 sps:$4 sm:$0xff]  }
  0x30   : > { %1484 = vmatpush1.bf16.msra.mxu0 %v1985_v43  ;;  %1399 = vmatprep.subr.bf16.mxu1 %v1986_v44  ;;  %v283_v43 = vshll.u32 %v2034_v39, 16  ;;  %v2035_v44 = vld [vmem:[%s2351_s5 + $0xc] ss:$0 sps:$4 sm:$0x77]   ;;  %v2046_v14 = vld [vmem:[%s2697_s1 + $0x320] ss:$8 sps:$4 sm:$0xff]  }
  0x31   : > { %1485 = vmatprep.subr.bf16.mxu0 %v1988_v45  ;;  %v2029_v45 = vld [vmem:[%s2697_s1 + $0x304] ss:$8 sps:$4 sm:$0xff]   ;;  %v363_v51 = vshrl.u32 %v2035_v44, 16  ;;  %v366_v52 = vshll.u32 %v2035_v44, 16  ;;  %v2055_v15 = vld [vmem:[%s2697_s1 + $0x140] ss:$8 sps:$4 sm:$0xff]  }
  0x32   : > { %v285_v50 = vrot.slane %v283_v43, 7  ;;  %v2054_v17 = vld [vmem:[%s2697_s1 + $0x334] ss:$8 sps:$4 sm:$0xff]   ;;  %v2052_v18 = vld [vmem:[%s2697_s1 + $0x330] ss:$8 sps:$4 sm:$0xff]  }
  0x33   : > { %1400 = vmatpush1.bf16.msra.mxu1 %v1990_v46  ;;  %v206_v46 = vrot.slane %v204_v41, 1  ;;  %v365_v58 = vrot.slane %v363_v51, 4  ;;  %v2061_v19 = vld [vmem:[%s2697_s1 + $0x150] ss:$8 sps:$4 sm:$0xff]   ;;  %v2060_v21 = vld [vmem:[%s2697_s1 + $0x344] ss:$8 sps:$4 sm:$0xff]  }
  0x34   : > { %1486 = vmatpush1.bf16.msra.mxu0 %v1991_v47  ;;  %1401 = vmatprep.subr.bf16.mxu1 %v1992_v48  ;;  %v2036_v47 = vld [vmem:[%s2351_s5 + $0x10] ss:$0 sps:$4 sm:$0x77]   ;;  %v493_v48 = vld [vmem:[#allocation2 + $0x8] sm:$0xff]  ;;  %v492_v1 = vld [vmem:[#allocation2] sm:$0xff] }
  0x35   : > { %1487 = vmatprep.subr.bf16.mxu0 %v1994_v49  ;;  %v282_v49 = vrot.slane %v280_v42, 6  ;;  %v207_v54 = vor.u32 %v206_v46, %v202_v40  ;;  %1409 = vmatprep.mubr.bf16.mxu1 %v493_v48  ;;  %v2075_v24 = vld [vmem:[%s2697_s1 + $0x174] ss:$8 sps:$4 sm:$0xff]   ;;  %v2064_v26 = vld [vmem:[%s2697_s1 + $0x350] ss:$8 sps:$4 sm:$0xff]  }
  0x36   : > { %v2066_v25 = vld [vmem:[%s2697_s1 + $0x354] ss:$8 sps:$4 sm:$0xff]   ;;  %v2072_v29 = vld [vmem:[%s2697_s1 + $0x364] ss:$8 sps:$4 sm:$0xff]   ;;  %v2070_v30 = vld [vmem:[%s2697_s1 + $0x360] ss:$8 sps:$4 sm:$0xff]  }
  0x37   : > { %1402 = vmatpush1.bf16.msra.mxu1 %v1996_v55  ;;  %v447_v55 = vshrl.u32 %v2036_v47, 16  ;;  %v286_v57 = vor.u32 %v285_v50, %v282_v49  ;;  %209 = vst [vmem:[#allocation2 + $0x20] sm:$0x3] %v207_v54  ;;  %v2079_v31 = vld [vmem:[%s2697_s1 + $0x180] ss:$8 sps:$4 sm:$0xff]  }
  0x38   : > { %1488 = vmatpush1.bf16.msra.mxu0 %v1997_v56  ;;  %1403 = vmatprep.subr.bf16.mxu1 %v1998_v59  ;;  %v450_v56 = vshll.u32 %v2036_v47, 16  ;;  %v368_v59 = vrot.slane %v366_v52, 5  ;;  %v2087_v32 = vld [vmem:[%s2697_s1 + $0x194] ss:$8 sps:$4 sm:$0xff]   ;;  %v2085_v36 = vld [vmem:[%s2697_s1 + $0x190] ss:$8 sps:$4 sm:$0xff]  }
  0x39   : > { %1489 = vmatprep.subr.bf16.mxu0 %v2000_v0  ;;  %v449_v61 = vrot.slane %v447_v55, 2  ;;  %288 = vst [vmem:[#allocation2 + $0x20] sm:$0xc] %v286_v57  ;;  %v2039_v0 = vld [vmem:[%s2697_s1 + $0x114] ss:$8 sps:$4 sm:$0xff]  }
  0x3a   : > { %v452_v62 = vrot.slane %v450_v56, 3  ;;  %v369_v63 = vor.u32 %v368_v59, %v365_v58  ;;  %v2078_v33 = vld [vmem:[%s2697_s1 + $0x374] ss:$8 sps:$4 sm:$0xff]   ;;  %v1675_v38 = vld [vmem:[%s2351_s5 + $0x4] sm:$0x3] }
  0x3b   : > { %1404 = vmatpush1.bf16.msra.mxu1 %v2002_v8  ;;  %v2042_v8 = vld [vmem:[%s2697_s1 + $0x314] ss:$8 sps:$4 sm:$0xff]   ;;  %v2091_v39 = vld [vmem:[%s2697_s1 + $0x1a0] ss:$8 sps:$4 sm:$0xff]   ;;  %196 = vst [vmem:[#allocation2 + $0x18] sm:$0x3] %v1675_v38 }
  0x3c   : > { %1490 = vmatpush1.bf16.msra.mxu0 %v2003_v9  ;;  %1405 = vmatprep.subr.bf16.mxu1 %v2004_v13  ;;  %v453_v2 = vor.u32 %v452_v62, %v449_v61  ;;  %371 = vst [vmem:[#allocation2 + $0x20] sm:$0x30] %v369_v63  ;;  %v2048_v13 = vld [vmem:[%s2697_s1 + $0x324] ss:$8 sps:$4 sm:$0xff]   ;;  %v2082_v41 = vld [vmem:[%s2697_s1 + $0x380] ss:$8 sps:$4 sm:$0xff]  }
  0x3d   : > { %1491 = vmatprep.subr.bf16.mxu0 %v2006_v20  ;;  %v2069_v20 = vld [vmem:[%s2697_s1 + $0x164] ss:$8 sps:$4 sm:$0xff]   ;;  %v2127_v40 = vld [vmem:[%s2351_s5 + $0x8] ss:$0 sps:$4 sm:$0x33]  }
  0x3e   : > { %455 = vst [vmem:[#allocation2 + $0x20] sm:$0xc0] %v453_v2  ;;  %v2099_v42 = vld [vmem:[%s2697_s1 + $0x1b4] ss:$8 sps:$4 sm:$0xff]   ;;  %v2097_v48 = vld [vmem:[%s2697_s1 + $0x1b0] ss:$8 sps:$4 sm:$0xff]  }
  0x3f   : > { %1406 = vmatpush1.bf16.msra.mxu1 %v2008_v22  ;;  %v2058_v22 = vld [vmem:[%s2697_s1 + $0x340] ss:$8 sps:$4 sm:$0xff]   ;;  %v2128_v43 = vld [vmem:[%s2351_s5 + $0xc] ss:$0 sps:$4 sm:$0x33]  }
  0x40   : > { %1492 = vmatpush1.bf16.msra.mxu0 %v2009_v23  ;;  %1407 = vmatprep.subr.bf16.mxu1 %v2010_v27  ;;  %v2067_v23 = vld [vmem:[%s2697_s1 + $0x160] ss:$8 sps:$4 sm:$0xff]   ;;  %v2073_v27 = vld [vmem:[%s2697_s1 + $0x170] ss:$8 sps:$4 sm:$0xff]   ;;  %v2090_v44 = vld [vmem:[%s2697_s1 + $0x394] ss:$8 sps:$4 sm:$0xff]  }
  0x41   : > { %1493 = vmatprep.subr.bf16.mxu0 %v2012_v28  ;;  %v2081_v28 = vld [vmem:[%s2697_s1 + $0x184] ss:$8 sps:$4 sm:$0xff]   ;;  %v2129_v46 = vld [vmem:[%s2351_s5 + $0x10] ss:$0 sps:$4 sm:$0x33]  }
  0x42   : > { %357 = vst [vmem:[#allocation2 + $0x18] sm:$0x30] %v2128_v43  ;;  %v2130_v47 = vld [vmem:[%s2351_s5] ss:$0 sps:$4 sm:$0x66]   ;;  %v439_v49 = vrot.slane %v2129_v46, 2 }
  0x43   : > { %1408 = vmatpush1.bf16.msra.mxu1 %v2014_v34  ;;  %v2076_v34 = vld [vmem:[%s2697_s1 + $0x370] ss:$8 sps:$4 sm:$0xff]   ;;  %v2131_v50 = vld [vmem:[%s2351_s5 + $0x4] ss:$0 sps:$4 sm:$0x66]   ;;  %v191_v53 = vrot.slane %v2130_v47, 1 }
  0x44   : > { %1494 = vmatpush1.bf16.msra.mxu0 %v2015_v35  ;;  %1420 = vmatprep.subr.bf16.mxu1 %v2022_v37  ;;  %v2084_v35 = vld [vmem:[%s2697_s1 + $0x384] ss:$8 sps:$4 sm:$0xff]   ;;  %v2088_v51 = vld [vmem:[%s2697_s1 + $0x390] ss:$8 sps:$4 sm:$0xff]   ;;  %441 = vst [vmem:[#allocation2 + $0x18] sm:$0xc0] %v439_v49 }
  0x45   : > { %1506 = vmatprep.subr.bf16.mxu0 %v2029_v45  ;;  %v496_v9 = vld [vmem:[#allocation2 + $0x20] sm:$0xff]  ;;  %v272_v45 = vrot.slane %v2127_v40, 6  ;;  %v2132_v54 = vld [vmem:[%s2351_s5 + $0x8] ss:$0 sps:$4 sm:$0x66]   ;;  %v265_v56 = vrot.slane %v2131_v50, 7 }
  0x46   : > { %1410 = vmatmul.mubr.bf16.vlgmr.msra.gmra.mrb[0].mxu1 %v492_v1  ;;  %v2093_v37 = vld [vmem:[%s2697_s1 + $0x1a4] ss:$8 sps:$4 sm:$0xff]   ;;  %193 = vst [vmem:[#allocation2 + $0x10] sm:$0x3] %v191_v53  ;;  %v349_v58 = vrot.slane %v2132_v54, 5 }
  0x47   : > { %1421 = vmatpush1.bf16.msra.mxu1 %v2020_v60  ;;  %1496 = vmatmul.mubr.bf16.vlgmr.msra.gmra.mrb[0].mxu0 %v496_v9  ;;  %274 = vst [vmem:[#allocation2 + $0x18] sm:$0xc] %v272_v45  ;;  %v2105_v52 = vld [vmem:[%s2697_s1 + $0x1c4] ss:$8 sps:$4 sm:$0xff]   ;;  %v2103_v60 = vld [vmem:[%s2697_s1 + $0x1c0] ss:$8 sps:$4 sm:$0xff]  }
  0x48   : > { %1422 = vmatprep.subr.bf16.mxu1 %v2039_v0  ;;  %1507 = vmatpush1.bf16.msra.mxu0 %v2027_v5  ;;  %v2096_v55 = vld [vmem:[%s2697_s1 + $0x3a4] ss:$8 sps:$4 sm:$0xff]   ;;  %v2134_v59 = vld [vmem:[%s2351_s5 + $0x8] ss:$0 sps:$4 sm:$0x77]  }
  0x49   : > { %1508 = vmatprep.subr.bf16.mxu0 %v2042_v8  ;;  %v2133_v57 = vld [vmem:[%s2351_s5 + $0xc] ss:$0 sps:$4 sm:$0x66]   ;;  %267 = vst [vmem:[#allocation2 + $0x10] sm:$0xc] %v265_v56  ;;  %v225_v0 = vshrl.u32 %v2134_v59, 16 }
  0x4a   : > { %v432_v61 = vrot.slane %v2133_v57, 3  ;;  %v2135_v62 = vld [vmem:[%s2351_s5 + $0xc] ss:$0 sps:$4 sm:$0x77]   ;;  %v2094_v63 = vld [vmem:[%s2697_s1 + $0x3a0] ss:$8 sps:$4 sm:$0xff]  }
  0x4b   : > { %1423 = vmatpush1.bf16.msra.mxu1 %v2037_v3  ;;  %351 = vst [vmem:[#allocation2 + $0x10] sm:$0x30] %v349_v58  ;;  %v227_v1 = vshll.u32 %v2134_v59, 16  ;;  %v2136_v2 = vld [vmem:[%s2351_s5 + $0x10] ss:$0 sps:$4 sm:$0x77]  }
  0x4c   : > { %1424 = vmatprep.subr.bf16.mxu1 %v2045_v4  ;;  %1509 = vmatpush1.bf16.msra.mxu0 %v2040_v10  ;;  %v2102_v3 = vld [vmem:[%s2697_s1 + $0x3b4] ss:$8 sps:$4 sm:$0xff]   ;;  %434 = vst [vmem:[#allocation2 + $0x10] sm:$0xc0] %v432_v61  ;;  %v309_v5 = vshrl.u32 %v2135_v62, 16  ;;  %v391_v8 = vshrl.u32 %v2136_v2, 16 }
  0x4d   : > { %1510 = vmatprep.subr.bf16.mxu0 %v2048_v13  ;;  %v2111_v4 = vld [vmem:[%s2697_s1 + $0x1d4] ss:$8 sps:$4 sm:$0xff]   ;;  %v394_v9 = vshll.u32 %v2136_v2, 16  ;;  %v2121_v38 = vld [vmem:[%s2697_s1 + $0x1f0] ss:$8 sps:$4 sm:$0xff]   ;;  %v2177_v59 = vmov 0  }
  0x4e   : > { %v2137_v10 = vld [vmem:[%s2351_s5 + $0x14] ss:$0 sps:$4 sm:$0x77]   ;;  %v2120_v40 = vld [vmem:[%s2697_s1 + $0x3e4] ss:$8 sps:$4 sm:$0xff]  }
  0x4f   : > { %1425 = vmatpush1.bf16.msra.mxu1 %v2043_v6  ;;  %v312_v6 = vshll.u32 %v2135_v62, 16  ;;  %v2165_v43 = vld [vmem:[%s2351_s5 + $0x8] ss:$0 sps:$4 sm:$0x66]   ;;  %v2140_v54 = vld [vmem:[%s2697_s1 + $0x404] ss:$8 sps:$4 sm:$0xff]  }
  0x50   : > { %1426 = vmatprep.subr.bf16.mxu1 %v2051_v7  ;;  %1511 = vmatpush1.bf16.msra.mxu0 %v2046_v14  ;;  %v229_v7 = vrot.slane %v227_v1, 1  ;;  %v1680_v14 = vld [vmem:[%s2351_s5 + $0x8] sm:$0x3]  ;;  %v2166_v46 = vld [vmem:[%s2351_s5 + $0xc] ss:$0 sps:$4 sm:$0x66]  }
  0x51   : > { %1512 = vmatprep.subr.bf16.mxu0 %v2054_v17  ;;  %v314_v13 = vrot.slane %v312_v6, 7  ;;  %v495_v17 = vld [vmem:[#allocation2 + $0x18] sm:$0xff]  ;;  %219 = vst [vmem:[#allocation2 + $0x30] sm:$0x3] %v1680_v14  ;;  %v237_v47 = vrot.slane %v2165_v43, 1  ;;  %v322_v49 = vrot.slane %v2166_v46, 7 }
  0x52   : > { %1452 = vmatprep.mubr.bf16.mxu1 %v495_v17  ;;  %v2168_v50 = vld [vmem:[%s2351_s5 + $0x14] ss:$0 sps:$4 sm:$0x66]   ;;  %v2144_v58 = vld [vmem:[%s2697_s1 + $0x410] ss:$8 sps:$4 sm:$0xff]  }
  0x53   : > { %1427 = vmatpush1.bf16.msra.mxu1 %v2049_v11  ;;  %v2109_v11 = vld [vmem:[%s2697_s1 + $0x1d0] ss:$8 sps:$4 sm:$0xff]   ;;  %239 = vst [vmem:[#allocation2 + $0x40] sm:$0x3] %v237_v47  ;;  %324 = vst [vmem:[#allocation2 + $0x40] sm:$0xc] %v322_v49 }
  0x54   : > { %1428 = vmatprep.subr.bf16.mxu1 %v2057_v12  ;;  %1513 = vmatpush1.bf16.msra.mxu0 %v2052_v18  ;;  %v311_v12 = vrot.slane %v309_v5, 6  ;;  %v230_v18 = vor.u32 %v229_v7, %v225_v0  ;;  %v489_v53 = vrot.slane %v2168_v50, 3  ;;  %v2146_v57 = vld [vmem:[%s2697_s1 + $0x414] ss:$8 sps:$4 sm:$0xff]   ;;  %v2147_v61 = vld [vmem:[%s2697_s1 + $0x420] ss:$8 sps:$4 sm:$0xff]  }
  0x55   : > { %1514 = vmatprep.subr.bf16.mxu0 %v2060_v21  ;;  %v476_v21 = vshrl.u32 %v2137_v10, 16  ;;  %v2152_v62 = vld [vmem:[%s2697_s1 + $0x434] ss:$8 sps:$4 sm:$0xff]   ;;  %v2155_v0 = vld [vmem:[%s2697_s1 + $0x444] ss:$8 sps:$4 sm:$0xff]  }
  0x56   : > { %232 = vst [vmem:[#allocation2 + $0x38] sm:$0x3] %v230_v18  ;;  %491 = vst [vmem:[#allocation2 + $0x40] sm:$0xc0] %v489_v53  ;;  %v2153_v1 = vld [vmem:[%s2697_s1 + $0x440] ss:$8 sps:$4 sm:$0xff]  }
  0x57   : > { %1429 = vmatpush1.bf16.msra.mxu1 %v2055_v15  ;;  %v2100_v15 = vld [vmem:[%s2697_s1 + $0x3b0] ss:$8 sps:$4 sm:$0xff]   ;;  %v2158_v2 = vld [vmem:[%s2697_s1 + $0x454] ss:$8 sps:$4 sm:$0xff]   ;;  %v2159_v5 = vld [vmem:[%s2697_s1 + $0x460] ss:$8 sps:$4 sm:$0xff]  }
  0x58   : > { %1430 = vmatprep.subr.bf16.mxu1 %v2063_v16  ;;  %1515 = vmatpush1.bf16.msra.mxu0 %v2058_v22  ;;  %v2117_v16 = vld [vmem:[%s2697_s1 + $0x1e4] ss:$8 sps:$4 sm:$0xff]   ;;  %v2164_v6 = vld [vmem:[%s2697_s1 + $0x474] ss:$8 sps:$4 sm:$0xff]   ;;  %v2162_v7 = vld [vmem:[%s2697_s1 + $0x470] ss:$8 sps:$4 sm:$0xff]  }
  0x59   : > { %1516 = vmatprep.subr.bf16.mxu0 %v2066_v25  ;;  %v2108_v22 = vld [vmem:[%s2697_s1 + $0x3c4] ss:$8 sps:$4 sm:$0xff]  }
  0x5a   : > { %v2141_v25 = vld [vmem:[%s2351_s5 + $0xc] ss:$0 sps:$4 sm:$0x33]  }
  0x5b   : > { %1431 = vmatpush1.bf16.msra.mxu1 %v2061_v19  ;;  %v393_v19 = vrot.slane %v391_v8, 4 }
  0x5c   : > { %1432 = vmatprep.subr.bf16.mxu1 %v2069_v20  ;;  %1517 = vmatpush1.bf16.msra.mxu0 %v2064_v26  ;;  %v396_v20 = vrot.slane %v394_v9, 5 }
  0x5d   : > { %1518 = vmatprep.subr.bf16.mxu0 %v2072_v29 }
  0x5e   : > { %v397_v26 = vor.u32 %v396_v20, %v393_v19 }
  0x5f   : > { %1433 = vmatpush1.bf16.msra.mxu1 %v2067_v23  ;;  %v315_v23 = vor.u32 %v314_v13, %v311_v12  ;;  %v647_v13 = vlaneseq }
  0x60   : > { %1434 = vmatprep.subr.bf16.mxu1 %v2075_v24  ;;  %1519 = vmatpush1.bf16.msra.mxu0 %v2070_v30  ;;  %v479_v24 = vshll.u32 %v2137_v10, 16  ;;  %v301_v30 = vrot.slane %v2141_v25, 6  ;;  %399 = vst [vmem:[#allocation2 + $0x38] sm:$0x30] %v397_v26 }
  0x61   : > { %1520 = vmatprep.subr.bf16.mxu0 %v2078_v33  ;;  %317 = vst [vmem:[#allocation2 + $0x38] sm:$0xc] %v315_v23  ;;  %v2115_v33 = vld [vmem:[%s2697_s1 + $0x1e0] ss:$8 sps:$4 sm:$0xff]   ;;  %v648_v14 = vshrl.u32 %v647_v13, 7 }
  0x62   : > { %v481_v29 = vrot.slane %v479_v24, 3  ;;  %303 = vst [vmem:[#allocation2 + $0x30] sm:$0xc] %v301_v30 }
  0x63   : > { %1435 = vmatpush1.bf16.msra.mxu1 %v2073_v27  ;;  %v478_v27 = vrot.slane %v476_v21, 2  ;;  %v653_v17 = vsub.s32 1, %v648_v14 }
  0x64   : > { %1436 = vmatprep.subr.bf16.mxu1 %v2081_v28  ;;  %1521 = vmatpush1.bf16.msra.mxu0 %v2076_v34  ;;  %v2142_v28 = vld [vmem:[%s2351_s5 + $0x10] ss:$0 sps:$4 sm:$0x33]  }
  0x65   : > { %1522 = vmatprep.subr.bf16.mxu0 %v2084_v35  ;;  %385 = vst [vmem:[#allocation2 + $0x30] sm:$0x30] %v2142_v28  ;;  %v482_v34 = vor.u32 %v481_v29, %v478_v27 }
  0x67   : > { %1437 = vmatpush1.bf16.msra.mxu1 %v2079_v31  ;;  %v2143_v31 = vld [vmem:[%s2351_s5 + $0x14] ss:$0 sps:$4 sm:$0x33]   ;;  %484 = vst [vmem:[#allocation2 + $0x38] sm:$0xc0] %v482_v34 }
  0x68   : > { %1438 = vmatprep.subr.bf16.mxu1 %v2087_v32  ;;  %1523 = vmatpush1.bf16.msra.mxu0 %v2082_v41  ;;  %v2106_v32 = vld [vmem:[%s2697_s1 + $0x3c0] ss:$8 sps:$4 sm:$0xff]   ;;  %v468_v35 = vrot.slane %v2143_v31, 2 }
  0x69   : > { %1524 = vmatprep.subr.bf16.mxu0 %v2090_v44  ;;  %v2118_v41 = vld [vmem:[%s2697_s1 + $0x3e0] ss:$8 sps:$4 sm:$0xff]   ;;  %v2126_v44 = vld [vmem:[%s2697_s1 + $0x3f4] ss:$8 sps:$4 sm:$0xff]  }
  0x6a   : > { %470 = vst [vmem:[#allocation2 + $0x30] sm:$0xc0] %v468_v35 }
  0x6b   : > { %1439 = vmatpush1.bf16.msra.mxu1 %v2085_v36  ;;  %v2123_v36 = vld [vmem:[%s2697_s1 + $0x1f4] ss:$8 sps:$4 sm:$0xff]  }
  0x6c   : > { %1440 = vmatprep.subr.bf16.mxu1 %v2093_v37  ;;  %1525 = vmatpush1.bf16.msra.mxu0 %v2088_v51  ;;  %v2114_v37 = vld [vmem:[%s2697_s1 + $0x3d4] ss:$8 sps:$4 sm:$0xff]  }
  0x6d   : > { %1526 = vmatprep.subr.bf16.mxu0 %v2096_v55  ;;  %v2138_v55 = vld [vmem:[%s2697_s1 + $0x400] ss:$8 sps:$4 sm:$0xff]  }
  0x6e   : > { %v499_v45 = vld [vmem:[#allocation2 + $0x38] sm:$0xff] }
  0x6f   : > { %1441 = vmatpush1.bf16.msra.mxu1 %v2091_v39  ;;  %v2112_v39 = vld [vmem:[%s2697_s1 + $0x3d0] ss:$8 sps:$4 sm:$0xff]   ;;  %1538 = vmatprep.mubr.bf16.mxu0 %v499_v45 }
  0x70   : > { %1442 = vmatprep.subr.bf16.mxu1 %v2099_v42  ;;  %1527 = vmatpush1.bf16.msra.mxu0 %v2094_v63  ;;  %v494_v42 = vld [vmem:[#allocation2 + $0x10] sm:$0xff] }
  0x71   : > { %1528 = vmatprep.subr.bf16.mxu0 %v2102_v3  ;;  %v498_v56 = vld [vmem:[#allocation2 + $0x30] sm:$0xff] }
  0x72   : > { %v2150_v63 = vld [vmem:[%s2697_s1 + $0x430] ss:$8 sps:$4 sm:$0xff]  }
  0x73   : > { %1443 = vmatpush1.bf16.msra.mxu1 %v2097_v48  ;;  %v2167_v48 = vld [vmem:[%s2351_s5 + $0x10] ss:$0 sps:$4 sm:$0x66]  }
  0x74   : > { %1444 = vmatprep.subr.bf16.mxu1 %v2105_v52  ;;  %1529 = vmatpush1.bf16.msra.mxu0 %v2100_v15  ;;  %v404_v51 = vrot.slane %v2167_v48, 5  ;;  %v2124_v52 = vld [vmem:[%s2697_s1 + $0x3f0] ss:$8 sps:$4 sm:$0xff]   ;;  %v649_v15 = vsub.s32 0, %v648_v14 }
  0x75   : > { %1530 = vmatprep.subr.bf16.mxu0 %v2108_v22  ;;  %v2156_v3 = vld [vmem:[%s2697_s1 + $0x450] ss:$8 sps:$4 sm:$0xff]  }
  0x76   : > { %406 = vst [vmem:[#allocation2 + $0x40] sm:$0x30] %v404_v51 }
  0x77   : > { %1445 = vmatpush1.bf16.msra.mxu1 %v2103_v60  ;;  %v2149_v60 = vld [vmem:[%s2697_s1 + $0x424] ss:$8 sps:$4 sm:$0xff]  }
  0x78   : > { %1446 = vmatprep.subr.bf16.mxu1 %v2111_v4  ;;  %1531 = vmatpush1.bf16.msra.mxu0 %v2106_v32  ;;  %v2161_v4 = vld [vmem:[%s2697_s1 + $0x464] ss:$8 sps:$4 sm:$0xff]  }
  0x79   : > { %1532 = vmatprep.subr.bf16.mxu0 %v2114_v37 }
  0x7b   : > { %1447 = vmatpush1.bf16.msra.mxu1 %v2109_v11 }
  0x7c   : > { %1448 = vmatprep.subr.bf16.mxu1 %v2117_v16  ;;  %1533 = vmatpush1.bf16.msra.mxu0 %v2112_v39  ;;  %v645_v16 = vld [vmem:[%s2698_s2] sm:$0x3] }
  0x7d   : > { %1534 = vmatprep.subr.bf16.mxu0 %v2120_v40  ;;  %v500_v8 = vld [vmem:[#allocation2 + $0x40] sm:$0xff]  ;;  %v650_v18 = vrot.slane %v645_v16, %v649_v15  ;;  %v654_v19 = vrot.slane %v645_v16, %v653_v17 }
  0x7f   : > { %1449 = vmatpush1.bf16.msra.mxu1 %v2115_v33 }
  0x80   : > { %1450 = vmatprep.subr.bf16.mxu1 %v2123_v36  ;;  %1535 = vmatpush1.bf16.msra.mxu0 %v2118_v41 }
  0x81   : > { %1536 = vmatprep.subr.bf16.mxu0 %v2126_v44 }
  0x83   : > { %1451 = vmatpush1.bf16.msra.mxu1 %v2121_v38 }
  0x84   : > { %1537 = vmatpush1.bf16.msra.mxu0 %v2124_v52 }
  0x85   : > { %1549 = vmatprep.subr.bf16.mxu0 %v2140_v54 }
  0x86   : > { %1453 = vmatmul.mubr.bf16.vlgmr.msra.gmra.mrb[0].mxu1 %v494_v42 }
  0x87   : > { %1539 = vmatmul.mubr.bf16.vlgmr.msra.gmra.mrb[0].mxu0 %v498_v56 }
  0x88   : > { %1550 = vmatpush1.bf16.msra.mxu0 %v2138_v55  ;;  %1581 = vmatprep.mubr.bf16.mxu0 %v2177_v59 }
  0x89   : > { %1551 = vmatprep.subr.bf16.mxu0 %v2146_v57 }
  0x8c   : > { %1552 = vmatpush1.bf16.msra.mxu0 %v2144_v58 }
  0x8d   : > { %1553 = vmatprep.subr.bf16.mxu0 %v2149_v60 }
  0x90   : > { %1554 = vmatpush1.bf16.msra.mxu0 %v2147_v61 }
  0x91   : > { %1555 = vmatprep.subr.bf16.mxu0 %v2152_v62 }
  0x94   : > { %1556 = vmatpush1.bf16.msra.mxu0 %v2150_v63 }
  0x95   : > { %1557 = vmatprep.subr.bf16.mxu0 %v2155_v0 }
  0x98   : > { %1558 = vmatpush1.bf16.msra.mxu0 %v2153_v1 }
  0x99   : > { %1559 = vmatprep.subr.bf16.mxu0 %v2158_v2 }
  0x9c   : > { %1560 = vmatpush1.bf16.msra.mxu0 %v2156_v3 }
  0x9d   : > { %1561 = vmatprep.subr.bf16.mxu0 %v2161_v4 }
  0xa0   : > { %1562 = vmatpush1.bf16.msra.mxu0 %v2159_v5 }
  0xa1   : > { %1563 = vmatprep.subr.bf16.mxu0 %v2164_v6 }
  0xa4   : > { %1564 = vmatpush1.bf16.msra.mxu0 %v2162_v7 }
  0xa7   : > { %1582 = vmatmul.mubr.bf16.vlgmr.msra.gmra.mrb[0].mxu0 %v500_v8 }
 0x159   : > { %v1454_v9 = vpop.f32.mrb[0].mxu1 }
 0x15a   : > { %v1456_v10 = vpop.f32.mrb[1].mxu1  ;;  %v1890_v20 = vadd.f32 %v1454_v9, %v650_v18 }
 0x15b   : > { %v1458_v11 = vpop.f32.mrb[2].mxu1  ;;  %v1892_v21 = vadd.f32 %v1456_v10, %v654_v19 }
 0x15c   : > { %v1460_v12 = vpop.f32.mrb[3].mxu1  ;;  %v1894_v23 = vadd.f32 %v1458_v11, %v650_v18 }
 0x15d   : > { %v1896_v26 = vadd.f32 %v1460_v12, %v654_v19 }
 0x17a   : > { %v1583_v22 = vpop.f32.mrb[0].mxu0 }
 0x17b   : > { %v1891_v24 = vadd.f32 %v1890_v20, %v1583_v22  ;;  %v1585_v25 = vpop.f32.mrb[1].mxu0 }
 0x17c   : > { %v1893_v27 = vadd.f32 %v1892_v21, %v1585_v25  ;;  %v1587_v28 = vpop.f32.mrb[2].mxu0 }
 0x17d   : > { %v1592_v29 = vmax.f32 %v1891_v24, 0.0  ;;  %v1895_v30 = vadd.f32 %v1894_v23, %v1587_v28  ;;  %v1589_v31 = vpop.f32.mrb[3].mxu0 }
 0x17e   : > { %v1593_v32 = vmax.f32 %v1893_v27, 0.0  ;;  %v1897_v33 = vadd.f32 %v1896_v26, %v1589_v31 }
 0x17f   : > { %v1594_v34 = vmax.f32 %v1895_v30, 0.0 }
 0x180   : > { %v1888_v35 = vpack.c.bf16 %v1593_v32, %v1592_v29  ;;  %v1595_v36 = vmax.f32 %v1897_v33, 0.0 }
 0x182   : > { %1608 = vst [vmem:[%s170_s17] sm:$0xff] %v1888_v35  ;;  %v1889_v37 = vpack.c.bf16 %v1595_v36, %v1594_v34 }
 0x184   : > { %1609 = vst [vmem:[%s170_s17 + $0x8] sm:$0xff] %v1889_v37 }
 0x185 PF: > { %s13_s12 = sadd.s32 1, %s2175_s12  }
 0x186   : > { %p10_p4 = scmp.ge.s32.totalorder %s13_s12, 4  }
 0x188   :  { %12 = sbr.rel (!%p10_p4) target bundleno = 1 (0x1), region = 67 }

// kernel: generator_forward.7
= control target key start
LH: loop header
LB: loop body
LE: loop exit
PB: predicated region body
PF: predicated region fallthrough
CT: control target
= control target key end

     0   :  { %s2090_s12 = smov 0   ;;  %s2423_s0 = inlined_call_operand.vmem [shape: bf16[2,10,10,64], index: 0, kind: input, shape index: {}]   ;;  %s2424_s1 = inlined_call_operand.vmem [shape: bf16[576,4], index: 1, kind: input, shape index: {}]   ;;  %s2425_s2 = inlined_call_operand.vmem [shape: f32[1,4], index: 2, kind: input, shape index: {}]   ;;  %s2426_s3 = inlined_call_operand.vmem [shape: f32[2,64,4], index: 3, kind: output, shape index: {}]  }
   0x1 LB: > { %s1592_s13 = sadd.s32 4294967295, %s2067_s12   ;;  %p1596_p0 = scmp.ge.s32.totalorder %s2067_s12, 1  ;;  %s2067_s12 = sphi %s2090_s12, %s13_s12  }
   0x2   : > { %p137_p1 = scmp.lt.s32.totalorder %s2067_s12, 3 }
   0x4   : > { %p138_p2 = pnand %p1596_p0, %p137_p1 }
   0x5   : > { %p161_p3 = scmp.lt.s32.totalorder (!%p138_p2), %s1592_s13, 1  ;;  %v1977_v0 = vld [vmem:[%s2424_s1 + $0xc0] sm:$0xff] (!%p138_p2)   ;;  %v1981_v4 = vld [vmem:[%s2424_s1 + $0xc8] sm:$0xff] (!%p138_p2)   ;;  %s2069_s30 = smov (!%p138_p2), 64   ;;  %v1985_v26 = vld [vmem:[%s2424_s1 + $0xd0] sm:$0xff] (!%p138_p2)   ;;  %vm277_vm0 = vcmask (!%p138_p2), 523268  }
   0x6   : > { %141 = sbr.rel (%p138_p2) target bundleno = 443 (0x1bb), region = 32  ;;  %v1978_v1 = vld [vmem:[%s2424_s1 + $0x80] sm:$0xff] (!%p138_p2)   ;;  %1863 = vmatprep.subr.bf16.mxu1 (!%p138_p2), %v1977_v0  ;;  %v1982_v5 = vld [vmem:[%s2424_s1 + $0x88] sm:$0xff] (!%p138_p2)   ;;  %v1986_v34 = vld [vmem:[%s2424_s1 + $0x90] sm:$0xff] (!%p138_p2)   ;;  %vm173_vm1 = vcmask (!%p138_p2), 519168   ;;  %vm297_vm2 = vcmask (!%p138_p2), 1048068  }
   0x7   : > { %v1979_v2 = vld [vmem:[%s2424_s1 + $0x40] sm:$0xff] (!%p138_p2)   ;;  %1864 = vmatpush3.bf16.msra.mxu1 (!%p138_p2), %v1978_v1  ;;  %v1983_v12 = vld [vmem:[%s2424_s1 + $0x48] sm:$0xff] (!%p138_p2)   ;;  %v1989_v41 = vld [vmem:[%s2424_s1 + $0x50] sm:$0xff] (!%p138_p2)   ;;  %vm192_vm3 = vcmask (!%p138_p2), 1043968   ;;  %vm1312_vm4 = vcmask (!%p138_p2), 523264   ;;  %vm1528_vm5 = vcmask (!%p138_p2), 31744  }
   0x8   : > { %v1980_v3 = vld [vmem:[%s2424_s1] sm:$0xff] (!%p138_p2)   ;;  %1823 = vmatprep.subr.bf16.mxu0 (!%p138_p2), %v1979_v2  ;;  %1865 = vmatprep.subr.bf16.mxu1 (!%p138_p2), %v1981_v4  ;;  %v1984_v15 = vld [vmem:[%s2424_s1 + $0x8] sm:$0xff] (!%p138_p2)   ;;  %v1990_v52 = vld [vmem:[%s2424_s1 + $0x10] sm:$0xff] (!%p138_p2)  }
   0x9   : > { %1824 = vmatpush3.bf16.msra.mxu0 (!%p138_p2), %v1980_v3  ;;  %v1991_v59 = vld [vmem:[%s2424_s1 + $0xd8] sm:$0xff] (!%p138_p2)  }
   0xa   : > { %1825 = vmatprep.subr.bf16.mxu0 (!%p138_p2), %v1983_v12  ;;  %v1992_v0 = vld [vmem:[%s2424_s1 + $0x98] sm:$0xff] (!%p138_p2)  }
   0xb   : > { %1866 = vmatpush3.bf16.msra.mxu1 (!%p138_p2), %v1982_v5  ;;  %v1995_v3 = vld [vmem:[%s2424_s1 + $0x58] sm:$0xff] (!%p138_p2)  }
   0xc   : > { %1867 = vmatprep.subr.bf16.mxu1 (!%p138_p2), %v1985_v26 }
   0xd   : > { %s2428_s13 = smov (!%p161_p3, %s1592_s13), 1  ;;  %1826 = vmatpush3.bf16.msra.mxu0 %v1984_v15 }
   0xe   : > { %s1935_s20 = smul.u32 80, %s2428_s13  ;;  %1827 = vmatprep.subr.bf16.mxu0 %v1989_v41 }
   0xf   : > { %1868 = vmatpush3.bf16.msra.mxu1 %v1986_v34 }
  0x10   : > { %s2119_s27 = scalar_lea.vmem %s2423_s0, %s1935_s20  ;;  %1869 = vmatprep.subr.bf16.mxu1 %v1991_v59  ;;  %s1822_s20 = sshll.u32 %s2428_s13, 6 }
  0x11   : > { %v1945_v6 = vld [vmem:[%s2119_s27 + $0x10] ss:$0 sps:$4 sm:$0xff]   ;;  %v1946_v7 = vld [vmem:[%s2119_s27 + $0x8] ss:$0 sps:$4 sm:$0xff]   ;;  %v1947_v8 = vld [vmem:[%s2119_s27 + $0x8] sm:$0x1e]   ;;  %1828 = vmatpush3.bf16.msra.mxu0 %v1990_v52  ;;  %s170_s23 = scalar_lea.vmem %s2426_s3, %s1822_s20 }
  0x12   : > { %313 = vrot.lane.b32.xlu1 %v1945_v6, %s2069_s30  ;;  %v1948_v9 = vld [vmem:[%s2119_s27 + $0x18] ss:$0 sps:$4 sm:$0xff]   ;;  %209 = vrot.lane.b32.xlu0 %v1946_v7, %s2069_s30  ;;  %v1949_v10 = vld [vmem:[%s2119_s27 + $0x10] sm:$0x1e]   ;;  %v236_v11 = vrot.slane %v1947_v8, 1 }
  0x13   : > { %v341_v13 = vrot.slane %v1949_v10, 5  ;;  %v1950_v14 = vld [vmem:[%s2119_s27 + $0x10] sm:$0x1f]   ;;  %v1951_v16 = vld [vmem:[%s2119_s27 + $0x18] sm:$0x1f]   ;;  %1870 = vmatpush3.bf16.msra.mxu1 %v1992_v0  ;;  %1829 = vmatprep.subr.bf16.mxu0 %v1995_v3 }
  0x14   : > { %v252_v17 = vshrl.u32 %v1950_v14, 16  ;;  %v254_v18 = vshll.u32 %v1950_v14, 16  ;;  %v1952_v19 = vld [vmem:[%s2119_s27] sm:$0x1f]   ;;  %v361_v20 = vshrl.u32 %v1951_v16, 16  ;;  %v364_v21 = vshll.u32 %v1951_v16, 16 }
  0x15   : > { %v183_v23 = vshrl.u32 %v1952_v19, 16  ;;  %v185_v24 = vshll.u32 %v1952_v19, 16  ;;  %v1953_v25 = vld [vmem:[%s2119_s27 + $0x20] sm:$0x1f]   ;;  %v1954_v33 = vld [vmem:[%s2119_s27 + $0x8] sm:$0x1f]  }
  0x16   : > { %237 = vrot.lane.b32.xlu1 %v236_v11, %s2069_s30  ;;  %416 = vrot.lane.b32.xlu0 %v1948_v9, %s2069_s30  ;;  %v256_v22 = vrot.slane %v254_v18, 1  ;;  %v363_v27 = vrot.slane %v361_v20, 4  ;;  %v366_v28 = vrot.slane %v364_v21, 5  ;;  %v459_v31 = vshrl.u32 %v1953_v25, 16  ;;  %v1955_v36 = vld [vmem:[%s2119_s27 + $0x28] sm:$0x1f]  }
  0x17   : > { %v187_v30 = vrot.slane %v185_v24, 1  ;;  %v461_v32 = vshll.u32 %v1953_v25, 16  ;;  %v287_v39 = vshrl.u32 %v1954_v33, 16  ;;  %v290_v40 = vshll.u32 %v1954_v33, 16  ;;  %v1957_v49 = vld [vmem:[%s2119_s27 + $0x18] sm:$0x1e]  }
  0x18   : > { %v257_v29 = vor.u32 %v256_v22, %v252_v17  ;;  %v367_v35 = vor.u32 %v366_v28, %v363_v27  ;;  %v566_v42 = vshrl.u32 %v1955_v36, 16  ;;  %v569_v43 = vshll.u32 %v1955_v36, 16  ;;  %v1958_v51 = vld [vmem:[%s2119_s27 + $0x10] sm:$0x1f]   ;;  %v1959_v54 = vld [vmem:[%s2119_s27 + $0x20] sm:$0x1e]  }
  0x19   : > { %v188_v37 = vor.u32 %v187_v30, %v183_v23  ;;  %v463_v38 = vrot.slane %v461_v32, 1  ;;  %v289_v45 = vrot.slane %v287_v39, 4  ;;  %v292_v46 = vrot.slane %v290_v40, 5  ;;  %v1956_v55 = vld [vmem:[%s2119_s27 + $0x20] ss:$0 sps:$4 sm:$0xff]   ;;  %v1996_v6 = vld [vmem:[%s2424_s1 + $0x18] sm:$0xff]  }
  0x1a   : > { %342 = vrot.lane.b32.xlu1 %v341_v13, %s2069_s30  ;;  %258 = vrot.lane.b32.xlu0 %v257_v29, %s2069_s30  ;;  %v568_v47 = vrot.slane %v566_v42, 4  ;;  %v571_v48 = vrot.slane %v569_v43, 5  ;;  %v394_v56 = vshll.u32 %v1958_v51, 16  ;;  %v1960_v57 = vld [vmem:[%s2119_s27 + $0x18] sm:$0x1f]   ;;  %v392_v58 = vshrl.u32 %v1958_v51, 16 }
  0x1b   : > { %v464_v44 = vor.u32 %v463_v38, %v459_v31  ;;  %v293_v50 = vor.u32 %v292_v46, %v289_v45  ;;  %v493_v61 = vshrl.u32 %v1960_v57, 16  ;;  %v496_v62 = vshll.u32 %v1960_v57, 16  ;;  %v1961_v63 = vld [vmem:[%s2119_s27 + $0x30] sm:$0x1f]   ;;  %v1963_v5 = vld [vmem:[%s2119_s27 + $0x38] sm:$0x1f]   ;;  %1830 = vmatpush3.bf16.msra.mxu0 %v1996_v6 }
  0x1c   : > { %v572_v53 = vor.u32 %v571_v48, %v568_v47  ;;  %v396_v60 = vrot.slane %v394_v56, 1  ;;  %v443_v1 = vrot.slane %v1957_v49, 1  ;;  %v546_v2 = vrot.slane %v1959_v54, 5  ;;  %v1997_v14 = vld [vmem:[%s2424_s1 + $0xe0] sm:$0xff]   ;;  %v1965_v17 = vld [vmem:[%s2119_s27 + $0x28] sm:$0x1e]  }
  0x1d   : > { %v666_v4 = vshll.u32 %v1961_v63, 16  ;;  %v495_v8 = vrot.slane %v493_v61, 4  ;;  %v498_v9 = vrot.slane %v496_v62, 5  ;;  %v664_v10 = vshrl.u32 %v1961_v63, 16  ;;  %v1966_v15 = vld [vmem:[%s2119_s27 + $0x20] sm:$0x1f]   ;;  %1871 = vmatprep.subr.bf16.mxu1 %v1997_v14 }
  0x1e   : > { %368 = vrot.lane.b32.xlu1 %v367_v35, %s2069_s30  ;;  %189 = vrot.lane.b32.xlu0 %v188_v37, %s2069_s30  ;;  %v397_v7 = vor.u32 %v396_v60, %v392_v58  ;;  %v771_v12 = vshrl.u32 %v1963_v5, 16  ;;  %v774_v13 = vshll.u32 %v1963_v5, 16  ;;  %v1998_v18 = vld [vmem:[%s2424_s1 + $0xa0] sm:$0xff]   ;;  %v599_v21 = vshll.u32 %v1966_v15, 16  ;;  %v1967_v22 = vld [vmem:[%s2119_s27 + $0x30] sm:$0x1e]  }
  0x1f   : > { %v668_v11 = vrot.slane %v666_v4, 1  ;;  %v499_v19 = vor.u32 %v498_v9, %v495_v8  ;;  %v1968_v24 = vld [vmem:[%s2119_s27 + $0x28] sm:$0x1f]   ;;  %1872 = vmatpush3.bf16.msra.mxu1 %v1998_v18  ;;  %v1969_v28 = vld [vmem:[%s2119_s27 + $0x40] sm:$0x1f]   ;;  %v648_v30 = vrot.slane %v1965_v17, 1 }
  0x20   : > { %v773_v16 = vrot.slane %v771_v12, 4  ;;  %v776_v20 = vrot.slane %v774_v13, 5  ;;  %v1962_v25 = vld [vmem:[%s2119_s27 + $0x28] ss:$0 sps:$4 sm:$0xff]   ;;  %v698_v26 = vshrl.u32 %v1968_v24, 16  ;;  %v701_v27 = vshll.u32 %v1968_v24, 16 }
  0x21   : > { %v669_v23 = vor.u32 %v668_v11, %v664_v10  ;;  %v597_v31 = vshrl.u32 %v1966_v15, 16  ;;  %v601_v32 = vrot.slane %v599_v21, 1  ;;  %v751_v33 = vrot.slane %v1967_v22, 5  ;;  %v1971_v36 = vld [vmem:[%s2119_s27 + $0x48] sm:$0x1f]   ;;  %v2000_v43 = vld [vmem:[%s2424_s1 + $0x60] sm:$0xff]  }
  0x22   : > { %465 = vrot.lane.b32.xlu1 %v464_v44, %s2069_s30  ;;  %294 = vrot.lane.b32.xlu0 %v293_v50, %s2069_s30  ;;  %v777_v29 = vor.u32 %v776_v20, %v773_v16  ;;  %v700_v34 = vrot.slane %v698_v26, 4  ;;  %v871_v35 = vshll.u32 %v1969_v28, 16  ;;  %v1964_v37 = vld [vmem:[%s2119_s27 + $0x30] ss:$0 sps:$4 sm:$0xff]   ;;  %v703_v38 = vrot.slane %v701_v27, 5  ;;  %v2001_v50 = vld [vmem:[%s2424_s1 + $0x20] sm:$0xff]  }
  0x23   : > { %v869_v39 = vshrl.u32 %v1969_v28, 16  ;;  %v976_v41 = vshrl.u32 %v1971_v36, 16  ;;  %v979_v42 = vshll.u32 %v1971_v36, 16  ;;  %v2208_v44 = vld [vmem:[%s2119_s27 + $0x38] sm:$0x1e]   ;;  %1831 = vmatprep.subr.bf16.mxu0 %v2000_v43  ;;  %v2002_v56 = vld [vmem:[%s2424_s1 + $0xe8] sm:$0xff]  }
  0x24   : > { %v873_v40 = vrot.slane %v871_v35, 1  ;;  %v1974_v47 = vld [vmem:[%s2119_s27 + $0x30] sm:$0x1f]   ;;  %v853_v48 = vrot.slane %v2208_v44, 1  ;;  %v2214_v49 = vld [vmem:[%s2119_s27 + $0x40] sm:$0x1e]   ;;  %1832 = vmatpush3.bf16.msra.mxu0 %v2001_v50  ;;  %1873 = vmatprep.subr.bf16.mxu1 %v2002_v56  ;;  %v704_v61 = vor.u32 %v703_v38, %v700_v34 }
  0x25   : > { %v978_v45 = vrot.slane %v976_v41, 4  ;;  %v981_v46 = vrot.slane %v979_v42, 5  ;;  %v802_v51 = vshrl.u32 %v1974_v47, 16  ;;  %v804_v52 = vshll.u32 %v1974_v47, 16  ;;  %v2003_v58 = vld [vmem:[%s2424_s1 + $0xa8] sm:$0xff]   ;;  %v2007_v15 = vld [vmem:[%s2424_s1 + $0xf0] sm:$0xff]  }
  0x26   : > { %573 = vrot.lane.b32.xlu1 %v572_v53, %s2069_s30  ;;  %518 = vrot.lane.b32.xlu0 %v1956_v55, %s2069_s30  ;;  %v602_v53 = vor.u32 %v601_v32, %v597_v31  ;;  %v956_v54 = vrot.slane %v2214_v49, 5  ;;  %v1976_v55 = vld [vmem:[%s2119_s27 + $0x38] sm:$0x1f]   ;;  %v1987_v0 = vld [vmem:[%s2119_s27 + $0x8] sm:$0x1e]  }
  0x27   : > { %v806_v57 = vrot.slane %v804_v52, 1  ;;  %v903_v59 = vshrl.u32 %v1976_v55, 16  ;;  %v906_v60 = vshll.u32 %v1976_v55, 16  ;;  %1874 = vmatpush3.bf16.msra.mxu1 %v2003_v58  ;;  %v1970_v3 = vld [vmem:[%s2119_s27 + $0x38] ss:$0 sps:$4 sm:$0xff]   ;;  %v306_v4 = vrot.slane %v1987_v0, 5 }
  0x28   : > { %v2005_v5 = vld [vmem:[%s2424_s1 + $0x68] sm:$0xff]   ;;  %v982_v8 = vor.u32 %v981_v46, %v978_v45  ;;  %v1972_v10 = vld [vmem:[%s2119_s27 + $0x40] ss:$0 sps:$4 sm:$0xff]   ;;  %v1994_v11 = vld [vmem:[%s2119_s27 + $0x10] sm:$0x1e]   ;;  %1875 = vmatprep.subr.bf16.mxu1 %v2007_v15 }
  0x29   : > { %v905_v62 = vrot.slane %v903_v59, 4  ;;  %v908_v63 = vrot.slane %v906_v60, 5  ;;  %308 = vst.msk [vmem:[#allocation2 + $0x8] sm:$0xf0] %vm277_vm0, %v306_v4  ;;  %1833 = vmatprep.subr.bf16.mxu0 %v2005_v5  ;;  %v1993_v9 = vld [vmem:[%s2119_s27 + $0x8] sm:$0x1f]   ;;  %v807_v21 = vor.u32 %v806_v57, %v802_v51 }
  0x2a   : > { %444 = vrot.lane.b32.xlu1 %v443_v1, %s2069_s30  ;;  %398 = vrot.lane.b32.xlu0 %v397_v7, %s2069_s30  ;;  %v874_v1 = vor.u32 %v873_v40, %v869_v39  ;;  %v2006_v7 = vld [vmem:[%s2424_s1 + $0x28] sm:$0xff]   ;;  %v221_v12 = vshrl.u32 %v1993_v9, 16  ;;  %v223_v13 = vshll.u32 %v1993_v9, 16  ;;  %v409_v14 = vrot.slane %v1994_v11, 1  ;;  %v2008_v17 = vld [vmem:[%s2424_s1 + $0xb0] sm:$0xff]  }
  0x2b   : > { %1834 = vmatpush3.bf16.msra.mxu0 %v2006_v7  ;;  %v1610_v20 = vld [vmem:[%s2119_s27 + $0x10] sm:$0xf]  ;;  %1876 = vmatpush3.bf16.msra.mxu1 %v2008_v17  ;;  %v2004_v26 = vld [vmem:[%s2119_s27 + $0x18] ss:$0 sps:$4 sm:$0xff]   ;;  %v909_v27 = vor.u32 %v908_v63, %v905_v62  ;;  %v172_v28 = vld [vmem:[%s2119_s27] sm:$0xf] }
  0x2c   : > { %v225_v16 = vrot.slane %v223_v13, 1  ;;  %411 = vst.msk [vmem:[#allocation2 + $0x30] sm:$0xf] %vm173_vm1, %v409_v14  ;;  %243 = vst.msk [vmem:[#allocation2 + $0x18] sm:$0xf] %vm173_vm1, %v1610_v20  ;;  %v2010_v32 = vld [vmem:[%s2424_s1 + $0x70] sm:$0xff]  }
  0x2d   : > { %352 = vst.msk [vmem:[#allocation2 + $0x18] sm:$0xf0] %vm277_vm0, %v2004_v26  ;;  %v2009_v31 = vld [vmem:[%s2119_s27 + $0x8] ss:$0 sps:$4 sm:$0xff]   ;;  %1835 = vmatprep.subr.bf16.mxu0 %v2010_v32  ;;  %v2012_v34 = vld [vmem:[%s2424_s1 + $0xf8] sm:$0xff]   ;;  %v2308_v52 = vld [vmem:[%s2424_s1 + $0x100] sm:$0xff]  }
  0x2e   : > { %547 = vrot.lane.b32.xlu1 %v546_v2, %s2069_s30  ;;  %500 = vrot.lane.b32.xlu0 %v499_v19, %s2069_s30  ;;  %v1988_v2 = vld [vmem:[%s2119_s27] sm:$0x1e]   ;;  %v226_v18 = vor.u32 %v225_v16, %v221_v12  ;;  %v1999_v19 = vld [vmem:[%s2119_s27 + $0x10] sm:$0x1f]   ;;  %174 = vst.msk [vmem:[#allocation2] sm:$0xf] %vm173_vm1, %v172_v28 }
  0x2f   : > { %v201_v6 = vrot.slane %v1988_v2, 1  ;;  %v325_v22 = vshrl.u32 %v1999_v19, 16  ;;  %278 = vst.msk [vmem:[#allocation2] sm:$0xf0] %vm277_vm0, %v2009_v31  ;;  %v2013_v35 = vld [vmem:[%s2424_s1 + $0xb8] sm:$0xff]   ;;  %1877 = vmatprep.subr.bf16.mxu1 %v2012_v34 }
  0x30   : > { %228 = vst.msk [vmem:[#allocation2 + $0x10] sm:$0xf] %vm173_vm1, %v226_v18  ;;  %v2014_v36 = vld [vmem:[%s2119_s27 + $0x28] ss:$0 sps:$4 sm:$0xff]   ;;  %1878 = vmatpush3.bf16.msra.mxu1 %v2013_v35  ;;  %v2016_v38 = vld [vmem:[%s2424_s1 + $0x78] sm:$0xff]  }
  0x31   : > { %203 = vst.msk [vmem:[#allocation2 + $0x8] sm:$0xf] %vm173_vm1, %v201_v6  ;;  %v327_v24 = vrot.slane %v325_v22, 4  ;;  %v2017_v40 = vld [vmem:[%s2424_s1 + $0x38] sm:$0xff]   ;;  %v1641_v42 = vld [vmem:[%s2119_s27 + $0x10] sm:$0xf]  ;;  %1927 = vmatprep.subr.bf16.mxu1 %v2308_v52 }
  0x32   : > { %670 = vrot.lane.b32.xlu1 %v669_v23, %s2069_s30  ;;  %621 = vrot.lane.b32.xlu0 %v1962_v25, %s2069_s30  ;;  %v328_v23 = vshll.u32 %v1999_v19, 16  ;;  %557 = vst.msk [vmem:[#allocation2 + $0x40] sm:$0xf0] %vm277_vm0, %v2014_v36  ;;  %v2018_v41 = vld [vmem:[%s2119_s27 + $0x18] sm:$0x1f]  }
  0x33   : > { %383 = vst.msk [vmem:[#allocation2 + $0x28] sm:$0xf] %vm173_vm1, %v1641_v42  ;;  %v2019_v43 = vld [vmem:[%s2119_s27 + $0x20] sm:$0x1f]   ;;  %v428_v44 = vshrl.u32 %v2018_v41, 16  ;;  %v430_v45 = vshll.u32 %v2018_v41, 16 }
  0x34   : > { %v330_v25 = vrot.slane %v328_v23, 5  ;;  %v2020_v46 = vld [vmem:[%s2119_s27 + $0x18] ss:$0 sps:$4 sm:$0xff]   ;;  %v530_v47 = vshrl.u32 %v2019_v43, 16  ;;  %v1702_v49 = vld [vmem:[%s2119_s27 + $0x30] sm:$0xf] }
  0x35   : > { %v432_v50 = vrot.slane %v430_v45, 1  ;;  %484 = vst.msk [vmem:[#allocation2 + $0x28] sm:$0xf0] %vm277_vm0, %v2020_v46  ;;  %v2021_v51 = vld [vmem:[%s2119_s27 + $0x20] sm:$0x1e]  }
  0x36   : > { %778 = vrot.lane.b32.xlu1 %v777_v29, %s2069_s30  ;;  %723 = vrot.lane.b32.xlu0 %v1964_v37, %s2069_s30  ;;  %v331_v29 = vor.u32 %v330_v25, %v327_v24  ;;  %v2015_v37 = vld [vmem:[%s2119_s27 + $0x18] sm:$0x1e]   ;;  %655 = vst.msk [vmem:[#allocation2 + $0x68] sm:$0xf] %vm173_vm1, %v1702_v49  ;;  %v2022_v55 = vld [vmem:[%s2119_s27 + $0x38] ss:$0 sps:$4 sm:$0xff]  }
  0x37   : > { %v511_v39 = vrot.slane %v2015_v37, 5  ;;  %v433_v56 = vor.u32 %v432_v50, %v428_v44  ;;  %v614_v57 = vrot.slane %v2021_v51, 1  ;;  %762 = vst.msk [vmem:[#allocation2 + $0x68] sm:$0xf0] %vm277_vm0, %v2022_v55  ;;  %v2023_v59 = vld [vmem:[%s2119_s27 + $0x28] sm:$0x1e]  }
  0x38   : > { %333 = vst.msk [vmem:[#allocation2 + $0x10] sm:$0xf0] %vm277_vm0, %v331_v29  ;;  %v2024_v60 = vld [vmem:[%s2119_s27 + $0x28] sm:$0x1f]   ;;  %v716_v62 = vrot.slane %v2023_v59, 5 }
  0x39   : > { %513 = vst.msk [vmem:[#allocation2 + $0x30] sm:$0xf0] %vm277_vm0, %v511_v39  ;;  %v633_v63 = vshrl.u32 %v2024_v60, 16  ;;  %v635_v0 = vshll.u32 %v2024_v60, 16  ;;  %v2027_v2 = vld [vmem:[%s2119_s27 + $0x28] ss:$0 sps:$4 sm:$0xff]  }
  0x3a   : > { %649 = vrot.lane.b32.xlu1 %v648_v30, %s2069_s30  ;;  %603 = vrot.lane.b32.xlu0 %v602_v53, %s2069_s30  ;;  %v1656_v30 = vld [vmem:[%s2119_s27 + $0x20] sm:$0xf]  ;;  %v532_v53 = vrot.slane %v530_v47, 4  ;;  %435 = vst.msk [vmem:[#allocation2 + $0x38] sm:$0xf] %vm173_vm1, %v433_v56  ;;  %v2030_v59 = vld [vmem:[%s2424_s1 + $0x108] sm:$0xff]  }
  0x3b   : > { %450 = vst.msk [vmem:[#allocation2 + $0x40] sm:$0xf] %vm173_vm1, %v1656_v30  ;;  %616 = vst.msk [vmem:[#allocation2 + $0x58] sm:$0xf] %vm173_vm1, %v614_v57  ;;  %v637_v4 = vrot.slane %v635_v0, 1 }
  0x3c   : > { %718 = vst.msk [vmem:[#allocation2 + $0x58] sm:$0xf0] %vm277_vm0, %v716_v62  ;;  %689 = vst.msk [vmem:[#allocation2 + $0x50] sm:$0xf0] %vm277_vm0, %v2027_v2  ;;  %v2028_v7 = vld [vmem:[%s2119_s27 + $0x30] sm:$0x1e]  }
  0x3d   : > { %v2029_v11 = vld [vmem:[%s2119_s27 + $0x48] ss:$0 sps:$4 sm:$0xff]   ;;  %v819_v12 = vrot.slane %v2028_v7, 1  ;;  %v2031_v14 = vld [vmem:[%s2119_s27 + $0x38] sm:$0x1e]  }
  0x3e   : > { %752 = vrot.lane.b32.xlu1 %v751_v33, %s2069_s30  ;;  %705 = vrot.lane.b32.xlu0 %v704_v61, %s2069_s30  ;;  %v2011_v33 = vld [vmem:[%s2424_s1 + $0x30] sm:$0xff]   ;;  %v1687_v61 = vld [vmem:[%s2119_s27 + $0x20] sm:$0xf]  ;;  %967 = vst.msk [vmem:[#allocation2 + $0x90] sm:$0xf0] %vm277_vm0, %v2029_v11  ;;  %v921_v17 = vrot.slane %v2031_v14, 5 }
  0x3f   : > { %1836 = vmatpush3.bf16.msra.mxu0 %v2011_v33  ;;  %588 = vst.msk [vmem:[#allocation2 + $0x50] sm:$0xf] %vm173_vm1, %v1687_v61  ;;  %821 = vst.msk [vmem:[#allocation2 + $0x80] sm:$0xf] %vm173_vm1, %v819_v12  ;;  %v2032_v15 = vld [vmem:[%s2119_s27 + $0x38] sm:$0x1f]  }
  0x40   : > { %1837 = vmatprep.subr.bf16.mxu0 %v2016_v38  ;;  %v1733_v16 = vld [vmem:[%s2119_s27 + $0x30] sm:$0xf]  ;;  %v838_v18 = vshrl.u32 %v2032_v15, 16  ;;  %v840_v19 = vshll.u32 %v2032_v15, 16  ;;  %v2033_v20 = vld [vmem:[%s2119_s27 + $0x40] sm:$0x1f]  }
  0x41   : > { %793 = vst.msk [vmem:[#allocation2 + $0x78] sm:$0xf] %vm173_vm1, %v1733_v16  ;;  %v940_v23 = vshrl.u32 %v2033_v20, 16  ;;  %v943_v24 = vshll.u32 %v2033_v20, 16  ;;  %v2037_v28 = vld [vmem:[%s2119_s27 + $0x10] sm:$0x1e]  }
  0x42   : > { %875 = vrot.lane.b32.xlu1 %v874_v1, %s2069_s30  ;;  %826 = vrot.lane.b32.xlu0 %v1970_v3, %s2069_s30  ;;  %v2026_v1 = vld [vmem:[%s2119_s27 + $0x30] sm:$0x1f]   ;;  %v1748_v3 = vld [vmem:[%s2119_s27 + $0x40] sm:$0xf]  ;;  %923 = vst.msk [vmem:[#allocation2 + $0x80] sm:$0xf0] %vm277_vm0, %v921_v17 }
  0x43   : > { %1838 = vmatpush3.bf16.msra.mxu0 %v2017_v40  ;;  %v735_v5 = vshrl.u32 %v2026_v1, 16  ;;  %v738_v6 = vshll.u32 %v2026_v1, 16  ;;  %860 = vst.msk [vmem:[#allocation2 + $0x90] sm:$0xf] %vm173_vm1, %v1748_v3  ;;  %v842_v22 = vrot.slane %v840_v19, 1  ;;  %v942_v26 = vrot.slane %v940_v23, 4 }
  0x44   : > { %1911 = vmatprep.subr.bf16.mxu0 %v2308_v52  ;;  %v2038_v29 = vld [vmem:[%s2119_s27 + $0x18] sm:$0x1e]   ;;  %v269_v31 = vrot.slane %v2037_v28, 1  ;;  %v2039_v32 = vld [vmem:[%s2119_s27 + $0x30] sm:$0x1e]  }
  0x45   : > { %v737_v9 = vrot.slane %v735_v5, 4  ;;  %v843_v25 = vor.u32 %v842_v22, %v838_v18  ;;  %v379_v33 = vrot.slane %v2038_v29, 5  ;;  %v681_v34 = vrot.slane %v2039_v32, 1  ;;  %v2040_v35 = vld [vmem:[%s2119_s27 + $0x38] sm:$0x1e]  }
  0x46   : > { %983 = vrot.lane.b32.xlu1 %v982_v8, %s2069_s30  ;;  %928 = vrot.lane.b32.xlu0 %v1972_v10, %s2069_s30  ;;  %v638_v8 = vor.u32 %v637_v4, %v633_v63  ;;  %v740_v10 = vrot.slane %v738_v6, 5  ;;  %271 = vst.msk [vmem:[#allocation2 + $0x20] sm:$0xf] %vm173_vm1, %v269_v31  ;;  %v2041_v36 = vld [vmem:[%s2119_s27 + $0x20] sm:$0x1e]   ;;  %v789_v37 = vrot.slane %v2040_v35, 5 }
  0x47   : > { %845 = vst.msk [vmem:[#allocation2 + $0x88] sm:$0xf] %vm173_vm1, %v843_v25  ;;  %683 = vst.msk [vmem:[#allocation2 + $0x70] sm:$0xf] %vm173_vm1, %v681_v34  ;;  %v2042_v38 = vld [vmem:[%s2119_s27 + $0x28] sm:$0x1e]  }
  0x48   : > { %640 = vst.msk [vmem:[#allocation2 + $0x60] sm:$0xf] %vm173_vm1, %v638_v8  ;;  %v741_v13 = vor.u32 %v740_v10, %v737_v9  ;;  %v476_v39 = vrot.slane %v2041_v36, 1  ;;  %v584_v40 = vrot.slane %v2042_v38, 5  ;;  %v2043_v41 = vld [vmem:[%s2119_s27 + $0x40] sm:$0x1e]  }
  0x49   : > { %381 = vst.msk [vmem:[#allocation2 + $0x20] sm:$0xf0] %vm277_vm0, %v379_v33  ;;  %791 = vst.msk [vmem:[#allocation2 + $0x70] sm:$0xf0] %vm277_vm0, %v789_v37  ;;  %v2044_v42 = vld [vmem:[%s2119_s27 + $0x48] sm:$0x1e]  }
  0x4a   : > { %854 = vrot.lane.b32.xlu1 %v853_v48, %s2069_s30  ;;  %808 = vrot.lane.b32.xlu0 %v807_v21, %s2069_s30  ;;  %v533_v48 = vshll.u32 %v2019_v43, 16  ;;  %743 = vst.msk [vmem:[#allocation2 + $0x60] sm:$0xf0] %vm277_vm0, %v741_v13  ;;  %v2035_v21 = vld [vmem:[%s2119_s27 + $0x38] ss:$0 sps:$4 sm:$0xff]   ;;  %v886_v43 = vrot.slane %v2043_v41, 1 }
  0x4b   : > { %894 = vst.msk [vmem:[#allocation2 + $0x78] sm:$0xf0] %vm277_vm0, %v2035_v21  ;;  %586 = vst.msk [vmem:[#allocation2 + $0x48] sm:$0xf0] %vm277_vm0, %v584_v40  ;;  %v994_v44 = vrot.slane %v2044_v42, 5  ;;  %v2034_v63 = vld [vmem:[%s2424_s1 + $0x110] sm:$0xff]  }
  0x4c   : > { %478 = vst.msk [vmem:[#allocation2 + $0x48] sm:$0xf] %vm173_vm1, %v476_v39  ;;  %888 = vst.msk [vmem:[#allocation2 + $0x98] sm:$0xf] %vm173_vm1, %v886_v43  ;;  %v2036_v4 = vld [vmem:[%s2424_s1 + $0x118] sm:$0xff]  }
  0x4d   : > { %996 = vst.msk [vmem:[#allocation2 + $0x98] sm:$0xf0] %vm277_vm0, %v994_v44  ;;  %v1779_v43 = vld [vmem:[%s2425_s2] ss:$0 sm:$0xff] }
  0x4e   : > { %957 = vrot.lane.b32.xlu1 %v956_v54, %s2069_s30  ;;  %910 = vrot.lane.b32.xlu0 %v909_v27, %s2069_s30  ;;  %v535_v54 = vrot.slane %v533_v48, 5  ;;  %v945_v27 = vrot.slane %v943_v24, 5 }
  0x50   : > { %v536_v58 = vor.u32 %v535_v54, %v532_v53  ;;  %v946_v30 = vor.u32 %v945_v27, %v942_v26  ;;  %v1001_v32 = vld [vmem:[#allocation2 + $0x20] sm:$0xff] }
  0x52   : > { %538 = vst.msk [vmem:[#allocation2 + $0x38] sm:$0xf0] %vm277_vm0, %v536_v58  ;;  %948 = vst.msk [vmem:[#allocation2 + $0x88] sm:$0xf0] %vm277_vm0, %v946_v30  ;;  %v1011_v30 = vld [vmem:[#allocation2 + $0x70] sm:$0xff] }
  0x53   : > { %v1006_v35 = vld [vmem:[#allocation2 + $0x48] sm:$0xff] }
  0x54   : > { %v1016_v34 = vld [vmem:[#allocation2 + $0x98] sm:$0xff] }
  0x84   : > { %v314_v45 = vpop.permute.xlu1 %313  ;;  %v210_v46 = vpop.permute.xlu0 %209 }
  0x85   : > { %316 = vst.msk [vmem:[#allocation2 + $0x8] sm:$0xf0] %vm297_vm2, %v314_v45 }
  0x86   : > { %212 = vst.msk [vmem:[#allocation2 + $0x8] sm:$0xf] %vm192_vm3, %v210_v46 }
  0x88   : > { %v238_v47 = vpop.permute.xlu1 %237  ;;  %v417_v48 = vpop.permute.xlu0 %416 }
  0x89   : > { %240 = vst.msk [vmem:[#allocation2 + $0x10] sm:$0xf] %vm192_vm3, %v238_v47  ;;  %419 = vst.msk [vmem:[#allocation2 + $0x30] sm:$0xf] %vm192_vm3, %v417_v48 }
  0x8c   : > { %v343_v49 = vpop.permute.xlu1 %342  ;;  %v259_v51 = vpop.permute.xlu0 %258 }
  0x8d   : > { %345 = vst.msk [vmem:[#allocation2 + $0x10] sm:$0xf0] %vm297_vm2, %v343_v49  ;;  %v998_v50 = vld [vmem:[#allocation2 + $0x8] sm:$0xff] }
  0x8e   : > { %1357 = vmatprep.mubr.bf16.mxu0 %v998_v50  ;;  %261 = vst.msk [vmem:[#allocation2 + $0x18] sm:$0xf] %vm192_vm3, %v259_v51 }
  0x90   : > { %v369_v53 = vpop.permute.xlu1 %368  ;;  %v190_v54 = vpop.permute.xlu0 %189 }
  0x91   : > { %371 = vst.msk [vmem:[#allocation2 + $0x18] sm:$0xf0] %vm297_vm2, %v369_v53 }
  0x92   : > { %193 = vst.msk [vmem:[#allocation2] sm:$0xf] %vm192_vm3, %v190_v54 }
  0x94   : > { %v466_v55 = vpop.permute.xlu1 %465  ;;  %v295_v56 = vpop.permute.xlu0 %294  ;;  %v999_v60 = vld [vmem:[#allocation2 + $0x10] sm:$0xff] }
  0x95   : > { %468 = vst.msk [vmem:[#allocation2 + $0x40] sm:$0xf] %vm192_vm3, %v466_v55 }
  0x96   : > { %298 = vst.msk [vmem:[#allocation2] sm:$0xf0] %vm297_vm2, %v295_v56 }
  0x98   : > { %v574_v57 = vpop.permute.xlu1 %573  ;;  %v1000_v58 = vld [vmem:[#allocation2 + $0x18] sm:$0xff]  ;;  %v519_v61 = vpop.permute.xlu0 %518 }
  0x99   : > { %576 = vst.msk [vmem:[#allocation2 + $0x40] sm:$0xf0] %vm297_vm2, %v574_v57  ;;  %1422 = vmatprep.mubr.bf16.mxu1 %v1000_v58  ;;  %521 = vst.msk [vmem:[#allocation2 + $0x30] sm:$0xf0] %vm297_vm2, %v519_v61 }
  0x9a   : > { %1423 = vmatmul.mubr.bf16.vlgmr.msra.gmra.mrb[0].mxu1 %v999_v60 }
  0x9b   : > { %1931 = vmatpush3.bf16.msra.mxu1 %v2308_v52 }
  0x9c   : > { %v445_v62 = vpop.permute.xlu1 %444  ;;  %1928 = vmatprep.subr.bf16.mxu1 %v2030_v59  ;;  %v399_v0 = vpop.permute.xlu0 %398 }
  0x9d   : > { %447 = vst.msk [vmem:[#allocation2 + $0x38] sm:$0xf] %vm192_vm3, %v445_v62  ;;  %v997_v1 = vld [vmem:[#allocation2] sm:$0xff]  ;;  %401 = vst.msk [vmem:[#allocation2 + $0x28] sm:$0xf] %vm192_vm3, %v399_v0 }
  0x9e   : > { %1358 = vmatmul.mubr.bf16.vlgmr.msra.gmra.mrb[0].mxu0 %v997_v1 }
  0x9f   : > { %1932 = vmatpush3.bf16.msra.mxu1 %v2030_v59  ;;  %1912 = vmatpush3.bf16.msra.mxu0 %v2308_v52 }
  0xa0   : > { %v548_v2 = vpop.permute.xlu1 %547  ;;  %v1005_v3 = vld [vmem:[#allocation2 + $0x40] sm:$0xff]  ;;  %1929 = vmatprep.subr.bf16.mxu1 %v2034_v63  ;;  %1913 = vmatprep.subr.bf16.mxu0 %v2030_v59  ;;  %v501_v5 = vpop.permute.xlu0 %500  ;;  %v1003_v6 = vld [vmem:[#allocation2 + $0x30] sm:$0xff] }
  0xa1   : > { %550 = vst.msk [vmem:[#allocation2 + $0x38] sm:$0xf0] %vm297_vm2, %v548_v2  ;;  %1430 = vmatprep.mubr.bf16.mxu1 %v1005_v3  ;;  %503 = vst.msk [vmem:[#allocation2 + $0x28] sm:$0xf0] %vm297_vm2, %v501_v5  ;;  %1365 = vmatprep.mubr.bf16.mxu0 %v1003_v6 }
  0xa3   : > { %1933 = vmatpush3.bf16.msra.mxu1 %v2034_v63  ;;  %1914 = vmatpush3.bf16.msra.mxu0 %v2030_v59 }
  0xa4   : > { %v671_v7 = vpop.permute.xlu1 %670  ;;  %1930 = vmatprep.subr.bf16.mxu1 %v2036_v4  ;;  %1915 = vmatprep.subr.bf16.mxu0 %v2034_v63  ;;  %v622_v8 = vpop.permute.xlu0 %621 }
  0xa5   : > { %673 = vst.msk [vmem:[#allocation2 + $0x68] sm:$0xf] %vm192_vm3, %v671_v7  ;;  %624 = vst.msk [vmem:[#allocation2 + $0x58] sm:$0xf] %vm192_vm3, %v622_v8 }
  0xa7   : > { %1934 = vmatpush3.bf16.msra.mxu1 %v2036_v4  ;;  %1916 = vmatpush3.bf16.msra.mxu0 %v2034_v63 }
  0xa8   : > { %v779_v9 = vpop.permute.xlu1 %778  ;;  %v1004_v10 = vld [vmem:[#allocation2 + $0x38] sm:$0xff]  ;;  %1917 = vmatprep.subr.bf16.mxu0 %v2036_v4  ;;  %v724_v52 = vpop.permute.xlu0 %723  ;;  %v1002_v11 = vld [vmem:[#allocation2 + $0x28] sm:$0xff] }
  0xa9   : > { %781 = vst.msk [vmem:[#allocation2 + $0x68] sm:$0xf0] %vm297_vm2, %v779_v9  ;;  %1431 = vmatmul.mubr.bf16.gmra.mrb[4].mxu1 %v1004_v10  ;;  %726 = vst.msk [vmem:[#allocation2 + $0x58] sm:$0xf0] %vm297_vm2, %v724_v52  ;;  %1366 = vmatmul.mubr.bf16.gmra.mrb[4].mxu0 %v1002_v11 }
  0xab   : > { %1918 = vmatpush3.bf16.msra.mxu0 %v2036_v4 }
  0xac   : > { %v650_v12 = vpop.permute.xlu1 %649  ;;  %v604_v13 = vpop.permute.xlu0 %603 }
  0xad   : > { %652 = vst.msk [vmem:[#allocation2 + $0x60] sm:$0xf] %vm192_vm3, %v650_v12  ;;  %606 = vst.msk [vmem:[#allocation2 + $0x50] sm:$0xf] %vm192_vm3, %v604_v13 }
  0xb0   : > { %v753_v14 = vpop.permute.xlu1 %752  ;;  %v1010_v15 = vld [vmem:[#allocation2 + $0x68] sm:$0xff]  ;;  %v706_v16 = vpop.permute.xlu0 %705  ;;  %v1008_v17 = vld [vmem:[#allocation2 + $0x58] sm:$0xff] }
  0xb1   : > { %755 = vst.msk [vmem:[#allocation2 + $0x60] sm:$0xf0] %vm297_vm2, %v753_v14  ;;  %1438 = vmatprep.mubr.bf16.mxu1 %v1010_v15  ;;  %708 = vst.msk [vmem:[#allocation2 + $0x50] sm:$0xf0] %vm297_vm2, %v706_v16  ;;  %1373 = vmatprep.mubr.bf16.mxu0 %v1008_v17 }
  0xb4   : > { %v876_v18 = vpop.permute.xlu1 %875  ;;  %v827_v19 = vpop.permute.xlu0 %826 }
  0xb5   : > { %878 = vst.msk [vmem:[#allocation2 + $0x90] sm:$0xf] %vm192_vm3, %v876_v18  ;;  %829 = vst.msk [vmem:[#allocation2 + $0x80] sm:$0xf] %vm192_vm3, %v827_v19 }
  0xb8   : > { %v984_v20 = vpop.permute.xlu1 %983  ;;  %v1009_v21 = vld [vmem:[#allocation2 + $0x60] sm:$0xff]  ;;  %v929_v22 = vpop.permute.xlu0 %928  ;;  %v1007_v23 = vld [vmem:[#allocation2 + $0x50] sm:$0xff] }
  0xb9   : > { %986 = vst.msk [vmem:[#allocation2 + $0x90] sm:$0xf0] %vm297_vm2, %v984_v20  ;;  %1439 = vmatmul.mubr.bf16.gmra.mrb[8].mxu1 %v1009_v21  ;;  %931 = vst.msk [vmem:[#allocation2 + $0x80] sm:$0xf0] %vm297_vm2, %v929_v22  ;;  %1374 = vmatmul.mubr.bf16.gmra.mrb[8].mxu0 %v1007_v23 }
  0xbc   : > { %v855_v24 = vpop.permute.xlu1 %854  ;;  %v809_v25 = vpop.permute.xlu0 %808 }
  0xbd   : > { %857 = vst.msk [vmem:[#allocation2 + $0x88] sm:$0xf] %vm192_vm3, %v855_v24  ;;  %811 = vst.msk [vmem:[#allocation2 + $0x78] sm:$0xf] %vm192_vm3, %v809_v25 }
  0xc0   : > { %v958_v26 = vpop.permute.xlu1 %957  ;;  %v1015_v27 = vld [vmem:[#allocation2 + $0x90] sm:$0xff]  ;;  %v911_v28 = vpop.permute.xlu0 %910  ;;  %v1013_v29 = vld [vmem:[#allocation2 + $0x80] sm:$0xff] }
  0xc1   : > { %960 = vst.msk [vmem:[#allocation2 + $0x88] sm:$0xf0] %vm297_vm2, %v958_v26  ;;  %1446 = vmatprep.mubr.bf16.mxu1 %v1015_v27  ;;  %913 = vst.msk [vmem:[#allocation2 + $0x78] sm:$0xf0] %vm297_vm2, %v911_v28  ;;  %1381 = vmatprep.mubr.bf16.mxu0 %v1013_v29 }
  0xc8   : > { %v1014_v31 = vld [vmem:[#allocation2 + $0x88] sm:$0xff]  ;;  %v1012_v33 = vld [vmem:[#allocation2 + $0x78] sm:$0xff] }
  0xc9   : > { %1447 = vmatmul.mubr.bf16.gmra.mrb[12].mxu1 %v1014_v31  ;;  %1382 = vmatmul.mubr.bf16.gmra.mrb[12].mxu0 %v1012_v33 }
  0xca   : > { %1923 = vmatprep.mubr.msk.bf16.mxu1 %vm1312_vm4, %v1011_v30  ;;  %1919 = vmatprep.mubr.msk.bf16.mxu0 %vm1312_vm4, %v1001_v32 }
  0xd1   : > { %1924 = vmatmul.mubr.msk.bf16.vlgmr.msra.gmra.mrb[16].mxu1 %vm1312_vm4, %v1016_v34  ;;  %1920 = vmatmul.mubr.msk.bf16.vlgmr.msra.gmra.mrb[16].mxu0 %vm1312_vm4, %v1006_v35 }
 0x16d   : > { %v1879_v36 = vpop.f32.mrb[0].mxu1 }
 0x16e   : > { %v1880_v37 = vpop.f32.mrb[1].mxu1 }
 0x16f   : > { %v1881_v38 = vadd.f32 %v1880_v37, %v1879_v36  ;;  %v1882_v39 = vpop.f32.mrb[2].mxu1 }
 0x170   : > { %v1883_v40 = vpop.f32.mrb[3].mxu1 }
 0x171   : > { %v1884_v41 = vadd.f32 %v1883_v40, %v1882_v39  ;;  %v1839_v42 = vpop.f32.mrb[0].mxu0 }
 0x172   : > { %v1840_v44 = vpop.f32.mrb[1].mxu0 }
 0x173   : > { %v1841_v45 = vadd.f32 %v1840_v44, %v1839_v42  ;;  %v1842_v46 = vpop.f32.mrb[2].mxu0 }
 0x174   : > { %v1843_v47 = vpop.f32.mrb[3].mxu0 }
 0x175   : > { %v1360_v48 = vadd.f32 %v1841_v45, %v1779_v43  ;;  %v1844_v49 = vadd.f32 %v1843_v47, %v1842_v46 }
 0x177   : > { %v1363_v50 = vadd.f32 %v1844_v49, %v1779_v43  ;;  %v1425_v51 = vadd.f32 %v1881_v38, %v1360_v48 }
 0x179   : > { %v2405_v53 = vadd.f32 %v1884_v41, %v1363_v50 }
 0x17c   : > { %v1885_v54 = vpop.f32.mrb[4].mxu1  ;;  %v1845_v58 = vpop.f32.mrb[4].mxu0 }
 0x17d   : > { %v1886_v55 = vpop.f32.mrb[5].mxu1  ;;  %v1846_v60 = vpop.f32.mrb[5].mxu0 }
 0x17e   : > { %v1887_v56 = vadd.f32 %v1886_v55, %v1885_v54  ;;  %v1888_v57 = vpop.f32.mrb[6].mxu1  ;;  %v1847_v62 = vadd.f32 %v1846_v60, %v1845_v58  ;;  %v1848_v63 = vpop.f32.mrb[6].mxu0 }
 0x17f   : > { %v1889_v59 = vpop.f32.mrb[7].mxu1  ;;  %v1849_v0 = vpop.f32.mrb[7].mxu0 }
 0x180   : > { %v1890_v61 = vadd.f32 %v1889_v59, %v1888_v57  ;;  %v1368_v1 = vadd.f32 %v1847_v62, %v1779_v43  ;;  %v1850_v2 = vadd.f32 %v1849_v0, %v1848_v63 }
 0x182   : > { %v1371_v3 = vadd.f32 %v1850_v2, %v1779_v43  ;;  %v1433_v4 = vadd.f32 %v1887_v56, %v1368_v1 }
 0x184   : > { %v1436_v5 = vadd.f32 %v1890_v61, %v1371_v3 }
 0x18c   : > { %v1891_v6 = vpop.f32.mrb[8].mxu1  ;;  %v1851_v10 = vpop.f32.mrb[8].mxu0 }
 0x18d   : > { %v1892_v7 = vpop.f32.mrb[9].mxu1  ;;  %v1852_v11 = vpop.f32.mrb[9].mxu0 }
 0x18e   : > { %v1893_v8 = vadd.f32 %v1892_v7, %v1891_v6  ;;  %v1894_v9 = vpop.f32.mrb[10].mxu1  ;;  %v1853_v13 = vadd.f32 %v1852_v11, %v1851_v10  ;;  %v1854_v14 = vpop.f32.mrb[10].mxu0 }
 0x18f   : > { %v1895_v52 = vpop.f32.mrb[11].mxu1  ;;  %v1855_v15 = vpop.f32.mrb[11].mxu0 }
 0x190   : > { %v1896_v12 = vadd.f32 %v1895_v52, %v1894_v9  ;;  %v1376_v16 = vadd.f32 %v1853_v13, %v1779_v43  ;;  %v1856_v17 = vadd.f32 %v1855_v15, %v1854_v14 }
 0x192   : > { %v1379_v18 = vadd.f32 %v1856_v17, %v1779_v43  ;;  %v1441_v19 = vadd.f32 %v1893_v8, %v1376_v16 }
 0x194   : > { %v1444_v20 = vadd.f32 %v1896_v12, %v1379_v18 }
 0x19c   : > { %v1897_v21 = vpop.f32.mrb[12].mxu1  ;;  %v1857_v25 = vpop.f32.mrb[12].mxu0 }
 0x19d   : > { %v1898_v22 = vpop.f32.mrb[13].mxu1  ;;  %v1858_v27 = vpop.f32.mrb[13].mxu0 }
 0x19e   : > { %v1899_v23 = vadd.f32 %v1898_v22, %v1897_v21  ;;  %v1900_v24 = vpop.f32.mrb[14].mxu1  ;;  %v1859_v29 = vadd.f32 %v1858_v27, %v1857_v25  ;;  %v1860_v30 = vpop.f32.mrb[14].mxu0 }
 0x19f   : > { %v1901_v26 = vpop.f32.mrb[15].mxu1  ;;  %v1861_v31 = vpop.f32.mrb[15].mxu0 }
 0x1a0   : > { %v1902_v28 = vadd.f32 %v1901_v26, %v1900_v24  ;;  %v1384_v32 = vadd.f32 %v1859_v29, %v1779_v43  ;;  %v1862_v33 = vadd.f32 %v1861_v31, %v1860_v30 }
 0x1a2   : > { %v1387_v35 = vadd.f32 %v1862_v33, %v1779_v43  ;;  %v1449_v36 = vadd.f32 %v1899_v23, %v1384_v32 }
 0x1a4   : > { %v1925_v34 = vpop.f32.mrb[16].mxu1  ;;  %v1921_v40 = vpop.f32.mrb[16].mxu0  ;;  %v1452_v42 = vadd.f32 %v1902_v28, %v1387_v35 }
 0x1a5   : > { %v1505_v37 = vpop.f32.mrb[17].mxu1  ;;  %v1514_v41 = vadd.f32 %v1925_v34, %v1449_v36  ;;  %v1498_v45 = vadd.f32 %v1921_v40, %v1433_v4  ;;  %v1489_v46 = vpop.f32.mrb[17].mxu0 }
 0x1a6   : > { %v1506_v38 = vadd.f32 %v1505_v37, %v1441_v19  ;;  %v1926_v39 = vpop.f32.mrb[18].mxu1  ;;  %v1490_v48 = vadd.f32 %v1489_v46, %v1425_v51  ;;  %v1922_v49 = vpop.f32.mrb[18].mxu0 }
 0x1a7   : > { %v1508_v44 = vpop.f32.mrb[19].mxu1  ;;  %v1517_v50 = vadd.f32 %v1926_v39, %v1452_v42  ;;  %v1501_v54 = vadd.f32 %v1922_v49, %v1436_v5  ;;  %v1492_v43 = vpop.f32.mrb[19].mxu0 }
 0x1a8   : > { %2045 = vtanh.f32 %v1506_v38  ;;  %v1509_v47 = vadd.f32 %v1508_v44, %v1444_v20  ;;  %v1493_v55 = vadd.f32 %v1492_v43, %v2405_v53 }
 0x1a9   : > { %2047 = vtanh.f32 %v1514_v41 }
 0x1aa   : > { %2049 = vtanh.f32 %v1498_v45 }
 0x1ab   : > { %2051 = vtanh.f32 %v1490_v48 }
 0x1ac   : > { %2053 = vtanh.f32 %v1501_v54 }
 0x1ad   : > { %2055 = vtanh.f32 %v1517_v50 }
 0x1ae   : > { %2057 = vtanh.f32 %v1493_v55 }
 0x1af   : > { %2059 = vtanh.f32 %v1509_v47 }
 0x1b2   : > { %v2046_v56 = vpop.eup %2045 }
 0x1b3   : > { %v2048_v51 = vpop.eup %2047  ;;  %1533 = vst.msk [vmem:[%s170_s23 + $0x20] sm:$0xff] %vm1528_vm5, %v2046_v56 }
 0x1b4   : > { %v2050_v57 = vpop.eup %2049  ;;  %1535 = vst.msk [vmem:[%s170_s23 + $0x30] sm:$0xff] %vm1528_vm5, %v2048_v51 }
 0x1b5   : > { %v2052_v58 = vpop.eup %2051  ;;  %1531 = vst.msk [vmem:[%s170_s23 + $0x10] sm:$0xff] %vm1528_vm5, %v2050_v57 }
 0x1b6   : > { %v2054_v53 = vpop.eup %2053  ;;  %1529 = vst.msk [vmem:[%s170_s23] sm:$0xff] %vm1528_vm5, %v2052_v58 }
 0x1b7   : > { %v2056_v59 = vpop.eup %2055  ;;  %1532 = vst.msk [vmem:[%s170_s23 + $0x18] sm:$0xff] %vm1528_vm5, %v2054_v53 }
 0x1b8   : > { %v2058_v60 = vpop.eup %2057  ;;  %1536 = vst.msk [vmem:[%s170_s23 + $0x38] sm:$0xff] %vm1528_vm5, %v2056_v59 }
 0x1b9   : > { %v2060_v61 = vpop.eup %2059  ;;  %1530 = vst.msk [vmem:[%s170_s23 + $0x8] sm:$0xff] %vm1528_vm5, %v2058_v60 }
 0x1ba   : > { %1534 = vst.msk [vmem:[%s170_s23 + $0x28] sm:$0xff] %vm1528_vm5, %v2060_v61 }
 0x1bb PF: > { %s13_s12 = sadd.s32 1, %s2067_s12  }
 0x1bc   : > { %p10_p4 = scmp.ge.s32.totalorder %s13_s12, 4  }
 0x1be   :  { %12 = sbr.rel (!%p10_p4) target bundleno = 1 (0x1), region = 71 }

</bundles_post_ra>
